<compile_context>
chip_gen: v7x
topology: tpu7x:2x2x1
jax: 0.10.0
libtpu: 0.0.40
codegen_flags: <defaults>
</compile_context>

<pallas_src>
import numpy as np

import jax
import jax.numpy as jnp
from jax.experimental import pallas as pl
from jax.experimental.pallas import tpu as pltpu

LANE = 128   # lane width everything is padded to
KH = 5       # 5x5 convs
S1 = 16      # per-image row stride of the pooled conv1 activations (14 valid)
S2 = 8       # per-image row stride of the pooled conv2 activations (5 valid)


# ---------------- fused Pallas kernel ----------------

def _lenet_kernel(x_ref, cw1_ref, cb1_ref, sh1_ref, pe1_ref, po1_ref,
                  cw2_ref, cb2_ref, sh2_ref, pe2_ref, po2_ref,
                  fw1_ref, fb1_ref, selh_ref, fw2_ref, fb2_ref,
                  fw3_ref, fb3_ref, o_ref):
    """Whole LeNet forward for one batch tile; all intermediates stay in VMEM.

    Layouts (everything lane-padded to 128, per-image rows stacked in the
    sublane direction):
      x_ref   : (B*32, 128)   row = img*32 + h,  lane = w*3  + cin
      a1      : (B*16, 128)   row = img*16 + h1, lane = w1*6 + c1   (14 valid)
      a2      : (B*8, 128)    row = img*8  + h2, lane = w2*16 + c2  (5 valid)
      o_ref   : (B, 128)      lanes 0..9 = logits
    Conv H-offsets, 2x2 pooling and torch's NCHW flatten for fc1 are all
    expressed as precomputed 0/1 selection matmuls (resident bf16 constants).
    """
    f32, bf16 = jnp.float32, jnp.bfloat16

    def mm(a, b):                       # bf16 x bf16 -> f32 MXU matmul
        return jnp.dot(a, b, preferred_element_type=f32)

    def sel(m, a):                      # exact 0/1 row-selection matmul
        return mm(m, a).astype(bf16)

    def conv_relu_pool(a, w_ref, b_ref, sh_ref, pe_ref, po_ref):
        # a: (rows, 128) bf16 merged activation slab.
        # w_ref: (KH, 128, 256) banded (Toeplitz) bf16 conv weights, columns
        #        ordered (w-parity, pooled-w, Cout); b_ref: (1, 256) f32 bias.
        acc = mm(a, w_ref[0])
        for d in range(1, KH):          # remaining kh-1 row offsets
            acc += mm(sel(sh_ref[d - 1], a), w_ref[d])
        acc = jnp.maximum(acc + b_ref[...], 0.0)                  # bias + ReLU
        half = acc.shape[1] // 2
        z = jnp.maximum(acc[:, :half], acc[:, half:]).astype(bf16)  # W pool
        return jnp.maximum(sel(pe_ref[...], z), sel(po_ref[...], z))  # H pool

    x = x_ref[...]                                                # bf16 slab
    a1 = conv_relu_pool(x, cw1_ref, cb1_ref, sh1_ref, pe1_ref, po1_ref)
    a2 = conv_relu_pool(a1, cw2_ref, cb2_ref, sh2_ref, pe2_ref, po2_ref)

    # fc1: gather the 5 pooled rows per image (selh) and fold torch's NCHW
    # .view(-1, 400) order into the (KH, 128, 128) weight stack.
    h = mm(sel(selh_ref[0], a2), fw1_ref[0])
    for r in range(1, KH):
        h += mm(sel(selh_ref[r], a2), fw1_ref[r])                 # (B, 128)
    h = jnp.maximum(h + fb1_ref[...], 0.0).astype(bf16)           # fc1 + ReLU
    h = jnp.maximum(mm(h, fw2_ref[...]) + fb2_ref[...], 0.0).astype(bf16)
    o_ref[...] = (mm(h, fw3_ref[...]) + fb3_ref[...]).astype(o_ref.dtype)


# ---------------- one-time parameter preparation (numpy, outside jit) -------

def _conv_banded(w_oihw, bias, in_w):
    """Banded (Toeplitz) matrices for a valid 5x5 conv on the merged
    (H, W*Cin) layout; output columns ordered (w-parity, pooled-w, Cout) and
    zero-padded to 128 lanes per parity half, which fuses the W half of the
    2x2 max-pool into a max of two contiguous 128-lane halves."""
    w = np.asarray(w_oihw, np.float32)          # (Cout, Cin, kh, kw) torch
    b = np.asarray(bias, np.float32)
    cout, cin, kh, kw = w.shape
    assert kh == kw == KH
    ow2 = (in_w - kw + 1) // 2
    assert in_w * cin <= LANE and ow2 * cout <= LANE
    mats = np.zeros((kh, LANE, 2 * LANE), np.float32)
    bvec = np.zeros((1, 2 * LANE), np.float32)
    for p in range(2):                          # parity of the conv output col
        for j in range(ow2):                    # pooled output column
            col = p * LANE + j * cout
            bvec[0, col:col + cout] = b
            for dh in range(kh):
                for dw in range(kw):
                    for ci in range(cin):
                        row = (2 * j + p + dw) * cin + ci
                        mats[dh, row, col:col + cout] = w[:, ci, dh, dw]
    return mats, bvec


def _shift_mats(b_tile, stride, valid_rows):
    """sh[d-1] @ slab places row (img*stride + h + d) into row (img*stride + h);
    zero outside the image so per-image slabs never mix."""
    n = b_tile * stride
    sh = np.zeros((KH - 1, n, n), np.float32)
    for d in range(1, KH):
        for b in range(b_tile):
            for h in range(valid_rows - d):
                sh[d - 1, b * stride + h, b * stride + h + d] = 1.0
    return sh


def _pool_select(b_tile, in_stride, out_stride, n_out):
    """Even/odd row-selection matrices for the H half of the 2x2 max-pool."""
    pe = np.zeros((b_tile * out_stride, b_tile * in_stride), np.float32)
    po = np.zeros_like(pe)
    for b in range(b_tile):
        for r in range(n_out):
            pe[b * out_stride + r, b * in_stride + 2 * r] = 1.0
            po[b * out_stride + r, b * in_stride + 2 * r + 1] = 1.0
    return pe, po


def _fc_prep(params, b_tile):
    """Pre-transpose / pre-permute / lane-pad FC weights; torch's NCHW
    .view(-1, 400) order is folded into fc1's per-row weight stack."""
    w1 = np.asarray(params["fc1_w"], np.float32)      # (120, 400)
    w2 = np.asarray(params["fc2_w"], np.float32)      # (84, 120)
    w3 = np.asarray(params["fc3_w"], np.float32)      # (10, 84)
    b1 = np.asarray(params["fc1_b"], np.float32)
    b2 = np.asarray(params["fc2_b"], np.float32)
    b3 = np.asarray(params["fc3_b"], np.float32)

    fw1 = np.zeros((KH, LANE, LANE), np.float32)      # one 128x128 block per h
    for h in range(5):
        for wq in range(5):
            for c in range(16):
                # activation lane (w*16 + c)  <->  torch flat index c*25+h*5+w
                fw1[h, wq * 16 + c, :120] = w1[:, c * 25 + h * 5 + wq]
    selh = np.zeros((KH, b_tile, b_tile * S2), np.float32)
    for h in range(KH):
        for b in range(b_tile):
            selh[h, b, b * S2 + h] = 1.0
    fb1 = np.zeros((1, LANE), np.float32); fb1[0, :120] = b1
    fw2 = np.zeros((LANE, LANE), np.float32); fw2[:120, :84] = w2.T
    fb2 = np.zeros((1, LANE), np.float32); fb2[0, :84] = b2
    fw3 = np.zeros((LANE, LANE), np.float32); fw3[:84, :10] = w3.T
    fb3 = np.zeros((1, LANE), np.float32); fb3[0, :10] = b3
    return fw1, fb1, selh, fw2, fb2, fw3, fb3


def prepare_params(params, b_tile=8):
    """One-time (outside jit) conversion of torch-layout params into resident
    kernel constants for a fixed batch tile.  b_tile=8 -> conv1 matmuls see
    M=256 (v6e/v7x MXU target; v5e runs them as two clean 128-row passes)."""
    assert b_tile % 8 == 0, "b_tile must be a multiple of 8 (sublane tiling)"
    cw1, cb1 = _conv_banded(params["conv1_w"], params["conv1_b"], in_w=32)
    cw2, cb2 = _conv_banded(params["conv2_w"], params["conv2_b"], in_w=14)
    sh1 = _shift_mats(b_tile, 32, 32)
    sh2 = _shift_mats(b_tile, S1, 14)
    pe1, po1 = _pool_select(b_tile, 32, S1, 14)
    pe2, po2 = _pool_select(b_tile, S1, S2, 5)
    fw1, fb1, selh, fw2, fb2, fw3, fb3 = _fc_prep(params, b_tile)
    bf = lambda a: jnp.asarray(a, jnp.bfloat16)
    f32 = lambda a: jnp.asarray(a, jnp.float32)
    return {
        "cw1": bf(cw1), "cb1": f32(cb1), "sh1": bf(sh1),
        "pe1": bf(pe1), "po1": bf(po1),
        "cw2": bf(cw2), "cb2": f32(cb2), "sh2": bf(sh2),
        "pe2": bf(pe2), "po2": bf(po2),
        "fw1": bf(fw1), "fb1": f32(fb1), "selh": bf(selh),
        "fw2": bf(fw2), "fb2": f32(fb2), "fw3": bf(fw3), "fb3": f32(fb3),
    }


# ---------------- forward ----------------

_PARAM_ORDER = ("cw1", "cb1", "sh1", "pe1", "po1",
                "cw2", "cb2", "sh2", "pe2", "po2",
                "fw1", "fb1", "selh", "fw2", "fb2", "fw3", "fb3")


def net_forward(prep, x_nchw):
    b_tile = prep["selh"].shape[1]                     # static under jit
    n = x_nchw.shape[0]
    n_pad = ((n + b_tile - 1) // b_tile) * b_tile
    # Tiny one-time glue: NCHW -> merged (N, 32, W*Cin), lane/batch padded,
    # flattened to one lane-dense slab and cast to bf16 (halves input DMA).
    x = jnp.transpose(x_nchw, (0, 2, 3, 1)).reshape(n, 32, 32 * 3)
    x = jnp.pad(x, ((0, n_pad - n), (0, 0), (0, LANE - 32 * 3)))
    x2d = x.reshape(n_pad * 32, LANE).astype(jnp.bfloat16)

    rows = b_tile * 32

    def resident(a):                                   # weights stay in VMEM
        nd = a.ndim
        return pl.BlockSpec(tuple(a.shape), lambda i, nd=nd: (0,) * nd)

    out = pl.pallas_call(
        _lenet_kernel,
        grid=(n_pad // b_tile,),                       # one step per batch tile
        in_specs=[pl.BlockSpec((rows, LANE), lambda i: (i, 0))] +
                 [resident(prep[k]) for k in _PARAM_ORDER],
        out_specs=pl.BlockSpec((b_tile, LANE), lambda i: (i, 0)),  # lane-dense
        out_shape=jax.ShapeDtypeStruct((n_pad, LANE), jnp.float32),
        compiler_params=pltpu.CompilerParams(
            dimension_semantics=("parallel",)),        # megacore-shardable
    )(x2d, *[prep[k] for k in _PARAM_ORDER])
    return out[:n, :10]                                # pad rows/lanes dropped


# ---------------- parameters (deterministic, torch-default-style uniform) ---

def init_params(key):
    ks = jax.random.split(key, 10)

    def u(k, shape, fan_in):
        bound = 1.0 / jnp.sqrt(jnp.float32(fan_in))
        return jax.random.uniform(k, shape, jnp.float32, -bound, bound)

    return {
        "conv1_w": u(ks[0], (6, 3, 5, 5), 3 * 5 * 5),
        "conv1_b": u(ks[1], (6,), 3 * 5 * 5),
        "conv2_w": u(ks[2], (16, 6, 5, 5), 6 * 5 * 5),
        "conv2_b": u(ks[3], (16,), 6 * 5 * 5),
        "fc1_w":   u(ks[4], (120, 400), 400),
        "fc1_b":   u(ks[5], (120,), 400),
        "fc2_w":   u(ks[6], (84, 120), 120),
        "fc2_b":   u(ks[7], (84,), 120),
        "fc3_w":   u(ks[8], (10, 84), 84),
        "fc3_b":   u(ks[9], (10,), 84),
    }


def reference_forward(params, x):
    """Plain-XLA f32 reference with identical semantics (self-check only)."""
    dn = ("NCHW", "OIHW", "NCHW")
    y = jax.lax.conv_general_dilated(x, params["conv1_w"], (1, 1), "VALID",
                                     dimension_numbers=dn)
    y = jax.nn.relu(y + params["conv1_b"][None, :, None, None])
    y = jax.lax.reduce_window(y, -jnp.inf, jax.lax.max,
                              (1, 1, 2, 2), (1, 1, 2, 2), "VALID")
    y = jax.lax.conv_general_dilated(y, params["conv2_w"], (1, 1), "VALID",
                                     dimension_numbers=dn)
    y = jax.nn.relu(y + params["conv2_b"][None, :, None, None])
    y = jax.lax.reduce_window(y, -jnp.inf, jax.lax.max,
                              (1, 1, 2, 2), (1, 1, 2, 2), "VALID")
    y = y.reshape(y.shape[0], -1)
    y = jax.nn.relu(y @ params["fc1_w"].T + params["fc1_b"])
    y = jax.nn.relu(y @ params["fc2_w"].T + params["fc2_b"])
    return y @ params["fc3_w"].T + params["fc3_b"]


if __name__ == "__main__":
    key = jax.random.PRNGKey(0)
    pkey, xkey = jax.random.split(key)
    params = init_params(pkey)
    prep = prepare_params(params, b_tile=8)           # one-time weight prep
    # Net's fc1 (16*5*5 inputs) implies a 3x32x32 (CIFAR-style) input.
    x = jax.random.normal(xkey, (2, 3, 32, 32), jnp.float32)
    out = jax.block_until_ready(jax.jit(net_forward)(prep, x))
    assert out.shape == (2, 10) and out.dtype == jnp.float32
    # Cross-check against a plain-XLA f32 reference; the 2e-2 tolerance covers
    # the bf16 dot-input path (layout bugs would show up as O(1) errors).
    ref = jax.block_until_ready(jax.jit(reference_forward)(params, x))
    np.testing.assert_allclose(np.asarray(out), np.asarray(ref),
                               rtol=2e-2, atol=2e-2)
    print("KERNEL_OK")
</pallas_src>

<mosaic_0001>
module attributes {stable_mosaic.version = 11 : i64} {
  func.func @_lenet_kernel(%arg0: i32, %arg1: memref<256x128xbf16, #tpu.memory_space<vmem>>, %arg2: memref<5x128x256xbf16, #tpu.memory_space<vmem>>, %arg3: memref<1x256xf32, #tpu.memory_space<vmem>>, %arg4: memref<4x256x256xbf16, #tpu.memory_space<vmem>>, %arg5: memref<128x256xbf16, #tpu.memory_space<vmem>>, %arg6: memref<128x256xbf16, #tpu.memory_space<vmem>>, %arg7: memref<5x128x256xbf16, #tpu.memory_space<vmem>>, %arg8: memref<1x256xf32, #tpu.memory_space<vmem>>, %arg9: memref<4x128x128xbf16, #tpu.memory_space<vmem>>, %arg10: memref<64x128xbf16, #tpu.memory_space<vmem>>, %arg11: memref<64x128xbf16, #tpu.memory_space<vmem>>, %arg12: memref<5x128x128xbf16, #tpu.memory_space<vmem>>, %arg13: memref<1x128xf32, #tpu.memory_space<vmem>>, %arg14: memref<5x8x64xbf16, #tpu.memory_space<vmem>>, %arg15: memref<128x128xbf16, #tpu.memory_space<vmem>>, %arg16: memref<1x128xf32, #tpu.memory_space<vmem>>, %arg17: memref<128x128xbf16, #tpu.memory_space<vmem>>, %arg18: memref<1x128xf32, #tpu.memory_space<vmem>>, %arg19: memref<8x128xf32, #tpu.memory_space<vmem>>) attributes {dimension_semantics = [#tpu.dimension_semantics<parallel>], iteration_bounds = array<i64: 1>, scalar_prefetch = 0 : i64, scratch_operands = 0 : i64, tpu.core_type = #tpu.core_type<tc>, window_params = [{transform_indices = @transform_0, window_bounds = array<i64: 256, 128>}, {pipeline_mode = #tpu.pipeline_mode<synchronous>, transform_indices = @transform_1, window_bounds = array<i64: 5, 128, 256>}, {pipeline_mode = #tpu.pipeline_mode<synchronous>, transform_indices = @transform_2, window_bounds = array<i64: 1, 256>}, {pipeline_mode = #tpu.pipeline_mode<synchronous>, transform_indices = @transform_3, window_bounds = array<i64: 4, 256, 256>}, {pipeline_mode = #tpu.pipeline_mode<synchronous>, transform_indices = @transform_4, window_bounds = array<i64: 128, 256>}, {pipeline_mode = #tpu.pipeline_mode<synchronous>, transform_indices = @transform_5, window_bounds = array<i64: 128, 256>}, {pipeline_mode = #tpu.pipeline_mode<synchronous>, transform_indices = @transform_6, window_bounds = array<i64: 5, 128, 256>}, {pipeline_mode = #tpu.pipeline_mode<synchronous>, transform_indices = @transform_7, window_bounds = array<i64: 1, 256>}, {pipeline_mode = #tpu.pipeline_mode<synchronous>, transform_indices = @transform_8, window_bounds = array<i64: 4, 128, 128>}, {pipeline_mode = #tpu.pipeline_mode<synchronous>, transform_indices = @transform_9, window_bounds = array<i64: 64, 128>}, {pipeline_mode = #tpu.pipeline_mode<synchronous>, transform_indices = @transform_10, window_bounds = array<i64: 64, 128>}, {pipeline_mode = #tpu.pipeline_mode<synchronous>, transform_indices = @transform_11, window_bounds = array<i64: 5, 128, 128>}, {pipeline_mode = #tpu.pipeline_mode<synchronous>, transform_indices = @transform_12, window_bounds = array<i64: 1, 128>}, {pipeline_mode = #tpu.pipeline_mode<synchronous>, transform_indices = @transform_13, window_bounds = array<i64: 5, 8, 64>}, {pipeline_mode = #tpu.pipeline_mode<synchronous>, transform_indices = @transform_14, window_bounds = array<i64: 128, 128>}, {pipeline_mode = #tpu.pipeline_mode<synchronous>, transform_indices = @transform_15, window_bounds = array<i64: 1, 128>}, {pipeline_mode = #tpu.pipeline_mode<synchronous>, transform_indices = @transform_16, window_bounds = array<i64: 128, 128>}, {pipeline_mode = #tpu.pipeline_mode<synchronous>, transform_indices = @transform_17, window_bounds = array<i64: 1, 128>}, {transform_indices = @transform_18, window_bounds = array<i64: 8, 128>}]} {
    %c0 = arith.constant 0 : index
    %c0_0 = arith.constant 0 : index
    %0 = vector.load %arg1[%c0, %c0_0] : memref<256x128xbf16, #tpu.memory_space<vmem>>, vector<256x128xbf16>
    %c0_1 = arith.constant 0 : index
    %c0_2 = arith.constant 0 : index
    %c0_3 = arith.constant 0 : index
    %1 = vector.load %arg2[%c0_1, %c0_2, %c0_3] : memref<5x128x256xbf16, #tpu.memory_space<vmem>>, vector<1x128x256xbf16>
    %2 = vector.shape_cast %1 : vector<1x128x256xbf16> to vector<128x256xbf16>
    %cst = arith.constant dense<0.000000e+00> : vector<256x256xf32>
    %3 = tpu.matmul %0, %2, %cst {dimension_numbers = #tpu.dot_dimension_numbers<[1], [0], [0], [1], [0, 0, 1, 1], [], []>} : vector<256x128xbf16>, vector<128x256xbf16>, vector<256x256xf32> -> vector<256x256xf32>
    %c0_4 = arith.constant 0 : index
    %c0_5 = arith.constant 0 : index
    %c0_6 = arith.constant 0 : index
    %4 = vector.load %arg4[%c0_4, %c0_5, %c0_6] : memref<4x256x256xbf16, #tpu.memory_space<vmem>>, vector<1x256x256xbf16>
    %5 = vector.shape_cast %4 : vector<1x256x256xbf16> to vector<256x256xbf16>
    %cst_7 = arith.constant dense<0.000000e+00> : vector<256x128xf32>
    %6 = tpu.matmul %5, %0, %cst_7 {dimension_numbers = #tpu.dot_dimension_numbers<[1], [0], [0], [1], [0, 0, 1, 1], [], []>} : vector<256x256xbf16>, vector<256x128xbf16>, vector<256x128xf32> -> vector<256x128xf32>
    %7 = arith.truncf %6 : vector<256x128xf32> to vector<256x128xbf16>
    %c1 = arith.constant 1 : index
    %c0_8 = arith.constant 0 : index
    %c0_9 = arith.constant 0 : index
    %8 = vector.load %arg2[%c1, %c0_8, %c0_9] : memref<5x128x256xbf16, #tpu.memory_space<vmem>>, vector<1x128x256xbf16>
    %9 = vector.shape_cast %8 : vector<1x128x256xbf16> to vector<128x256xbf16>
    %cst_10 = arith.constant dense<0.000000e+00> : vector<256x256xf32>
    %10 = tpu.matmul %7, %9, %cst_10 {dimension_numbers = #tpu.dot_dimension_numbers<[1], [0], [0], [1], [0, 0, 1, 1], [], []>} : vector<256x128xbf16>, vector<128x256xbf16>, vector<256x256xf32> -> vector<256x256xf32>
    %11 = arith.addf %3, %10 : vector<256x256xf32>
    %c1_11 = arith.constant 1 : index
    %c0_12 = arith.constant 0 : index
    %c0_13 = arith.constant 0 : index
    %12 = vector.load %arg4[%c1_11, %c0_12, %c0_13] : memref<4x256x256xbf16, #tpu.memory_space<vmem>>, vector<1x256x256xbf16>
    %13 = vector.shape_cast %12 : vector<1x256x256xbf16> to vector<256x256xbf16>
    %cst_14 = arith.constant dense<0.000000e+00> : vector<256x128xf32>
    %14 = tpu.matmul %13, %0, %cst_14 {dimension_numbers = #tpu.dot_dimension_numbers<[1], [0], [0], [1], [0, 0, 1, 1], [], []>} : vector<256x256xbf16>, vector<256x128xbf16>, vector<256x128xf32> -> vector<256x128xf32>
    %15 = arith.truncf %14 : vector<256x128xf32> to vector<256x128xbf16>
    %c2 = arith.constant 2 : index
    %c0_15 = arith.constant 0 : index
    %c0_16 = arith.constant 0 : index
    %16 = vector.load %arg2[%c2, %c0_15, %c0_16] : memref<5x128x256xbf16, #tpu.memory_space<vmem>>, vector<1x128x256xbf16>
    %17 = vector.shape_cast %16 : vector<1x128x256xbf16> to vector<128x256xbf16>
    %cst_17 = arith.constant dense<0.000000e+00> : vector<256x256xf32>
    %18 = tpu.matmul %15, %17, %cst_17 {dimension_numbers = #tpu.dot_dimension_numbers<[1], [0], [0], [1], [0, 0, 1, 1], [], []>} : vector<256x128xbf16>, vector<128x256xbf16>, vector<256x256xf32> -> vector<256x256xf32>
    %19 = arith.addf %11, %18 : vector<256x256xf32>
    %c2_18 = arith.constant 2 : index
    %c0_19 = arith.constant 0 : index
    %c0_20 = arith.constant 0 : index
    %20 = vector.load %arg4[%c2_18, %c0_19, %c0_20] : memref<4x256x256xbf16, #tpu.memory_space<vmem>>, vector<1x256x256xbf16>
    %21 = vector.shape_cast %20 : vector<1x256x256xbf16> to vector<256x256xbf16>
    %cst_21 = arith.constant dense<0.000000e+00> : vector<256x128xf32>
    %22 = tpu.matmul %21, %0, %cst_21 {dimension_numbers = #tpu.dot_dimension_numbers<[1], [0], [0], [1], [0, 0, 1, 1], [], []>} : vector<256x256xbf16>, vector<256x128xbf16>, vector<256x128xf32> -> vector<256x128xf32>
    %23 = arith.truncf %22 : vector<256x128xf32> to vector<256x128xbf16>
    %c3 = arith.constant 3 : index
    %c0_22 = arith.constant 0 : index
    %c0_23 = arith.constant 0 : index
    %24 = vector.load %arg2[%c3, %c0_22, %c0_23] : memref<5x128x256xbf16, #tpu.memory_space<vmem>>, vector<1x128x256xbf16>
    %25 = vector.shape_cast %24 : vector<1x128x256xbf16> to vector<128x256xbf16>
    %cst_24 = arith.constant dense<0.000000e+00> : vector<256x256xf32>
    %26 = tpu.matmul %23, %25, %cst_24 {dimension_numbers = #tpu.dot_dimension_numbers<[1], [0], [0], [1], [0, 0, 1, 1], [], []>} : vector<256x128xbf16>, vector<128x256xbf16>, vector<256x256xf32> -> vector<256x256xf32>
    %27 = arith.addf %19, %26 : vector<256x256xf32>
    %c3_25 = arith.constant 3 : index
    %c0_26 = arith.constant 0 : index
    %c0_27 = arith.constant 0 : index
    %28 = vector.load %arg4[%c3_25, %c0_26, %c0_27] : memref<4x256x256xbf16, #tpu.memory_space<vmem>>, vector<1x256x256xbf16>
    %29 = vector.shape_cast %28 : vector<1x256x256xbf16> to vector<256x256xbf16>
    %cst_28 = arith.constant dense<0.000000e+00> : vector<256x128xf32>
    %30 = tpu.matmul %29, %0, %cst_28 {dimension_numbers = #tpu.dot_dimension_numbers<[1], [0], [0], [1], [0, 0, 1, 1], [], []>} : vector<256x256xbf16>, vector<256x128xbf16>, vector<256x128xf32> -> vector<256x128xf32>
    %31 = arith.truncf %30 : vector<256x128xf32> to vector<256x128xbf16>
    %c4 = arith.constant 4 : index
    %c0_29 = arith.constant 0 : index
    %c0_30 = arith.constant 0 : index
    %32 = vector.load %arg2[%c4, %c0_29, %c0_30] : memref<5x128x256xbf16, #tpu.memory_space<vmem>>, vector<1x128x256xbf16>
    %33 = vector.shape_cast %32 : vector<1x128x256xbf16> to vector<128x256xbf16>
    %cst_31 = arith.constant dense<0.000000e+00> : vector<256x256xf32>
    %34 = tpu.matmul %31, %33, %cst_31 {dimension_numbers = #tpu.dot_dimension_numbers<[1], [0], [0], [1], [0, 0, 1, 1], [], []>} : vector<256x128xbf16>, vector<128x256xbf16>, vector<256x256xf32> -> vector<256x256xf32>
    %35 = arith.addf %27, %34 : vector<256x256xf32>
    %c0_32 = arith.constant 0 : index
    %c0_33 = arith.constant 0 : index
    %36 = vector.load %arg3[%c0_32, %c0_33] : memref<1x256xf32, #tpu.memory_space<vmem>>, vector<1x256xf32>
    %37 = vector.broadcast %36 : vector<1x256xf32> to vector<256x256xf32>
    %38 = arith.addf %35, %37 : vector<256x256xf32>
    %cst_34 = arith.constant 0.000000e+00 : f32
    %39 = vector.broadcast %cst_34 : f32 to vector<256x256xf32>
    %40 = arith.maximumf %38, %39 : vector<256x256xf32>
    %41 = vector.extract_strided_slice %40 {offsets = [0, 0], sizes = [256, 128], strides = [1, 1]} : vector<256x256xf32> to vector<256x128xf32>
    %42 = vector.extract_strided_slice %40 {offsets = [0, 128], sizes = [256, 128], strides = [1, 1]} : vector<256x256xf32> to vector<256x128xf32>
    %43 = arith.maximumf %41, %42 : vector<256x128xf32>
    %44 = arith.truncf %43 : vector<256x128xf32> to vector<256x128xbf16>
    %c0_35 = arith.constant 0 : index
    %c0_36 = arith.constant 0 : index
    %45 = vector.load %arg5[%c0_35, %c0_36] : memref<128x256xbf16, #tpu.memory_space<vmem>>, vector<128x256xbf16>
    %cst_37 = arith.constant dense<0.000000e+00> : vector<128x128xf32>
    %46 = tpu.matmul %45, %44, %cst_37 {dimension_numbers = #tpu.dot_dimension_numbers<[1], [0], [0], [1], [0, 0, 1, 1], [], []>} : vector<128x256xbf16>, vector<256x128xbf16>, vector<128x128xf32> -> vector<128x128xf32>
    %47 = arith.truncf %46 : vector<128x128xf32> to vector<128x128xbf16>
    %c0_38 = arith.constant 0 : index
    %c0_39 = arith.constant 0 : index
    %48 = vector.load %arg6[%c0_38, %c0_39] : memref<128x256xbf16, #tpu.memory_space<vmem>>, vector<128x256xbf16>
    %cst_40 = arith.constant dense<0.000000e+00> : vector<128x128xf32>
    %49 = tpu.matmul %48, %44, %cst_40 {dimension_numbers = #tpu.dot_dimension_numbers<[1], [0], [0], [1], [0, 0, 1, 1], [], []>} : vector<128x256xbf16>, vector<256x128xbf16>, vector<128x128xf32> -> vector<128x128xf32>
    %50 = arith.truncf %49 : vector<128x128xf32> to vector<128x128xbf16>
    %51 = arith.maximumf %47, %50 : vector<128x128xbf16>
    %c0_41 = arith.constant 0 : index
    %c0_42 = arith.constant 0 : index
    %c0_43 = arith.constant 0 : index
    %52 = vector.load %arg7[%c0_41, %c0_42, %c0_43] : memref<5x128x256xbf16, #tpu.memory_space<vmem>>, vector<1x128x256xbf16>
    %53 = vector.shape_cast %52 : vector<1x128x256xbf16> to vector<128x256xbf16>
    %cst_44 = arith.constant dense<0.000000e+00> : vector<128x256xf32>
    %54 = tpu.matmul %51, %53, %cst_44 {dimension_numbers = #tpu.dot_dimension_numbers<[1], [0], [0], [1], [0, 0, 1, 1], [], []>} : vector<128x128xbf16>, vector<128x256xbf16>, vector<128x256xf32> -> vector<128x256xf32>
    %c0_45 = arith.constant 0 : index
    %c0_46 = arith.constant 0 : index
    %c0_47 = arith.constant 0 : index
    %55 = vector.load %arg9[%c0_45, %c0_46, %c0_47] : memref<4x128x128xbf16, #tpu.memory_space<vmem>>, vector<1x128x128xbf16>
    %56 = vector.shape_cast %55 : vector<1x128x128xbf16> to vector<128x128xbf16>
    %cst_48 = arith.constant dense<0.000000e+00> : vector<128x128xf32>
    %57 = tpu.matmul %56, %51, %cst_48 {dimension_numbers = #tpu.dot_dimension_numbers<[1], [0], [0], [1], [0, 0, 1, 1], [], []>} : vector<128x128xbf16>, vector<128x128xbf16>, vector<128x128xf32> -> vector<128x128xf32>
    %58 = arith.truncf %57 : vector<128x128xf32> to vector<128x128xbf16>
    %c1_49 = arith.constant 1 : index
    %c0_50 = arith.constant 0 : index
    %c0_51 = arith.constant 0 : index
    %59 = vector.load %arg7[%c1_49, %c0_50, %c0_51] : memref<5x128x256xbf16, #tpu.memory_space<vmem>>, vector<1x128x256xbf16>
    %60 = vector.shape_cast %59 : vector<1x128x256xbf16> to vector<128x256xbf16>
    %cst_52 = arith.constant dense<0.000000e+00> : vector<128x256xf32>
    %61 = tpu.matmul %58, %60, %cst_52 {dimension_numbers = #tpu.dot_dimension_numbers<[1], [0], [0], [1], [0, 0, 1, 1], [], []>} : vector<128x128xbf16>, vector<128x256xbf16>, vector<128x256xf32> -> vector<128x256xf32>
    %62 = arith.addf %54, %61 : vector<128x256xf32>
    %c1_53 = arith.constant 1 : index
    %c0_54 = arith.constant 0 : index
    %c0_55 = arith.constant 0 : index
    %63 = vector.load %arg9[%c1_53, %c0_54, %c0_55] : memref<4x128x128xbf16, #tpu.memory_space<vmem>>, vector<1x128x128xbf16>
    %64 = vector.shape_cast %63 : vector<1x128x128xbf16> to vector<128x128xbf16>
    %cst_56 = arith.constant dense<0.000000e+00> : vector<128x128xf32>
    %65 = tpu.matmul %64, %51, %cst_56 {dimension_numbers = #tpu.dot_dimension_numbers<[1], [0], [0], [1], [0, 0, 1, 1], [], []>} : vector<128x128xbf16>, vector<128x128xbf16>, vector<128x128xf32> -> vector<128x128xf32>
    %66 = arith.truncf %65 : vector<128x128xf32> to vector<128x128xbf16>
    %c2_57 = arith.constant 2 : index
    %c0_58 = arith.constant 0 : index
    %c0_59 = arith.constant 0 : index
    %67 = vector.load %arg7[%c2_57, %c0_58, %c0_59] : memref<5x128x256xbf16, #tpu.memory_space<vmem>>, vector<1x128x256xbf16>
    %68 = vector.shape_cast %67 : vector<1x128x256xbf16> to vector<128x256xbf16>
    %cst_60 = arith.constant dense<0.000000e+00> : vector<128x256xf32>
    %69 = tpu.matmul %66, %68, %cst_60 {dimension_numbers = #tpu.dot_dimension_numbers<[1], [0], [0], [1], [0, 0, 1, 1], [], []>} : vector<128x128xbf16>, vector<128x256xbf16>, vector<128x256xf32> -> vector<128x256xf32>
    %70 = arith.addf %62, %69 : vector<128x256xf32>
    %c2_61 = arith.constant 2 : index
    %c0_62 = arith.constant 0 : index
    %c0_63 = arith.constant 0 : index
    %71 = vector.load %arg9[%c2_61, %c0_62, %c0_63] : memref<4x128x128xbf16, #tpu.memory_space<vmem>>, vector<1x128x128xbf16>
    %72 = vector.shape_cast %71 : vector<1x128x128xbf16> to vector<128x128xbf16>
    %cst_64 = arith.constant dense<0.000000e+00> : vector<128x128xf32>
    %73 = tpu.matmul %72, %51, %cst_64 {dimension_numbers = #tpu.dot_dimension_numbers<[1], [0], [0], [1], [0, 0, 1, 1], [], []>} : vector<128x128xbf16>, vector<128x128xbf16>, vector<128x128xf32> -> vector<128x128xf32>
    %74 = arith.truncf %73 : vector<128x128xf32> to vector<128x128xbf16>
    %c3_65 = arith.constant 3 : index
    %c0_66 = arith.constant 0 : index
    %c0_67 = arith.constant 0 : index
    %75 = vector.load %arg7[%c3_65, %c0_66, %c0_67] : memref<5x128x256xbf16, #tpu.memory_space<vmem>>, vector<1x128x256xbf16>
    %76 = vector.shape_cast %75 : vector<1x128x256xbf16> to vector<128x256xbf16>
    %cst_68 = arith.constant dense<0.000000e+00> : vector<128x256xf32>
    %77 = tpu.matmul %74, %76, %cst_68 {dimension_numbers = #tpu.dot_dimension_numbers<[1], [0], [0], [1], [0, 0, 1, 1], [], []>} : vector<128x128xbf16>, vector<128x256xbf16>, vector<128x256xf32> -> vector<128x256xf32>
    %78 = arith.addf %70, %77 : vector<128x256xf32>
    %c3_69 = arith.constant 3 : index
    %c0_70 = arith.constant 0 : index
    %c0_71 = arith.constant 0 : index
    %79 = vector.load %arg9[%c3_69, %c0_70, %c0_71] : memref<4x128x128xbf16, #tpu.memory_space<vmem>>, vector<1x128x128xbf16>
    %80 = vector.shape_cast %79 : vector<1x128x128xbf16> to vector<128x128xbf16>
    %cst_72 = arith.constant dense<0.000000e+00> : vector<128x128xf32>
    %81 = tpu.matmul %80, %51, %cst_72 {dimension_numbers = #tpu.dot_dimension_numbers<[1], [0], [0], [1], [0, 0, 1, 1], [], []>} : vector<128x128xbf16>, vector<128x128xbf16>, vector<128x128xf32> -> vector<128x128xf32>
    %82 = arith.truncf %81 : vector<128x128xf32> to vector<128x128xbf16>
    %c4_73 = arith.constant 4 : index
    %c0_74 = arith.constant 0 : index
    %c0_75 = arith.constant 0 : index
    %83 = vector.load %arg7[%c4_73, %c0_74, %c0_75] : memref<5x128x256xbf16, #tpu.memory_space<vmem>>, vector<1x128x256xbf16>
    %84 = vector.shape_cast %83 : vector<1x128x256xbf16> to vector<128x256xbf16>
    %cst_76 = arith.constant dense<0.000000e+00> : vector<128x256xf32>
    %85 = tpu.matmul %82, %84, %cst_76 {dimension_numbers = #tpu.dot_dimension_numbers<[1], [0], [0], [1], [0, 0, 1, 1], [], []>} : vector<128x128xbf16>, vector<128x256xbf16>, vector<128x256xf32> -> vector<128x256xf32>
    %86 = arith.addf %78, %85 : vector<128x256xf32>
    %c0_77 = arith.constant 0 : index
    %c0_78 = arith.constant 0 : index
    %87 = vector.load %arg8[%c0_77, %c0_78] : memref<1x256xf32, #tpu.memory_space<vmem>>, vector<1x256xf32>
    %88 = vector.broadcast %87 : vector<1x256xf32> to vector<128x256xf32>
    %89 = arith.addf %86, %88 : vector<128x256xf32>
    %cst_79 = arith.constant 0.000000e+00 : f32
    %90 = vector.broadcast %cst_79 : f32 to vector<128x256xf32>
    %91 = arith.maximumf %89, %90 : vector<128x256xf32>
    %92 = vector.extract_strided_slice %91 {offsets = [0, 0], sizes = [128, 128], strides = [1, 1]} : vector<128x256xf32> to vector<128x128xf32>
    %93 = vector.extract_strided_slice %91 {offsets = [0, 128], sizes = [128, 128], strides = [1, 1]} : vector<128x256xf32> to vector<128x128xf32>
    %94 = arith.maximumf %92, %93 : vector<128x128xf32>
    %95 = arith.truncf %94 : vector<128x128xf32> to vector<128x128xbf16>
    %c0_80 = arith.constant 0 : index
    %c0_81 = arith.constant 0 : index
    %96 = vector.load %arg10[%c0_80, %c0_81] : memref<64x128xbf16, #tpu.memory_space<vmem>>, vector<64x128xbf16>
    %cst_82 = arith.constant dense<0.000000e+00> : vector<64x128xf32>
    %97 = tpu.matmul %96, %95, %cst_82 {dimension_numbers = #tpu.dot_dimension_numbers<[1], [0], [0], [1], [0, 0, 1, 1], [], []>} : vector<64x128xbf16>, vector<128x128xbf16>, vector<64x128xf32> -> vector<64x128xf32>
    %98 = arith.truncf %97 : vector<64x128xf32> to vector<64x128xbf16>
    %c0_83 = arith.constant 0 : index
    %c0_84 = arith.constant 0 : index
    %99 = vector.load %arg11[%c0_83, %c0_84] : memref<64x128xbf16, #tpu.memory_space<vmem>>, vector<64x128xbf16>
    %cst_85 = arith.constant dense<0.000000e+00> : vector<64x128xf32>
    %100 = tpu.matmul %99, %95, %cst_85 {dimension_numbers = #tpu.dot_dimension_numbers<[1], [0], [0], [1], [0, 0, 1, 1], [], []>} : vector<64x128xbf16>, vector<128x128xbf16>, vector<64x128xf32> -> vector<64x128xf32>
    %101 = arith.truncf %100 : vector<64x128xf32> to vector<64x128xbf16>
    %102 = arith.maximumf %98, %101 : vector<64x128xbf16>
    %c0_86 = arith.constant 0 : index
    %c0_87 = arith.constant 0 : index
    %c0_88 = arith.constant 0 : index
    %103 = vector.load %arg14[%c0_86, %c0_87, %c0_88] : memref<5x8x64xbf16, #tpu.memory_space<vmem>>, vector<1x8x64xbf16>
    %104 = vector.shape_cast %103 : vector<1x8x64xbf16> to vector<8x64xbf16>
    %cst_89 = arith.constant dense<0.000000e+00> : vector<8x128xf32>
    %105 = tpu.matmul %104, %102, %cst_89 {dimension_numbers = #tpu.dot_dimension_numbers<[1], [0], [0], [1], [0, 0, 1, 1], [], []>} : vector<8x64xbf16>, vector<64x128xbf16>, vector<8x128xf32> -> vector<8x128xf32>
    %106 = arith.truncf %105 : vector<8x128xf32> to vector<8x128xbf16>
    %c0_90 = arith.constant 0 : index
    %c0_91 = arith.constant 0 : index
    %c0_92 = arith.constant 0 : index
    %107 = vector.load %arg12[%c0_90, %c0_91, %c0_92] : memref<5x128x128xbf16, #tpu.memory_space<vmem>>, vector<1x128x128xbf16>
    %108 = vector.shape_cast %107 : vector<1x128x128xbf16> to vector<128x128xbf16>
    %cst_93 = arith.constant dense<0.000000e+00> : vector<8x128xf32>
    %109 = tpu.matmul %106, %108, %cst_93 {dimension_numbers = #tpu.dot_dimension_numbers<[1], [0], [0], [1], [0, 0, 1, 1], [], []>} : vector<8x128xbf16>, vector<128x128xbf16>, vector<8x128xf32> -> vector<8x128xf32>
    %c1_94 = arith.constant 1 : index
    %c0_95 = arith.constant 0 : index
    %c0_96 = arith.constant 0 : index
    %110 = vector.load %arg14[%c1_94, %c0_95, %c0_96] : memref<5x8x64xbf16, #tpu.memory_space<vmem>>, vector<1x8x64xbf16>
    %111 = vector.shape_cast %110 : vector<1x8x64xbf16> to vector<8x64xbf16>
    %cst_97 = arith.constant dense<0.000000e+00> : vector<8x128xf32>
    %112 = tpu.matmul %111, %102, %cst_97 {dimension_numbers = #tpu.dot_dimension_numbers<[1], [0], [0], [1], [0, 0, 1, 1], [], []>} : vector<8x64xbf16>, vector<64x128xbf16>, vector<8x128xf32> -> vector<8x128xf32>
    %113 = arith.truncf %112 : vector<8x128xf32> to vector<8x128xbf16>
    %c1_98 = arith.constant 1 : index
    %c0_99 = arith.constant 0 : index
    %c0_100 = arith.constant 0 : index
    %114 = vector.load %arg12[%c1_98, %c0_99, %c0_100] : memref<5x128x128xbf16, #tpu.memory_space<vmem>>, vector<1x128x128xbf16>
    %115 = vector.shape_cast %114 : vector<1x128x128xbf16> to vector<128x128xbf16>
    %cst_101 = arith.constant dense<0.000000e+00> : vector<8x128xf32>
    %116 = tpu.matmul %113, %115, %cst_101 {dimension_numbers = #tpu.dot_dimension_numbers<[1], [0], [0], [1], [0, 0, 1, 1], [], []>} : vector<8x128xbf16>, vector<128x128xbf16>, vector<8x128xf32> -> vector<8x128xf32>
    %117 = arith.addf %109, %116 : vector<8x128xf32>
    %c2_102 = arith.constant 2 : index
    %c0_103 = arith.constant 0 : index
    %c0_104 = arith.constant 0 : index
    %118 = vector.load %arg14[%c2_102, %c0_103, %c0_104] : memref<5x8x64xbf16, #tpu.memory_space<vmem>>, vector<1x8x64xbf16>
    %119 = vector.shape_cast %118 : vector<1x8x64xbf16> to vector<8x64xbf16>
    %cst_105 = arith.constant dense<0.000000e+00> : vector<8x128xf32>
    %120 = tpu.matmul %119, %102, %cst_105 {dimension_numbers = #tpu.dot_dimension_numbers<[1], [0], [0], [1], [0, 0, 1, 1], [], []>} : vector<8x64xbf16>, vector<64x128xbf16>, vector<8x128xf32> -> vector<8x128xf32>
    %121 = arith.truncf %120 : vector<8x128xf32> to vector<8x128xbf16>
    %c2_106 = arith.constant 2 : index
    %c0_107 = arith.constant 0 : index
    %c0_108 = arith.constant 0 : index
    %122 = vector.load %arg12[%c2_106, %c0_107, %c0_108] : memref<5x128x128xbf16, #tpu.memory_space<vmem>>, vector<1x128x128xbf16>
    %123 = vector.shape_cast %122 : vector<1x128x128xbf16> to vector<128x128xbf16>
    %cst_109 = arith.constant dense<0.000000e+00> : vector<8x128xf32>
    %124 = tpu.matmul %121, %123, %cst_109 {dimension_numbers = #tpu.dot_dimension_numbers<[1], [0], [0], [1], [0, 0, 1, 1], [], []>} : vector<8x128xbf16>, vector<128x128xbf16>, vector<8x128xf32> -> vector<8x128xf32>
    %125 = arith.addf %117, %124 : vector<8x128xf32>
    %c3_110 = arith.constant 3 : index
    %c0_111 = arith.constant 0 : index
    %c0_112 = arith.constant 0 : index
    %126 = vector.load %arg14[%c3_110, %c0_111, %c0_112] : memref<5x8x64xbf16, #tpu.memory_space<vmem>>, vector<1x8x64xbf16>
    %127 = vector.shape_cast %126 : vector<1x8x64xbf16> to vector<8x64xbf16>
    %cst_113 = arith.constant dense<0.000000e+00> : vector<8x128xf32>
    %128 = tpu.matmul %127, %102, %cst_113 {dimension_numbers = #tpu.dot_dimension_numbers<[1], [0], [0], [1], [0, 0, 1, 1], [], []>} : vector<8x64xbf16>, vector<64x128xbf16>, vector<8x128xf32> -> vector<8x128xf32>
    %129 = arith.truncf %128 : vector<8x128xf32> to vector<8x128xbf16>
    %c3_114 = arith.constant 3 : index
    %c0_115 = arith.constant 0 : index
    %c0_116 = arith.constant 0 : index
    %130 = vector.load %arg12[%c3_114, %c0_115, %c0_116] : memref<5x128x128xbf16, #tpu.memory_space<vmem>>, vector<1x128x128xbf16>
    %131 = vector.shape_cast %130 : vector<1x128x128xbf16> to vector<128x128xbf16>
    %cst_117 = arith.constant dense<0.000000e+00> : vector<8x128xf32>
    %132 = tpu.matmul %129, %131, %cst_117 {dimension_numbers = #tpu.dot_dimension_numbers<[1], [0], [0], [1], [0, 0, 1, 1], [], []>} : vector<8x128xbf16>, vector<128x128xbf16>, vector<8x128xf32> -> vector<8x128xf32>
    %133 = arith.addf %125, %132 : vector<8x128xf32>
    %c4_118 = arith.constant 4 : index
    %c0_119 = arith.constant 0 : index
    %c0_120 = arith.constant 0 : index
    %134 = vector.load %arg14[%c4_118, %c0_119, %c0_120] : memref<5x8x64xbf16, #tpu.memory_space<vmem>>, vector<1x8x64xbf16>
    %135 = vector.shape_cast %134 : vector<1x8x64xbf16> to vector<8x64xbf16>
    %cst_121 = arith.constant dense<0.000000e+00> : vector<8x128xf32>
    %136 = tpu.matmul %135, %102, %cst_121 {dimension_numbers = #tpu.dot_dimension_numbers<[1], [0], [0], [1], [0, 0, 1, 1], [], []>} : vector<8x64xbf16>, vector<64x128xbf16>, vector<8x128xf32> -> vector<8x128xf32>
    %137 = arith.truncf %136 : vector<8x128xf32> to vector<8x128xbf16>
    %c4_122 = arith.constant 4 : index
    %c0_123 = arith.constant 0 : index
    %c0_124 = arith.constant 0 : index
    %138 = vector.load %arg12[%c4_122, %c0_123, %c0_124] : memref<5x128x128xbf16, #tpu.memory_space<vmem>>, vector<1x128x128xbf16>
    %139 = vector.shape_cast %138 : vector<1x128x128xbf16> to vector<128x128xbf16>
    %cst_125 = arith.constant dense<0.000000e+00> : vector<8x128xf32>
    %140 = tpu.matmul %137, %139, %cst_125 {dimension_numbers = #tpu.dot_dimension_numbers<[1], [0], [0], [1], [0, 0, 1, 1], [], []>} : vector<8x128xbf16>, vector<128x128xbf16>, vector<8x128xf32> -> vector<8x128xf32>
    %141 = arith.addf %133, %140 : vector<8x128xf32>
    %c0_126 = arith.constant 0 : index
    %c0_127 = arith.constant 0 : index
    %142 = vector.load %arg13[%c0_126, %c0_127] : memref<1x128xf32, #tpu.memory_space<vmem>>, vector<1x128xf32>
    %143 = vector.broadcast %142 : vector<1x128xf32> to vector<8x128xf32>
    %144 = arith.addf %141, %143 : vector<8x128xf32>
    %cst_128 = arith.constant 0.000000e+00 : f32
    %145 = vector.broadcast %cst_128 : f32 to vector<8x128xf32>
    %146 = arith.maximumf %144, %145 : vector<8x128xf32>
    %147 = arith.truncf %146 : vector<8x128xf32> to vector<8x128xbf16>
    %c0_129 = arith.constant 0 : index
    %c0_130 = arith.constant 0 : index
    %148 = vector.load %arg15[%c0_129, %c0_130] : memref<128x128xbf16, #tpu.memory_space<vmem>>, vector<128x128xbf16>
    %cst_131 = arith.constant dense<0.000000e+00> : vector<8x128xf32>
    %149 = tpu.matmul %147, %148, %cst_131 {dimension_numbers = #tpu.dot_dimension_numbers<[1], [0], [0], [1], [0, 0, 1, 1], [], []>} : vector<8x128xbf16>, vector<128x128xbf16>, vector<8x128xf32> -> vector<8x128xf32>
    %c0_132 = arith.constant 0 : index
    %c0_133 = arith.constant 0 : index
    %150 = vector.load %arg16[%c0_132, %c0_133] : memref<1x128xf32, #tpu.memory_space<vmem>>, vector<1x128xf32>
    %151 = vector.broadcast %150 : vector<1x128xf32> to vector<8x128xf32>
    %152 = arith.addf %149, %151 : vector<8x128xf32>
    %cst_134 = arith.constant 0.000000e+00 : f32
    %153 = vector.broadcast %cst_134 : f32 to vector<8x128xf32>
    %154 = arith.maximumf %152, %153 : vector<8x128xf32>
    %155 = arith.truncf %154 : vector<8x128xf32> to vector<8x128xbf16>
    %c0_135 = arith.constant 0 : index
    %c0_136 = arith.constant 0 : index
    %156 = vector.load %arg17[%c0_135, %c0_136] : memref<128x128xbf16, #tpu.memory_space<vmem>>, vector<128x128xbf16>
    %cst_137 = arith.constant dense<0.000000e+00> : vector<8x128xf32>
    %157 = tpu.matmul %155, %156, %cst_137 {dimension_numbers = #tpu.dot_dimension_numbers<[1], [0], [0], [1], [0, 0, 1, 1], [], []>} : vector<8x128xbf16>, vector<128x128xbf16>, vector<8x128xf32> -> vector<8x128xf32>
    %c0_138 = arith.constant 0 : index
    %c0_139 = arith.constant 0 : index
    %158 = vector.load %arg18[%c0_138, %c0_139] : memref<1x128xf32, #tpu.memory_space<vmem>>, vector<1x128xf32>
    %159 = vector.broadcast %158 : vector<1x128xf32> to vector<8x128xf32>
    %160 = arith.addf %157, %159 : vector<8x128xf32>
    %c0_140 = arith.constant 0 : index
    %c0_141 = arith.constant 0 : index
    %161 = vector.load %arg19[%c0_140, %c0_141] : memref<8x128xf32, #tpu.memory_space<vmem>>, vector<8x128xf32>
    tpu.vector_store %arg19[%c0_140, %c0_141], %160 {strides = array<i32>} : memref<8x128xf32, #tpu.memory_space<vmem>>, vector<8x128xf32>,
    return
  }
  func.func @transform_0(%arg0: i32) -> (i32, i32) {
    %c0_i32 = arith.constant 0 : i32
    %c0_i32_0 = arith.constant 0 : i32
    return %arg0, %c0_i32 : i32, i32
  }
  func.func @transform_1(%arg0: i32) -> (i32, i32, i32) {
    %c0_i32 = arith.constant 0 : i32
    %c0_i32_0 = arith.constant 0 : i32
    %c0_i32_1 = arith.constant 0 : i32
    %c0_i32_2 = arith.constant 0 : i32
    return %c0_i32, %c0_i32_0, %c0_i32_1 : i32, i32, i32
  }
  func.func @transform_2(%arg0: i32) -> (i32, i32) {
    %c0_i32 = arith.constant 0 : i32
    %c0_i32_0 = arith.constant 0 : i32
    %c0_i32_1 = arith.constant 0 : i32
    return %c0_i32, %c0_i32_0 : i32, i32
  }
  func.func @transform_3(%arg0: i32) -> (i32, i32, i32) {
    %c0_i32 = arith.constant 0 : i32
    %c0_i32_0 = arith.constant 0 : i32
    %c0_i32_1 = arith.constant 0 : i32
    %c0_i32_2 = arith.constant 0 : i32
    return %c0_i32, %c0_i32_0, %c0_i32_1 : i32, i32, i32
  }
  func.func @transform_4(%arg0: i32) -> (i32, i32) {
    %c0_i32 = arith.constant 0 : i32
    %c0_i32_0 = arith.constant 0 : i32
    %c0_i32_1 = arith.constant 0 : i32
    return %c0_i32, %c0_i32_0 : i32, i32
  }
  func.func @transform_5(%arg0: i32) -> (i32, i32) {
    %c0_i32 = arith.constant 0 : i32
    %c0_i32_0 = arith.constant 0 : i32
    %c0_i32_1 = arith.constant 0 : i32
    return %c0_i32, %c0_i32_0 : i32, i32
  }
  func.func @transform_6(%arg0: i32) -> (i32, i32, i32) {
    %c0_i32 = arith.constant 0 : i32
    %c0_i32_0 = arith.constant 0 : i32
    %c0_i32_1 = arith.constant 0 : i32
    %c0_i32_2 = arith.constant 0 : i32
    return %c0_i32, %c0_i32_0, %c0_i32_1 : i32, i32, i32
  }
  func.func @transform_7(%arg0: i32) -> (i32, i32) {
    %c0_i32 = arith.constant 0 : i32
    %c0_i32_0 = arith.constant 0 : i32
    %c0_i32_1 = arith.constant 0 : i32
    return %c0_i32, %c0_i32_0 : i32, i32
  }
  func.func @transform_8(%arg0: i32) -> (i32, i32, i32) {
    %c0_i32 = arith.constant 0 : i32
    %c0_i32_0 = arith.constant 0 : i32
    %c0_i32_1 = arith.constant 0 : i32
    %c0_i32_2 = arith.constant 0 : i32
    return %c0_i32, %c0_i32_0, %c0_i32_1 : i32, i32, i32
  }
  func.func @transform_9(%arg0: i32) -> (i32, i32) {
    %c0_i32 = arith.constant 0 : i32
    %c0_i32_0 = arith.constant 0 : i32
    %c0_i32_1 = arith.constant 0 : i32
    return %c0_i32, %c0_i32_0 : i32, i32
  }
  func.func @transform_10(%arg0: i32) -> (i32, i32) {
    %c0_i32 = arith.constant 0 : i32
    %c0_i32_0 = arith.constant 0 : i32
    %c0_i32_1 = arith.constant 0 : i32
    return %c0_i32, %c0_i32_0 : i32, i32
  }
  func.func @transform_11(%arg0: i32) -> (i32, i32, i32) {
    %c0_i32 = arith.constant 0 : i32
    %c0_i32_0 = arith.constant 0 : i32
    %c0_i32_1 = arith.constant 0 : i32
    %c0_i32_2 = arith.constant 0 : i32
    return %c0_i32, %c0_i32_0, %c0_i32_1 : i32, i32, i32
  }
  func.func @transform_12(%arg0: i32) -> (i32, i32) {
    %c0_i32 = arith.constant 0 : i32
    %c0_i32_0 = arith.constant 0 : i32
    %c0_i32_1 = arith.constant 0 : i32
    return %c0_i32, %c0_i32_0 : i32, i32
  }
  func.func @transform_13(%arg0: i32) -> (i32, i32, i32) {
    %c0_i32 = arith.constant 0 : i32
    %c0_i32_0 = arith.constant 0 : i32
    %c0_i32_1 = arith.constant 0 : i32
    %c0_i32_2 = arith.constant 0 : i32
    return %c0_i32, %c0_i32_0, %c0_i32_1 : i32, i32, i32
  }
  func.func @transform_14(%arg0: i32) -> (i32, i32) {
    %c0_i32 = arith.constant 0 : i32
    %c0_i32_0 = arith.constant 0 : i32
    %c0_i32_1 = arith.constant 0 : i32
    return %c0_i32, %c0_i32_0 : i32, i32
  }
  func.func @transform_15(%arg0: i32) -> (i32, i32) {
    %c0_i32 = arith.constant 0 : i32
    %c0_i32_0 = arith.constant 0 : i32
    %c0_i32_1 = arith.constant 0 : i32
    return %c0_i32, %c0_i32_0 : i32, i32
  }
  func.func @transform_16(%arg0: i32) -> (i32, i32) {
    %c0_i32 = arith.constant 0 : i32
    %c0_i32_0 = arith.constant 0 : i32
    %c0_i32_1 = arith.constant 0 : i32
    return %c0_i32, %c0_i32_0 : i32, i32
  }
  func.func @transform_17(%arg0: i32) -> (i32, i32) {
    %c0_i32 = arith.constant 0 : i32
    %c0_i32_0 = arith.constant 0 : i32
    %c0_i32_1 = arith.constant 0 : i32
    return %c0_i32, %c0_i32_0 : i32, i32
  }
  func.func @transform_18(%arg0: i32) -> (i32, i32) {
    %c0_i32 = arith.constant 0 : i32
    %c0_i32_0 = arith.constant 0 : i32
    return %arg0, %c0_i32 : i32, i32
  }
}

</mosaic_0001>

<bundles_post_ra>
// kernel: net_forward.1
= control target key start
LH: loop header
LB: loop body
LE: loop exit
PB: predicated region body
PF: predicated region fallthrough
CT: control target
= control target key end

     0   :  { %s12128_s0 = inlined_call_operand.vmem [shape: bf16[256,128], index: 0, kind: input, shape index: {}]   ;;  %s12129_s1 = inlined_call_operand.vmem [shape: bf16[5,128,256], index: 1, kind: input, shape index: {}]   ;;  %s12130_s2 = inlined_call_operand.hbm [shape: f32[1,256], index: 2, kind: input, shape index: {}]   ;;  %s12131_s3 = inlined_call_operand.hbm [shape: bf16[4,256,256], index: 3, kind: input, shape index: {}]   ;;  %s12132_s4 = inlined_call_operand.vmem [shape: bf16[128,256], index: 4, kind: input, shape index: {}]   ;;  %s12133_s5 = inlined_call_operand.hbm [shape: bf16[128,256], index: 5, kind: input, shape index: {}]   ;;  %s12134_s6 = inlined_call_operand.hbm [shape: bf16[5,128,256], index: 6, kind: input, shape index: {}]   ;;  %s12135_s7 = inlined_call_operand.hbm [shape: f32[1,256], index: 7, kind: input, shape index: {}]   ;;  %s12136_s8 = inlined_call_operand.hbm [shape: bf16[4,128,128], index: 8, kind: input, shape index: {}]   ;;  %s12137_s9 = inlined_call_operand.vmem [shape: bf16[64,128], index: 9, kind: input, shape index: {}]   ;;  %s12138_s10 = inlined_call_operand.hbm [shape: bf16[64,128], index: 10, kind: input, shape index: {}]   ;;  %s12139_s11 = inlined_call_operand.hbm [shape: bf16[5,128,128], index: 11, kind: input, shape index: {}]   ;;  %s12140_s12 = inlined_call_operand.vmem [shape: f32[1,128], index: 12, kind: input, shape index: {}]   ;;  %s12141_s13 = inlined_call_operand.vmem [shape: bf16[5,8,64], index: 13, kind: input, shape index: {}]   ;;  %s12142_s14 = inlined_call_operand.hbm [shape: bf16[128,128], index: 14, kind: input, shape index: {}]   ;;  %s12143_s15 = inlined_call_operand.hbm [shape: f32[1,128], index: 15, kind: input, shape index: {}]   ;;  %s12144_s16 = inlined_call_operand.hbm [shape: bf16[128,128], index: 16, kind: input, shape index: {}]   ;;  %s12145_s17 = inlined_call_operand.hbm [shape: f32[1,128], index: 17, kind: input, shape index: {}]   ;;  %s12146_s18 = inlined_call_operand.vmem [shape: f32[8,128], index: 18, kind: output, shape index: {}]  }
   0x1   :  { %12152 = sst [smem:[#allocation28_spill]] %s12128_s0 }
   0x2   :  { %12153 = sst [smem:[#allocation29_spill]] %s12129_s1 }
   0x3   :  { %12154 = sst [smem:[#allocation30_spill]] %s12130_s2 }
   0x4   :  { %12155 = sst [smem:[#allocation31_spill]] %s12146_s18 }
   0x5   :  { %23 = vsyncpa [#allocation3], 0 }
   0x6   :  { %24 = vsyncpa [#allocation5], 0 }
   0x7   :  { %25 = vsyncpa [#allocation8], 0 }
   0x8   :  { %26 = vsyncpa [#allocation11], 0 }
   0x9   :  { %27 = vsyncpa [#allocation14], 0 }
   0xa   :  { %28 = vsyncpa [#allocation17], 0 }
   0xb   :  { %29 = vsyncpa [#allocation20], 0  ;;  %s10126_s27 = smov [#allocation4]   ;;  %s9848_s0 = scalar_lea.hbm %s12131_s3, 16384 }
   0xc   :  { %s49_s28 = sshll.u32 %s10126_s27, 4  ;;  %p9849_p0 = scmp.ne.s32.totalorder %s12131_s3, %s9848_s0  ;;  %s50_s28 = int_to_ptr.vmem [resolvable:$true] %s49_s28 }
   0xd   :  { %p9852_p1 = scmp.lt.u32.totalorder %s9848_s0, %s12131_s3 }
   0xf   :  { %p9854_p2 = pnand %p9852_p1, %p9849_p0 }
  0x11   :  { %9857 = shalt.err (!%p9854_p2)
}
  0x12   :  { %s9858_s22 = scalar_lea.vmem %s50_s28, 16384  ;;  %p9863_p4 = scmp.lt.s32.totalorder %s50_s28, %s50_s28 }
  0x13   :  { %p9859_p3 = scmp.ne.s32.totalorder %s50_s28, %s9858_s22  ;;  %p9864_p5 = scmp.lt.s32.totalorder %s9858_s22, %s9858_s22 }
  0x15   :  { %p9865_p6 = por %p9864_p5, %p9863_p4 }
  0x17   :  { %p9866_p7 = pnand %p9865_p6, %p9859_p3 }
  0x19   :  { %9869 = shalt.err (!%p9866_p7)
}
  0x1a   :  { %s10127_s2 = smov 128   ;;  %s10128_s23 = smov 8  }
  0x1b   :  { %55 = dma.hbm_to_vmem [thread:$0]  %s12131_s3, 16384, %s50_s28, [#allocation5], %s10127_s2, %s10127_s2, %s10128_s23  }
  0x1c   :  { %s10129_s26 = smov [#allocation7]   ;;  %s10130_s29 = smov [#allocation10]  }
  0x1d   :  { %s75_s27 = sshll.u32 %s10129_s26, 4  ;;  %s97_s30 = sshll.u32 %s10130_s29, 4  ;;  %s76_s27 = int_to_ptr.vmem [resolvable:$true] %s75_s27  ;;  %s98_s30 = int_to_ptr.vmem [resolvable:$true] %s97_s30 }
  0x1e   :  { %s9870_s1 = scalar_lea.hbm %s12134_s6, 10240 }
  0x1f   :  { %p9871_p8 = scmp.ne.s32.totalorder %s12134_s6, %s9870_s1  ;;  %p9874_p9 = scmp.lt.u32.totalorder %s9870_s1, %s12134_s6 }
  0x21   :  { %p9876_p10 = pnand %p9874_p9, %p9871_p8 }
  0x23   :  { %9879 = shalt.err (!%p9876_p10)
}
  0x24   :  { %s9880_s3 = scalar_lea.vmem %s76_s27, 10240  ;;  %p9885_p12 = scmp.lt.s32.totalorder %s76_s27, %s76_s27 }
  0x25   :  { %p9881_p11 = scmp.ne.s32.totalorder %s76_s27, %s9880_s3  ;;  %p9886_p13 = scmp.lt.s32.totalorder %s9880_s3, %s9880_s3 }
  0x27   :  { %p9887_p0 = por %p9886_p13, %p9885_p12 }
  0x29   :  { %p9888_p1 = pnand %p9887_p0, %p9881_p11 }
  0x2b   :  { %9891 = shalt.err (!%p9888_p1)
}
  0x2c   :  { %81 = dma.hbm_to_vmem [thread:$0]  %s12134_s6, 10240, %s76_s27, [#allocation8], %s10127_s2, %s10127_s2, %s10128_s23  }
  0x2d   :  { %s9892_s26 = scalar_lea.hbm %s12136_s8, 4096 }
  0x2e   :  { %p9893_p2 = scmp.ne.s32.totalorder %s12136_s8, %s9892_s26  ;;  %p9896_p3 = scmp.lt.u32.totalorder %s9892_s26, %s12136_s8 }
  0x30   :  { %p9898_p4 = pnand %p9896_p3, %p9893_p2 }
  0x32   :  { %9901 = shalt.err (!%p9898_p4)
}
  0x33   :  { %s9902_s20 = scalar_lea.vmem %s98_s30, 4096  ;;  %p9907_p6 = scmp.lt.s32.totalorder %s98_s30, %s98_s30 }
  0x34   :  { %p9903_p5 = scmp.ne.s32.totalorder %s98_s30, %s9902_s20  ;;  %p9908_p7 = scmp.lt.s32.totalorder %s9902_s20, %s9902_s20 }
  0x36   :  { %p9909_p8 = por %p9908_p7, %p9907_p6 }
  0x38   :  { %p9910_p9 = pnand %p9909_p8, %p9903_p5 }
  0x3a   :  { %9913 = shalt.err (!%p9910_p9)
}
  0x3b   :  { %s10131_s6 = smov 64   ;;  %s10132_s27 = smov 4  }
  0x3c   :  { %103 = dma.hbm_to_vmem [thread:$0]  %s12136_s8, 4096, %s98_s30, [#allocation11], %s10131_s6, %s10131_s6, %s10132_s27  }
  0x3d   :  { %s10133_s3 = smov [#allocation13]   ;;  %s10134_s24 = smov [#allocation16]  }
  0x3e   :  { %s123_s28 = sshll.u32 %s10133_s3, 4  ;;  %s152_s25 = sshll.u32 %s10134_s24, 4  ;;  %s124_s28 = int_to_ptr.vmem [resolvable:$true] %s123_s28  ;;  %s153_s25 = int_to_ptr.vmem [resolvable:$true] %s152_s25 }
  0x3f   :  { %s9914_s29 = scalar_lea.hbm %s12139_s11, 5120 }
  0x40   :  { %p9915_p10 = scmp.ne.s32.totalorder %s12139_s11, %s9914_s29  ;;  %p9918_p11 = scmp.lt.u32.totalorder %s9914_s29, %s12139_s11 }
  0x42   :  { %p9920_p12 = pnand %p9918_p11, %p9915_p10 }
  0x44   :  { %9923 = shalt.err (!%p9920_p12)
}
  0x45   :  { %s9924_s8 = scalar_lea.vmem %s124_s28, 5120  ;;  %p9929_p0 = scmp.lt.s32.totalorder %s124_s28, %s124_s28 }
  0x46   :  { %p9925_p13 = scmp.ne.s32.totalorder %s124_s28, %s9924_s8  ;;  %p9930_p1 = scmp.lt.s32.totalorder %s9924_s8, %s9924_s8 }
  0x48   :  { %p9931_p2 = por %p9930_p1, %p9929_p0 }
  0x4a   :  { %p9932_p3 = pnand %p9931_p2, %p9925_p13 }
  0x4c   :  { %9935 = shalt.err (!%p9932_p3)
}
  0x4d   :  { %129 = dma.hbm_to_vmem [thread:$0]  %s12139_s11, 5120, %s124_s28, [#allocation14], %s10131_s6, %s10131_s6, %s10132_s27  }
  0x4e   :  { %s9936_s24 = scalar_lea.hbm %s12143_s15, 16 }
  0x4f   :  { %p9937_p4 = scmp.ne.s32.totalorder %s12143_s15, %s9936_s24  ;;  %p9940_p5 = scmp.lt.u32.totalorder %s9936_s24, %s12143_s15 }
  0x51   :  { %p9942_p6 = pnand %p9940_p5, %p9937_p4 }
  0x53   :  { %9945 = shalt.err (!%p9942_p6)
}
  0x54   :  { %s9946_s19 = scalar_lea.vmem %s153_s25, 16  ;;  %s9950_s1 = scalar_lea.vmem %s153_s25, 32 }
  0x55   :  { %p9947_p7 = scmp.ne.s32.totalorder %s153_s25, %s9946_s19  ;;  %p9951_p8 = scmp.lt.s32.totalorder %s153_s25, %s153_s25 }
  0x56   :  { %p9952_p9 = scmp.lt.s32.totalorder %s9950_s1, %s9946_s19 }
  0x58   :  { %p9953_p10 = por %p9952_p9, %p9951_p8 }
  0x5a   :  { %p9954_p11 = pnand %p9953_p10, %p9947_p7 }
  0x5c   :  { %9957 = shalt.err (!%p9954_p11)
}
  0x5d   :  { %155 = dma.hbm_to_vmem [thread:$0]  %s12143_s15, 16, %s153_s25, [#allocation17]  }
  0x5e   :  { %s10135_s20 = smov [#allocation2]   ;;  %s10136_s30 = smov [#allocation6]  }
  0x5f   :  { %s40_s8 = sshll.u32 %s10135_s20, 4  ;;  %s63_s21 = sshll.u32 %s10136_s30, 4  ;;  %s41_s8 = int_to_ptr.vmem [resolvable:$true] %s40_s8  ;;  %s64_s21 = int_to_ptr.vmem [resolvable:$true] %s63_s21 }
  0x60   :  { %s12156_s24 = sld [smem:[#allocation30_spill]] }
  0x66   :  { %s9958_s18 = scalar_lea.hbm %s12156_s24, 32 }
  0x67   :  { %p9959_p12 = scmp.ne.s32.totalorder %s12156_s24, %s9958_s18  ;;  %p9962_p13 = scmp.lt.u32.totalorder %s9958_s18, %s12156_s24 }
  0x69   :  { %p9964_p0 = pnand %p9962_p13, %p9959_p12 }
  0x6b   :  { %9967 = shalt.err (!%p9964_p0)
}
  0x6c   :  { %s9968_s15 = scalar_lea.vmem %s41_s8, 32  ;;  %p9973_p2 = scmp.lt.s32.totalorder %s41_s8, %s41_s8 }
  0x6d   :  { %p9969_p1 = scmp.ne.s32.totalorder %s41_s8, %s9968_s15  ;;  %p9974_p3 = scmp.lt.s32.totalorder %s9968_s15, %s9968_s15 }
  0x6f   :  { %p9975_p4 = por %p9974_p3, %p9973_p2 }
  0x71   :  { %p9976_p5 = pnand %p9975_p4, %p9969_p1 }
  0x73   :  { %9979 = shalt.err (!%p9976_p5)
}
  0x74   :  { %43 = dma.hbm_to_vmem [thread:$0]  %s12156_s24, 32, %s41_s8, [#allocation3]  }
  0x75   :  { %s9980_s20 = scalar_lea.hbm %s12133_s5, 2048 }
  0x76   :  { %p9981_p6 = scmp.ne.s32.totalorder %s12133_s5, %s9980_s20  ;;  %p9984_p7 = scmp.lt.u32.totalorder %s9980_s20, %s12133_s5 }
  0x78   :  { %p9986_p8 = pnand %p9984_p7, %p9981_p6 }
  0x7a   :  { %9989 = shalt.err (!%p9986_p8)
}
  0x7b   :  { %s9990_s26 = scalar_lea.vmem %s64_s21, 2048  ;;  %p9995_p10 = scmp.lt.s32.totalorder %s64_s21, %s64_s21 }
  0x7c   :  { %p9991_p9 = scmp.ne.s32.totalorder %s64_s21, %s9990_s26  ;;  %p9996_p11 = scmp.lt.s32.totalorder %s9990_s26, %s9990_s26 }
  0x7e   :  { %p9997_p12 = por %p9996_p11, %p9995_p10 }
  0x80   :  { %p9998_p13 = pnand %p9997_p12, %p9991_p9 }
  0x82   :  { %10001 = shalt.err (!%p9998_p13)
}
  0x83   :  { %69 = dma.hbm_to_vmem [thread:$0]  %s12133_s5, 2048, %s64_s21, [#allocation5], %s10127_s2, %s10127_s2, %s10128_s23  }
  0x84   :  { %s10137_s29 = smov [#allocation9]   ;;  %s10138_s19 = smov [#allocation12]  }
  0x85   :  { %s88_s0 = sshll.u32 %s10137_s29, 4  ;;  %s111_s15 = sshll.u32 %s10138_s19, 4  ;;  %s89_s0 = int_to_ptr.vmem [resolvable:$true] %s88_s0  ;;  %s112_s15 = int_to_ptr.vmem [resolvable:$true] %s111_s15 }
  0x86   :  { %s10002_s11 = scalar_lea.hbm %s12135_s7, 32 }
  0x87   :  { %p10003_p0 = scmp.ne.s32.totalorder %s12135_s7, %s10002_s11  ;;  %p10006_p1 = scmp.lt.u32.totalorder %s10002_s11, %s12135_s7 }
  0x89   :  { %p10008_p2 = pnand %p10006_p1, %p10003_p0 }
  0x8b   :  { %10011 = shalt.err (!%p10008_p2)
}
  0x8c   :  { %s10012_s5 = scalar_lea.vmem %s89_s0, 32  ;;  %p10017_p4 = scmp.lt.s32.totalorder %s89_s0, %s89_s0 }
  0x8d   :  { %p10013_p3 = scmp.ne.s32.totalorder %s89_s0, %s10012_s5  ;;  %p10018_p5 = scmp.lt.s32.totalorder %s10012_s5, %s10012_s5 }
  0x8f   :  { %p10019_p6 = por %p10018_p5, %p10017_p4 }
  0x91   :  { %p10020_p7 = pnand %p10019_p6, %p10013_p3 }
  0x93   :  { %10023 = shalt.err (!%p10020_p7)
}
  0x94   :  { %91 = dma.hbm_to_vmem [thread:$0]  %s12135_s7, 32, %s89_s0, [#allocation8]  }
  0x95   :  { %s10024_s18 = scalar_lea.hbm %s12138_s10, 512 }
  0x96   :  { %p10025_p8 = scmp.ne.s32.totalorder %s12138_s10, %s10024_s18  ;;  %p10028_p9 = scmp.lt.u32.totalorder %s10024_s18, %s12138_s10 }
  0x98   :  { %p10030_p10 = pnand %p10028_p9, %p10025_p8 }
  0x9a   :  { %10033 = shalt.err (!%p10030_p10)
}
  0x9b   :  { %s10034_s19 = scalar_lea.vmem %s112_s15, 512  ;;  %p10039_p12 = scmp.lt.s32.totalorder %s112_s15, %s112_s15 }
  0x9c   :  { %p10035_p11 = scmp.ne.s32.totalorder %s112_s15, %s10034_s19  ;;  %p10040_p13 = scmp.lt.s32.totalorder %s10034_s19, %s10034_s19 }
  0x9e   :  { %p10041_p0 = por %p10040_p13, %p10039_p12 }
  0xa0   :  { %p10042_p1 = pnand %p10041_p0, %p10035_p11 }
  0xa2   :  { %10045 = shalt.err (!%p10042_p1)
}
  0xa3   :  { %117 = dma.hbm_to_vmem [thread:$0]  %s12138_s10, 512, %s112_s15, [#allocation11], %s10131_s6, %s10131_s6, %s10132_s27  }
  0xa4   :  { %s10139_s25 = smov [#allocation15]   ;;  %s10140_s11 = smov [#allocation18]  }
  0xa5   :  { %s139_s1 = sshll.u32 %s10139_s25, 4  ;;  %s161_s28 = sshll.u32 %s10140_s11, 4  ;;  %s140_s1 = int_to_ptr.vmem [resolvable:$true] %s139_s1  ;;  %s162_s28 = int_to_ptr.vmem [resolvable:$true] %s161_s28 }
  0xa6   :  { %s10046_s22 = scalar_lea.hbm %s12142_s14, 1024 }
  0xa7   :  { %p10047_p2 = scmp.ne.s32.totalorder %s12142_s14, %s10046_s22  ;;  %p10050_p3 = scmp.lt.u32.totalorder %s10046_s22, %s12142_s14 }
  0xa9   :  { %p10052_p4 = pnand %p10050_p3, %p10047_p2 }
  0xab   :  { %10055 = shalt.err (!%p10052_p4)
}
  0xac   :  { %s10056_s10 = scalar_lea.vmem %s140_s1, 1024  ;;  %p10061_p6 = scmp.lt.s32.totalorder %s140_s1, %s140_s1 }
  0xad   :  { %p10057_p5 = scmp.ne.s32.totalorder %s140_s1, %s10056_s10  ;;  %p10062_p7 = scmp.lt.s32.totalorder %s10056_s10, %s10056_s10 }
  0xaf   :  { %p10063_p8 = por %p10062_p7, %p10061_p6 }
  0xb1   :  { %p10064_p9 = pnand %p10063_p8, %p10057_p5 }
  0xb3   :  { %10067 = shalt.err (!%p10064_p9)
}
  0xb4   :  { %145 = dma.hbm_to_vmem [thread:$0]  %s12142_s14, 1024, %s140_s1, [#allocation14], %s10131_s6, %s10131_s6, %s10132_s27  }
  0xb5   :  { %s10068_s8 = scalar_lea.hbm %s12144_s16, 1024 }
  0xb6   :  { %p10069_p10 = scmp.ne.s32.totalorder %s12144_s16, %s10068_s8  ;;  %p10072_p11 = scmp.lt.u32.totalorder %s10068_s8, %s12144_s16 }
  0xb8   :  { %p10074_p12 = pnand %p10072_p11, %p10069_p10 }
  0xba   :  { %10077 = shalt.err (!%p10074_p12)
}
  0xbb   :  { %s10078_s0 = scalar_lea.vmem %s162_s28, 1024  ;;  %p10083_p0 = scmp.lt.s32.totalorder %s162_s28, %s162_s28 }
  0xbc   :  { %p10079_p13 = scmp.ne.s32.totalorder %s162_s28, %s10078_s0  ;;  %p10084_p1 = scmp.lt.s32.totalorder %s10078_s0, %s10078_s0 }
  0xbe   :  { %p10085_p2 = por %p10084_p1, %p10083_p0 }
  0xc0   :  { %p10086_p3 = pnand %p10085_p2, %p10079_p13 }
  0xc2   :  { %10089 = shalt.err (!%p10086_p3)
}
  0xc3   :  { %167 = dma.hbm_to_vmem [thread:$0]  %s12144_s16, 1024, %s162_s28, [#allocation17], %s10131_s6, %s10131_s6, %s10132_s27  }
  0xc4   :  { %s10141_s1 = smov [#allocation19]   ;;  %s10090_s22 = scalar_lea.hbm %s12145_s17, 16 }
  0xc5   :  { %s174_s11 = sshll.u32 %s10141_s1, 4  ;;  %p10091_p4 = scmp.ne.s32.totalorder %s12145_s17, %s10090_s22  ;;  %s175_s11 = int_to_ptr.vmem [resolvable:$true] %s174_s11 }
  0xc6   :  { %p10094_p5 = scmp.lt.u32.totalorder %s10090_s22, %s12145_s17 }
  0xc8   :  { %p10096_p6 = pnand %p10094_p5, %p10091_p4 }
  0xca   :  { %10099 = shalt.err (!%p10096_p6)
}
  0xcb   :  { %s10100_s10 = scalar_lea.vmem %s175_s11, 16  ;;  %s10104_s16 = scalar_lea.vmem %s175_s11, 32 }
  0xcc   :  { %p10101_p7 = scmp.ne.s32.totalorder %s175_s11, %s10100_s10  ;;  %p10105_p8 = scmp.lt.s32.totalorder %s175_s11, %s175_s11 }
  0xcd   :  { %p10106_p9 = scmp.lt.s32.totalorder %s10104_s16, %s10100_s10 }
  0xcf   :  { %p10107_p10 = por %p10106_p9, %p10105_p8 }
  0xd1   :  { %p10108_p11 = pnand %p10107_p10, %p10101_p7 }
  0xd3   :  { %10111 = shalt.err (!%p10108_p11)
}
  0xd4   :  { %177 = dma.hbm_to_vmem [thread:$0]  %s12145_s17, 16, %s175_s11, [#allocation20]  }
  0xd5   :  { %10112 = dma.done.wait [#allocation3], 32  }
  0xd6   :  { %10113 = vsyncadd [#allocation3], 4294967264 }
  0xd7   :  { %10114 = dma.done.wait [#allocation5], 18432  }
  0xd8   :  { %10115 = vsyncadd [#allocation5], 4294948864 }
  0xd9   :  { %10116 = dma.done.wait [#allocation8], 10272  }
  0xda   :  { %10117 = vsyncadd [#allocation8], 4294957024 }
  0xdb   :  { %10118 = dma.done.wait [#allocation11], 4608  }
  0xdc   :  { %10119 = vsyncadd [#allocation11], 4294962688 }
  0xdd   :  { %10120 = dma.done.wait [#allocation14], 6144  }
  0xde   :  { %10121 = vsyncadd [#allocation14], 4294961152 }
  0xdf   :  { %10122 = dma.done.wait [#allocation17], 1040  }
  0xe0   :  { %10123 = vsyncadd [#allocation17], 4294966256 }
  0xe1   :  { %10124 = dma.done.wait [#allocation20], 16  }
  0xe2   :  { %10125 = vsyncadd [#allocation20], 4294967280  ;;  %s12157_s3 = sld [smem:[#allocation28_spill]]  ;;  %v9251_v11 = vld [vmem:[#allocation4 + $0x4] ss:$8 sps:$4 sm:$0xff]   ;;  %s12158_s19 = sld [smem:[#allocation29_spill]] }
  0xe3   :  { %583 = vmatprep.mubr.bf16.mxu0 %v9251_v11  ;;  %v9249_v17 = vld [vmem:[#allocation4] ss:$8 sps:$4 sm:$0xff]   ;;  %v9252_v18 = vld [vmem:[#allocation4 + $0x14] ss:$8 sps:$4 sm:$0xff]   ;;  %v9254_v19 = vld [vmem:[#allocation4 + $0x10] ss:$8 sps:$4 sm:$0xff]  }
  0xe4   :  { %v9255_v22 = vld [vmem:[#allocation4 + $0x24] ss:$8 sps:$4 sm:$0xff]   ;;  %v9257_v26 = vld [vmem:[#allocation4 + $0x20] ss:$8 sps:$4 sm:$0xff]   ;;  %v9258_v28 = vld [vmem:[#allocation4 + $0x34] ss:$8 sps:$4 sm:$0xff]  }
  0xe5   :  { %v9260_v33 = vld [vmem:[#allocation4 + $0x30] ss:$8 sps:$4 sm:$0xff]   ;;  %v9261_v35 = vld [vmem:[#allocation4 + $0x44] ss:$8 sps:$4 sm:$0xff]   ;;  %v9263_v37 = vld [vmem:[#allocation4 + $0x40] ss:$8 sps:$4 sm:$0xff]  }
  0xe6   :  { %v9264_v38 = vld [vmem:[#allocation4 + $0x54] ss:$8 sps:$4 sm:$0xff]   ;;  %v9266_v39 = vld [vmem:[#allocation4 + $0x50] ss:$8 sps:$4 sm:$0xff]   ;;  %v9267_v40 = vld [vmem:[#allocation4 + $0x64] ss:$8 sps:$4 sm:$0xff]  }
  0xe7   :  { %v9269_v41 = vld [vmem:[#allocation4 + $0x60] ss:$8 sps:$4 sm:$0xff]   ;;  %v9270_v42 = vld [vmem:[#allocation4 + $0x74] ss:$8 sps:$4 sm:$0xff]   ;;  %v9272_v43 = vld [vmem:[#allocation4 + $0x70] ss:$8 sps:$4 sm:$0xff]  }
  0xe8   :  { %v10411_v0 = vld [vmem:[%s12157_s3 + $0x40] sm:$0xff]   ;;  %v9235_v2 = vld [vmem:[%s12157_s3 + $0x48] sm:$0xff]   ;;  %v9237_v4 = vld [vmem:[%s12157_s3 + $0x50] sm:$0xff]   ;;  %v10142_v57 = vmov 0   ;;  %vm10144_vm0 = vmmov 0   ;;  %vm6192_vm1 = vcmask 523264  }
  0xe9   :  { %v9234_v1 = vld [vmem:[%s12157_s3] sm:$0xff]   ;;  %7702 = vmatprep.subr.bf16.mxu0 %v10411_v0  ;;  %v9236_v3 = vld [vmem:[%s12157_s3 + $0x8] sm:$0xff]   ;;  %v9238_v5 = vld [vmem:[%s12157_s3 + $0x10] sm:$0xff]   ;;  %857 = vmatprep.mubr.bf16.mxu1 %v10142_v57  ;;  %s12162_s8 = sld [smem:[#allocation31_spill]] }
  0xea   :  { %7703 = vmatpush3.bf16.msra.mxu0 %v9234_v1  ;;  %v9239_v6 = vld [vmem:[%s12157_s3 + $0x58] sm:$0xff]   ;;  %v9241_v8 = vld [vmem:[%s12157_s3 + $0x60] sm:$0xff]   ;;  %v9243_v10 = vld [vmem:[%s12157_s3 + $0x68] sm:$0xff]  }
  0xeb   :  { %7704 = vmatprep.subr.bf16.mxu0 %v9235_v2  ;;  %v9240_v7 = vld [vmem:[%s12157_s3 + $0x18] sm:$0xff]   ;;  %v9242_v9 = vld [vmem:[%s12157_s3 + $0x20] sm:$0xff]   ;;  %v9244_v12 = vld [vmem:[%s12157_s3 + $0x28] sm:$0xff]  }
  0xec   :  { %v9245_v13 = vld [vmem:[%s12157_s3 + $0x70] sm:$0xff]   ;;  %v9247_v15 = vld [vmem:[%s12157_s3 + $0x78] sm:$0xff]   ;;  %v9297_v20 = vld [vmem:[%s12158_s19 + $0x84] ss:$8 sps:$4 sm:$0xff]  }
  0xed   :  { %v9246_v14 = vld [vmem:[%s12157_s3 + $0x30] sm:$0xff]   ;;  %v9248_v16 = vld [vmem:[%s12157_s3 + $0x38] sm:$0xff]   ;;  %v9299_v21 = vld [vmem:[%s12158_s19 + $0x80] ss:$8 sps:$4 sm:$0xff]   ;;  %825 = vmatprep.subr.bf16.mxu1 %v9297_v20 }
  0xee   :  { %7705 = vmatpush3.bf16.msra.mxu0 %v9236_v3  ;;  %v9300_v23 = vld [vmem:[%s12158_s19 + $0x94] ss:$8 sps:$4 sm:$0xff]   ;;  %826 = vmatpush1.bf16.msra.mxu1 %v9299_v21  ;;  %v9302_v24 = vld [vmem:[%s12158_s19 + $0x90] ss:$8 sps:$4 sm:$0xff]   ;;  %v9303_v25 = vld [vmem:[%s12158_s19 + $0xa4] ss:$8 sps:$4 sm:$0xff]  }
  0xef   :  { %7706 = vmatprep.subr.bf16.mxu0 %v9237_v4  ;;  %827 = vmatprep.subr.bf16.mxu1 %v9300_v23  ;;  %v9305_v27 = vld [vmem:[%s12158_s19 + $0xa0] ss:$8 sps:$4 sm:$0xff]   ;;  %v9306_v29 = vld [vmem:[%s12158_s19 + $0xb4] ss:$8 sps:$4 sm:$0xff]   ;;  %v9308_v30 = vld [vmem:[%s12158_s19 + $0xb0] ss:$8 sps:$4 sm:$0xff]  }
  0xf0   :  { %v9309_v31 = vld [vmem:[%s12158_s19 + $0xc4] ss:$8 sps:$4 sm:$0xff]   ;;  %v9311_v32 = vld [vmem:[%s12158_s19 + $0xc0] ss:$8 sps:$4 sm:$0xff]   ;;  %v9312_v34 = vld [vmem:[%s12158_s19 + $0xd4] ss:$8 sps:$4 sm:$0xff]  }
  0xf1   :  { %v9314_v36 = vld [vmem:[%s12158_s19 + $0xd0] ss:$8 sps:$4 sm:$0xff]   ;;  %v9275_v45 = vld [vmem:[#allocation4 + $0x80] ss:$8 sps:$4 sm:$0xff]   ;;  %v9318_v55 = vld [vmem:[%s12158_s19 + $0xf4] ss:$8 sps:$4 sm:$0xff]  }
  0xf2   :  { %7707 = vmatpush3.bf16.msra.mxu0 %v9238_v5  ;;  %828 = vmatpush1.bf16.msra.mxu1 %v9302_v24  ;;  %v9273_v44 = vld [vmem:[#allocation4 + $0x84] ss:$8 sps:$4 sm:$0xff]   ;;  %v9276_v46 = vld [vmem:[#allocation4 + $0x94] ss:$8 sps:$4 sm:$0xff]   ;;  %v9278_v47 = vld [vmem:[#allocation4 + $0x90] ss:$8 sps:$4 sm:$0xff]  }
  0xf3   :  { %7708 = vmatprep.subr.bf16.mxu0 %v9239_v6  ;;  %829 = vmatprep.subr.bf16.mxu1 %v9303_v25  ;;  %v9279_v48 = vld [vmem:[#allocation4 + $0xa4] ss:$8 sps:$4 sm:$0xff]   ;;  %v9281_v49 = vld [vmem:[#allocation4 + $0xa0] ss:$8 sps:$4 sm:$0xff]   ;;  %v9282_v50 = vld [vmem:[#allocation4 + $0xb4] ss:$8 sps:$4 sm:$0xff]  }
  0xf4   :  { %v9315_v51 = vld [vmem:[%s12158_s19 + $0xe4] ss:$8 sps:$4 sm:$0xff]   ;;  %v9284_v52 = vld [vmem:[#allocation4 + $0xb0] ss:$8 sps:$4 sm:$0xff]   ;;  %v9317_v53 = vld [vmem:[%s12158_s19 + $0xe0] ss:$8 sps:$4 sm:$0xff]  }
  0xf5   :  { %v9285_v54 = vld [vmem:[#allocation4 + $0xc4] ss:$8 sps:$4 sm:$0xff]   ;;  %v9287_v58 = vld [vmem:[#allocation4 + $0xc0] ss:$8 sps:$4 sm:$0xff]   ;;  %v9288_v59 = vld [vmem:[#allocation4 + $0xd4] ss:$8 sps:$4 sm:$0xff]  }
  0xf6   :  { %7709 = vmatpush3.bf16.msra.mxu0 %v9240_v7  ;;  %830 = vmatpush1.bf16.msra.mxu1 %v9305_v27  ;;  %v9320_v56 = vld [vmem:[%s12158_s19 + $0xf0] ss:$8 sps:$4 sm:$0xff]   ;;  %v9293_v62 = vld [vmem:[#allocation4 + $0xe0] ss:$8 sps:$4 sm:$0xff]  }
  0xf7   :  { %7710 = vmatprep.subr.bf16.mxu0 %v9241_v8  ;;  %831 = vmatprep.subr.bf16.mxu1 %v9306_v29  ;;  %v9290_v60 = vld [vmem:[#allocation4 + $0xd0] ss:$8 sps:$4 sm:$0xff]   ;;  %v9291_v61 = vld [vmem:[#allocation4 + $0xe4] ss:$8 sps:$4 sm:$0xff]   ;;  %v9294_v63 = vld [vmem:[#allocation4 + $0xf4] ss:$8 sps:$4 sm:$0xff]  }
  0xf8   :  { %v10543_v11 = vld [vmem:[%s12157_s3 + $0x58] sm:$0xff]   ;;  %v10579_v20 = vld [vmem:[%s12157_s3 + $0x70] sm:$0xff]   ;;  %v9335_v24 = vld [vmem:[#allocation4 + $0x140] ss:$8 sps:$4 sm:$0xff]  }
  0xf9   :  { %v10585_v21 = vld [vmem:[%s12157_s3 + $0x30] sm:$0xff]   ;;  %v10591_v23 = vld [vmem:[%s12157_s3 + $0x78] sm:$0xff]   ;;  %v9338_v27 = vld [vmem:[%s12158_s19 + $0x4] ss:$8 sps:$4 sm:$0xff]  }
  0xfa   :  { %7711 = vmatpush3.bf16.msra.mxu0 %v9242_v9  ;;  %832 = vmatpush1.bf16.msra.mxu1 %v9308_v30  ;;  %v10597_v25 = vld [vmem:[%s12157_s3 + $0x38] sm:$0xff]   ;;  %v9342_v30 = vld [vmem:[#allocation4 + $0x164] ss:$8 sps:$4 sm:$0xff]  }
  0xfb   :  { %7712 = vmatprep.subr.bf16.mxu0 %v9243_v10  ;;  %833 = vmatprep.subr.bf16.mxu1 %v9309_v31  ;;  %v9341_v29 = vld [vmem:[#allocation4 + $0x150] ss:$8 sps:$4 sm:$0xff]   ;;  %v9344_v31 = vld [vmem:[#allocation4 + $0x160] ss:$8 sps:$4 sm:$0xff]  }
  0xfe   :  { %7713 = vmatpush3.bf16.msra.mxu0 %v9244_v12  ;;  %834 = vmatpush1.bf16.msra.mxu1 %v9311_v32  ;;  %v9348_v32 = vld [vmem:[#allocation4 + $0x174] ss:$8 sps:$4 sm:$0xff]  }
  0xff   :  { %7714 = vmatprep.subr.bf16.mxu0 %v9245_v13  ;;  %835 = vmatprep.subr.bf16.mxu1 %v9312_v34  ;;  %v9351_v34 = vld [vmem:[#allocation4 + $0x184] ss:$8 sps:$4 sm:$0xff]  }
 0x102   :  { %7715 = vmatpush3.bf16.msra.mxu0 %v9246_v14  ;;  %836 = vmatpush1.bf16.msra.mxu1 %v9314_v36  ;;  %v9357_v36 = vld [vmem:[#allocation4 + $0x194] ss:$8 sps:$4 sm:$0xff]  }
 0x103   :  { %7716 = vmatprep.subr.bf16.mxu0 %v9247_v15  ;;  %837 = vmatprep.subr.bf16.mxu1 %v9315_v51  ;;  %v9381_v51 = vld [vmem:[#allocation4 + $0x1c4] ss:$8 sps:$4 sm:$0xff]  }
 0x106   :  { %7717 = vmatpush3.bf16.msra.mxu0 %v9248_v16  ;;  %838 = vmatpush1.bf16.msra.mxu1 %v9317_v53 }
 0x107   :  { %7814 = vmatprep.subr.bf16.mxu0 %v10411_v0  ;;  %839 = vmatprep.subr.bf16.mxu1 %v9318_v55  ;;  %v9383_v55 = vld [vmem:[#allocation4 + $0x1c0] ss:$8 sps:$4 sm:$0xff]  }
 0x109   :  { %584 = vmatmul.mubr.bf16.vlgmr.msra.gmra.mrb[0].mxu0 %v9249_v17  ;;  %v10567_v17 = vld [vmem:[%s12157_s3 + $0x68] sm:$0xff]  }
 0x10a   :  { %591 = vmatprep.mubr.bf16.mxu0 %v9252_v18  ;;  %7815 = vmatpush3.bf16.msra.mxu0 %v9234_v1  ;;  %v9323_v1 = vld [vmem:[#allocation4 + $0x104] ss:$8 sps:$4 sm:$0xff]   ;;  %v9332_v18 = vld [vmem:[#allocation4 + $0x130] ss:$8 sps:$4 sm:$0xff]  }
 0x10b   :  { %7816 = vmatprep.subr.bf16.mxu0 %v9235_v2  ;;  %840 = vmatpush1.bf16.msra.mxu1 %v9320_v56  ;;  %v9321_v2 = vld [vmem:[#allocation4 + $0x100] ss:$8 sps:$4 sm:$0xff]  }
 0x10c   :  { %1098 = vmatprep.subr.bf16.mxu1 %v9338_v27  ;;  %v9363_v27 = vld [vmem:[%s12158_s19 + $0x40] ss:$8 sps:$4 sm:$0xff]  }
 0x10e   :  { %7817 = vmatpush3.bf16.msra.mxu0 %v9236_v3  ;;  %v10513_v3 = vld [vmem:[%s12157_s3] sm:$0xff]  }
 0x10f   :  { %7818 = vmatprep.subr.bf16.mxu0 %v9237_v4  ;;  %v9324_v4 = vld [vmem:[#allocation4 + $0x114] ss:$8 sps:$4 sm:$0xff]  }
 0x111   :  { %592 = vmatmul.mubr.bf16.gmra.mrb[4].mxu0 %v9254_v19  ;;  %v10573_v19 = vld [vmem:[%s12157_s3 + $0x28] sm:$0xff]  }
 0x112   :  { %599 = vmatprep.mubr.bf16.mxu0 %v9255_v22  ;;  %7819 = vmatpush3.bf16.msra.mxu0 %v9238_v5  ;;  %v10519_v5 = vld [vmem:[%s12157_s3 + $0x48] sm:$0xff]  }
 0x113   :  { %7820 = vmatprep.subr.bf16.mxu0 %v9239_v6  ;;  %v9326_v6 = vld [vmem:[#allocation4 + $0x110] ss:$8 sps:$4 sm:$0xff]   ;;  %v9333_v22 = vld [vmem:[#allocation4 + $0x144] ss:$8 sps:$4 sm:$0xff]  }
 0x116   :  { %7821 = vmatpush3.bf16.msra.mxu0 %v9240_v7  ;;  %v10525_v7 = vld [vmem:[%s12157_s3 + $0x8] sm:$0xff]  }
 0x117   :  { %7822 = vmatprep.subr.bf16.mxu0 %v9241_v8  ;;  %v10531_v8 = vld [vmem:[%s12157_s3 + $0x50] sm:$0xff]  }
 0x119   :  { %600 = vmatmul.mubr.bf16.gmra.mrb[8].mxu0 %v9257_v26  ;;  %v10603_v26 = vld [vmem:[%s12157_s3 + $0x40] sm:$0xff]  }
 0x11a   :  { %607 = vmatprep.mubr.bf16.mxu0 %v9258_v28  ;;  %7823 = vmatpush3.bf16.msra.mxu0 %v9242_v9  ;;  %v10537_v9 = vld [vmem:[%s12157_s3 + $0x10] sm:$0xff]  }
 0x11b   :  { %7824 = vmatprep.subr.bf16.mxu0 %v9243_v10  ;;  %v9327_v10 = vld [vmem:[#allocation4 + $0x124] ss:$8 sps:$4 sm:$0xff]   ;;  %v9339_v28 = vld [vmem:[#allocation4 + $0x154] ss:$8 sps:$4 sm:$0xff]  }
 0x11e   :  { %7825 = vmatpush3.bf16.msra.mxu0 %v9244_v12  ;;  %v9329_v12 = vld [vmem:[#allocation4 + $0x120] ss:$8 sps:$4 sm:$0xff]  }
 0x11f   :  { %7826 = vmatprep.subr.bf16.mxu0 %v9245_v13  ;;  %v10549_v13 = vld [vmem:[%s12157_s3 + $0x18] sm:$0xff]  }
 0x121   :  { %608 = vmatmul.mubr.bf16.gmra.mrb[12].mxu0 %v9260_v33  ;;  %v9350_v33 = vld [vmem:[#allocation4 + $0x170] ss:$8 sps:$4 sm:$0xff]  }
 0x122   :  { %615 = vmatprep.mubr.bf16.mxu0 %v9261_v35  ;;  %7827 = vmatpush3.bf16.msra.mxu0 %v9246_v14  ;;  %v10555_v14 = vld [vmem:[%s12157_s3 + $0x60] sm:$0xff]  }
 0x123   :  { %7828 = vmatprep.subr.bf16.mxu0 %v9247_v15  ;;  %v10561_v15 = vld [vmem:[%s12157_s3 + $0x20] sm:$0xff]  }
 0x124   :  { %v9353_v35 = vld [vmem:[#allocation4 + $0x180] ss:$8 sps:$4 sm:$0xff]  }
 0x126   :  { %7829 = vmatpush3.bf16.msra.mxu0 %v9248_v16  ;;  %v9330_v16 = vld [vmem:[#allocation4 + $0x134] ss:$8 sps:$4 sm:$0xff]  }
 0x127   :  { %7926 = vmatprep.subr.bf16.mxu0 %v10411_v0  ;;  %v9296_v0 = vld [vmem:[#allocation4 + $0xf0] ss:$8 sps:$4 sm:$0xff]  }
 0x129   :  { %616 = vmatmul.mubr.bf16.gmra.mrb[16].mxu0 %v9263_v37  ;;  %v9359_v37 = vld [vmem:[#allocation4 + $0x190] ss:$8 sps:$4 sm:$0xff]  }
 0x12a   :  { %623 = vmatprep.mubr.bf16.mxu0 %v9264_v38  ;;  %v9366_v38 = vld [vmem:[#allocation4 + $0x1a4] ss:$8 sps:$4 sm:$0xff]  }
 0x131   :  { %624 = vmatmul.mubr.bf16.gmra.mrb[20].mxu0 %v9266_v39  ;;  %v9368_v39 = vld [vmem:[#allocation4 + $0x1a0] ss:$8 sps:$4 sm:$0xff]  }
 0x132   :  { %631 = vmatprep.mubr.bf16.mxu0 %v9267_v40  ;;  %v9375_v40 = vld [vmem:[#allocation4 + $0x1b4] ss:$8 sps:$4 sm:$0xff]  }
 0x139   :  { %632 = vmatmul.mubr.bf16.gmra.mrb[24].mxu0 %v9269_v41 }
 0x13a   :  { %639 = vmatprep.mubr.bf16.mxu0 %v9270_v42 }
 0x141   :  { %640 = vmatmul.mubr.bf16.gmra.mrb[28].mxu0 %v9272_v43  ;;  %v9377_v43 = vld [vmem:[#allocation4 + $0x1b0] ss:$8 sps:$4 sm:$0xff]  }
 0x142   :  { %647 = vmatprep.mubr.bf16.mxu0 %v9273_v44 }
 0x149   :  { %648 = vmatmul.mubr.bf16.gmra.mrb[32].mxu0 %v9275_v45 }
 0x14a   :  { %655 = vmatprep.mubr.bf16.mxu0 %v9276_v46 }
 0x151   :  { %656 = vmatmul.mubr.bf16.gmra.mrb[36].mxu0 %v9278_v47 }
 0x152   :  { %663 = vmatprep.mubr.bf16.mxu0 %v9279_v48  ;;  %v9336_v48 = vld [vmem:[%s12158_s19] ss:$8 sps:$4 sm:$0xff]  }
 0x159   :  { %664 = vmatmul.mubr.bf16.gmra.mrb[40].mxu0 %v9281_v49 }
 0x15a   :  { %671 = vmatprep.mubr.bf16.mxu0 %v9282_v50  ;;  %v9347_v50 = vld [vmem:[%s12158_s19 + $0x14] ss:$8 sps:$4 sm:$0xff]  }
 0x161   :  { %672 = vmatmul.mubr.bf16.gmra.mrb[44].mxu0 %v9284_v52 }
 0x162   :  { %679 = vmatprep.mubr.bf16.mxu0 %v9285_v54  ;;  %v9345_v54 = vld [vmem:[%s12158_s19 + $0x10] ss:$8 sps:$4 sm:$0xff]  }
 0x169   :  { %680 = vmatmul.mubr.bf16.gmra.mrb[48].mxu0 %v9287_v58 }
 0x16a   :  { %687 = vmatprep.mubr.bf16.mxu0 %v9288_v59  ;;  %v9356_v59 = vld [vmem:[%s12158_s19 + $0x24] ss:$8 sps:$4 sm:$0xff]  }
 0x171   :  { %688 = vmatmul.mubr.bf16.gmra.mrb[52].mxu0 %v9290_v60 }
 0x172   :  { %695 = vmatprep.mubr.bf16.mxu0 %v9291_v61 }
 0x179   :  { %696 = vmatmul.mubr.bf16.gmra.mrb[56].mxu0 %v9293_v62  ;;  %v9354_v62 = vld [vmem:[%s12158_s19 + $0x20] ss:$8 sps:$4 sm:$0xff]  }
 0x17a   :  { %703 = vmatprep.mubr.bf16.mxu0 %v9294_v63 }
 0x181   :  { %704 = vmatmul.mubr.bf16.gmra.mrb[60].mxu0 %v9296_v0  ;;  %v9362_v0 = vld [vmem:[%s12158_s19 + $0x34] ss:$8 sps:$4 sm:$0xff]  }
 0x182   :  { %1516 = vmatprep.mubr.bf16.mxu0 %v9323_v1  ;;  %v9384_v1 = vld [vmem:[#allocation4 + $0x1d4] ss:$8 sps:$4 sm:$0xff]  }
 0x189   :  { %1517 = vmatmul.mubr.bf16.vlgmr.msra.gmra.mrb[64].mxu0 %v9321_v2 }
 0x18a   :  { %7927 = vmatpush3.bf16.msra.mxu0 %v10513_v3  ;;  %1524 = vmatprep.mubr.bf16.mxu0 %v9324_v4 }
 0x18b   :  { %7928 = vmatprep.subr.bf16.mxu0 %v10519_v5 }
 0x18e   :  { %7929 = vmatpush3.bf16.msra.mxu0 %v10525_v7 }
 0x18f   :  { %7930 = vmatprep.subr.bf16.mxu0 %v10531_v8 }
 0x191   :  { %1525 = vmatmul.mubr.bf16.gmra.mrb[68].mxu0 %v9326_v6  ;;  %v9360_v6 = vld [vmem:[%s12158_s19 + $0x30] ss:$8 sps:$4 sm:$0xff]  }
 0x192   :  { %7931 = vmatpush3.bf16.msra.mxu0 %v10537_v9  ;;  %1532 = vmatprep.mubr.bf16.mxu0 %v9327_v10  ;;  %v9386_v10 = vld [vmem:[#allocation4 + $0x1d0] ss:$8 sps:$4 sm:$0xff]  }
 0x193   :  { %7932 = vmatprep.subr.bf16.mxu0 %v10543_v11 }
 0x196   :  { %7933 = vmatpush3.bf16.msra.mxu0 %v10549_v13 }
 0x197   :  { %7934 = vmatprep.subr.bf16.mxu0 %v10555_v14 }
 0x199   :  { %1533 = vmatmul.mubr.bf16.gmra.mrb[72].mxu0 %v9329_v12 }
 0x19a   :  { %7935 = vmatpush3.bf16.msra.mxu0 %v10561_v15  ;;  %1540 = vmatprep.mubr.bf16.mxu0 %v9330_v16 }
 0x19b   :  { %7936 = vmatprep.subr.bf16.mxu0 %v10567_v17 }
 0x19e   :  { %7937 = vmatpush3.bf16.msra.mxu0 %v10573_v19 }
 0x19f   :  { %7938 = vmatprep.subr.bf16.mxu0 %v10579_v20 }
 0x1a1   :  { %1541 = vmatmul.mubr.bf16.gmra.mrb[76].mxu0 %v9332_v18  ;;  %v9365_v18 = vld [vmem:[%s12158_s19 + $0x44] ss:$8 sps:$4 sm:$0xff]  }
 0x1a2   :  { %7939 = vmatpush3.bf16.msra.mxu0 %v10585_v21  ;;  %1548 = vmatprep.mubr.bf16.mxu0 %v9333_v22 }
 0x1a3   :  { %7940 = vmatprep.subr.bf16.mxu0 %v10591_v23 }
 0x1a6   :  { %7941 = vmatpush3.bf16.msra.mxu0 %v10597_v25 }
 0x1a7   :  { %8038 = vmatprep.subr.bf16.mxu0 %v10603_v26 }
 0x1a9   :  { %1549 = vmatmul.mubr.bf16.gmra.mrb[80].mxu0 %v9335_v24 }
 0x1aa   :  { %1556 = vmatprep.mubr.bf16.mxu0 %v9339_v28 }
 0x1b1   :  { %1557 = vmatmul.mubr.bf16.gmra.mrb[84].mxu0 %v9341_v29  ;;  %v9371_v29 = vld [vmem:[%s12158_s19 + $0x54] ss:$8 sps:$4 sm:$0xff]  }
 0x1b2   :  { %1564 = vmatprep.mubr.bf16.mxu0 %v9342_v30  ;;  %v9387_v30 = vld [vmem:[#allocation4 + $0x1e4] ss:$8 sps:$4 sm:$0xff]  }
 0x1b9   :  { %1565 = vmatmul.mubr.bf16.gmra.mrb[88].mxu0 %v9344_v31 }
 0x1ba   :  { %1572 = vmatprep.mubr.bf16.mxu0 %v9348_v32 }
 0x1c1   :  { %1573 = vmatmul.mubr.bf16.gmra.mrb[92].mxu0 %v9350_v33  ;;  %v9369_v33 = vld [vmem:[%s12158_s19 + $0x50] ss:$8 sps:$4 sm:$0xff]  }
 0x1c2   :  { %1580 = vmatprep.mubr.bf16.mxu0 %v9351_v34  ;;  %v9389_v34 = vld [vmem:[#allocation4 + $0x1e0] ss:$8 sps:$4 sm:$0xff]  }
 0x1c9   :  { %1581 = vmatmul.mubr.bf16.gmra.mrb[96].mxu0 %v9353_v35 }
 0x1ca   :  { %1588 = vmatprep.mubr.bf16.mxu0 %v9357_v36 }
 0x1d1   :  { %1589 = vmatmul.mubr.bf16.gmra.mrb[100].mxu0 %v9359_v37  ;;  %v9374_v37 = vld [vmem:[%s12158_s19 + $0x64] ss:$8 sps:$4 sm:$0xff]  }
 0x1d2   :  { %1596 = vmatprep.mubr.bf16.mxu0 %v9366_v38 }
 0x1d9   :  { %1597 = vmatmul.mubr.bf16.gmra.mrb[104].mxu0 %v9368_v39 }
 0x1da   :  { %1604 = vmatprep.mubr.bf16.mxu0 %v9375_v40  ;;  %v9372_v40 = vld [vmem:[%s12158_s19 + $0x60] ss:$8 sps:$4 sm:$0xff]  }
 0x1dc   :  { %v7718_v41 = vpop.f32.mrb[0].mxu0 }
 0x1dd   :  { %v7719_v42 = vpop.f32.mrb[1].mxu0 }
 0x1de   :  { %v7720_v44 = vadd.f32 %v7719_v42, %v7718_v41  ;;  %v7721_v45 = vpop.f32.mrb[2].mxu0  ;;  %v9380_v42 = vld [vmem:[%s12158_s19 + $0x74] ss:$8 sps:$4 sm:$0xff]  }
 0x1df   :  { %v7722_v46 = vpop.f32.mrb[3].mxu0 }
 0x1e0   :  { %v7723_v47 = vadd.f32 %v7722_v46, %v7721_v45  ;;  %v9378_v46 = vld [vmem:[%s12158_s19 + $0x70] ss:$8 sps:$4 sm:$0xff]  }
 0x1e1   :  { %1605 = vmatmul.mubr.bf16.gmra.mrb[108].mxu0 %v9377_v43  ;;  %v9390_v43 = vld [vmem:[#allocation4 + $0x1f4] ss:$8 sps:$4 sm:$0xff]  }
 0x1e2   :  { %v712_v49 = vpack.c.bf16 %v7723_v47, %v7720_v44  ;;  %1612 = vmatprep.mubr.bf16.mxu0 %v9381_v51  ;;  %v9392_v47 = vld [vmem:[#allocation4 + $0x1f0] ss:$8 sps:$4 sm:$0xff]  }
 0x1e4   :  { %v7724_v52 = vpop.f32.mrb[4].mxu0  ;;  %858 = vmatmul.mubr.bf16.vlgmr.msra.gmra.mrb[0].mxu1 %v712_v49 }
 0x1e5   :  { %v7725_v53 = vpop.f32.mrb[5].mxu0  ;;  %867 = vmatprep.mubr.bf16.mxu1 %v10142_v57  ;;  %1099 = vmatpush1.bf16.msra.mxu1 %v9336_v48 }
 0x1e6   :  { %v7726_v56 = vadd.f32 %v7725_v53, %v7724_v52  ;;  %v7727_v58 = vpop.f32.mrb[6].mxu0  ;;  %1100 = vmatprep.subr.bf16.mxu1 %v9347_v50  ;;  %v9395_v53 = vld [vmem:[#allocation4 + $0x204] ss:$8 sps:$4 sm:$0xff]  }
 0x1e7   :  { %v7728_v60 = vpop.f32.mrb[7].mxu0 }
 0x1e8   :  { %v7729_v61 = vadd.f32 %v7728_v60, %v7727_v58 }
 0x1e9   :  { %1101 = vmatpush1.bf16.msra.mxu1 %v9345_v54  ;;  %1613 = vmatmul.mubr.bf16.gmra.mrb[112].mxu0 %v9383_v55 }
 0x1ea   :  { %v713_v63 = vpack.c.bf16 %v7729_v61, %v7726_v56  ;;  %1102 = vmatprep.subr.bf16.mxu1 %v9356_v59  ;;  %1620 = vmatprep.mubr.bf16.mxu0 %v9384_v1  ;;  %v9393_v56 = vld [vmem:[#allocation4 + $0x200] ss:$8 sps:$4 sm:$0xff]  }
 0x1ec   :  { %v7730_v2 = vpop.f32.mrb[8].mxu0  ;;  %868 = vmatmul.mubr.bf16.gmra.mrb[4].mxu1 %v713_v63  ;;  %v9396_v63 = vld [vmem:[#allocation4 + $0x214] ss:$8 sps:$4 sm:$0xff]  }
 0x1ed   :  { %v7731_v4 = vpop.f32.mrb[9].mxu0  ;;  %877 = vmatprep.mubr.bf16.mxu1 %v10142_v57  ;;  %1103 = vmatpush1.bf16.msra.mxu1 %v9354_v62 }
 0x1ee   :  { %v7732_v12 = vadd.f32 %v7731_v4, %v7730_v2  ;;  %v7733_v16 = vpop.f32.mrb[10].mxu0  ;;  %1104 = vmatprep.subr.bf16.mxu1 %v9362_v0  ;;  %v9398_v2 = vld [vmem:[#allocation4 + $0x210] ss:$8 sps:$4 sm:$0xff]  }
 0x1ef   :  { %v7734_v22 = vpop.f32.mrb[11].mxu0 }
 0x1f0   :  { %v7735_v24 = vadd.f32 %v7734_v22, %v7733_v16 }
 0x1f1   :  { %1105 = vmatpush1.bf16.msra.mxu1 %v9360_v6  ;;  %1621 = vmatmul.mubr.bf16.gmra.mrb[116].mxu0 %v9386_v10 }
 0x1f2   :  { %v714_v28 = vpack.c.bf16 %v7735_v24, %v7732_v12  ;;  %1106 = vmatprep.subr.bf16.mxu1 %v9365_v18  ;;  %1628 = vmatprep.mubr.bf16.mxu0 %v9387_v30  ;;  %v9401_v24 = vld [vmem:[#allocation4 + $0x220] ss:$8 sps:$4 sm:$0xff]  }
 0x1f4   :  { %v7736_v31 = vpop.f32.mrb[12].mxu0  ;;  %878 = vmatmul.mubr.bf16.gmra.mrb[8].mxu1 %v714_v28 }
 0x1f5   :  { %v7737_v32 = vpop.f32.mrb[13].mxu0  ;;  %887 = vmatprep.mubr.bf16.mxu1 %v10142_v57  ;;  %1107 = vmatpush1.bf16.msra.mxu1 %v9363_v27 }
 0x1f6   :  { %v7738_v35 = vadd.f32 %v7737_v32, %v7736_v31  ;;  %v7739_v36 = vpop.f32.mrb[14].mxu0  ;;  %1108 = vmatprep.subr.bf16.mxu1 %v9371_v29 }
 0x1f7   :  { %v7740_v38 = vpop.f32.mrb[15].mxu0 }
 0x1f8   :  { %v7741_v39 = vadd.f32 %v7740_v38, %v7739_v36 }
 0x1f9   :  { %1109 = vmatpush1.bf16.msra.mxu1 %v9369_v33  ;;  %1629 = vmatmul.mubr.bf16.gmra.mrb[120].mxu0 %v9389_v34  ;;  %v9404_v33 = vld [vmem:[#allocation4 + $0x230] ss:$8 sps:$4 sm:$0xff]  }
 0x1fa   :  { %v715_v41 = vpack.c.bf16 %v7741_v39, %v7738_v35  ;;  %1110 = vmatprep.subr.bf16.mxu1 %v9374_v37  ;;  %1636 = vmatprep.mubr.bf16.mxu0 %v9390_v43 }
 0x1fc   :  { %v7742_v44 = vpop.f32.mrb[16].mxu0  ;;  %888 = vmatmul.mubr.bf16.gmra.mrb[12].mxu1 %v715_v41  ;;  %v9410_v41 = vld [vmem:[%s12158_s19 + $0x104] ss:$8 sps:$4 sm:$0xff]  }
 0x1fd   :  { %v7743_v45 = vpop.f32.mrb[17].mxu0  ;;  %897 = vmatprep.mubr.bf16.mxu1 %v10142_v57  ;;  %1111 = vmatpush1.bf16.msra.mxu1 %v9372_v40  ;;  %v9407_v40 = vld [vmem:[#allocation4 + $0x240] ss:$8 sps:$4 sm:$0xff]  }
 0x1fe   :  { %v7744_v48 = vadd.f32 %v7743_v45, %v7742_v44  ;;  %v7745_v49 = vpop.f32.mrb[18].mxu0  ;;  %1112 = vmatprep.subr.bf16.mxu1 %v9380_v42  ;;  %v9411_v45 = vld [vmem:[#allocation4 + $0x254] ss:$8 sps:$4 sm:$0xff]  }
 0x1ff   :  { %v7746_v50 = vpop.f32.mrb[19].mxu0 }
 0x200   :  { %v7747_v51 = vadd.f32 %v7746_v50, %v7745_v49 }
 0x201   :  { %1113 = vmatpush1.bf16.msra.mxu1 %v9378_v46  ;;  %1637 = vmatmul.mubr.bf16.gmra.mrb[124].mxu0 %v9392_v47 }
 0x202   :  { %v716_v52 = vpack.c.bf16 %v7747_v51, %v7744_v48  ;;  %2240 = vmatprep.mubr.bf16.mxu0 %v9395_v53  ;;  %1758 = vmatprep.subr.bf16.mxu1 %v9410_v41  ;;  %v9413_v48 = vld [vmem:[#allocation4 + $0x250] ss:$8 sps:$4 sm:$0xff]   ;;  %v9440_v41 = vld [vmem:[#allocation4 + $0x2a0] ss:$8 sps:$4 sm:$0xff]  }
 0x204   :  { %v7748_v54 = vpop.f32.mrb[20].mxu0  ;;  %898 = vmatmul.mubr.bf16.gmra.mrb[16].mxu1 %v716_v52 }
 0x205   :  { %v7749_v55 = vpop.f32.mrb[21].mxu0  ;;  %907 = vmatprep.mubr.bf16.mxu1 %v10142_v57 }
 0x206   :  { %v7750_v58 = vadd.f32 %v7749_v55, %v7748_v54  ;;  %v7751_v59 = vpop.f32.mrb[22].mxu0  ;;  %v9414_v54 = vld [vmem:[#allocation4 + $0x264] ss:$8 sps:$4 sm:$0xff]  }
 0x207   :  { %v7752_v60 = vpop.f32.mrb[23].mxu0 }
 0x208   :  { %v7753_v61 = vadd.f32 %v7752_v60, %v7751_v59 }
 0x209   :  { %2241 = vmatmul.mubr.bf16.vlgmr.msra.gmra.mrb[128].mxu0 %v9393_v56 }
 0x20a   :  { %v717_v62 = vpack.c.bf16 %v7753_v61, %v7750_v58  ;;  %8039 = vmatpush3.bf16.msra.mxu0 %v10513_v3  ;;  %2248 = vmatprep.mubr.bf16.mxu0 %v9396_v63  ;;  %v9416_v58 = vld [vmem:[#allocation4 + $0x260] ss:$8 sps:$4 sm:$0xff]  }
 0x20b   :  { %8040 = vmatprep.subr.bf16.mxu0 %v10519_v5  ;;  %v9399_v5 = vld [vmem:[#allocation4 + $0x224] ss:$8 sps:$4 sm:$0xff]  }
 0x20c   :  { %v7754_v0 = vpop.f32.mrb[24].mxu0  ;;  %908 = vmatmul.mubr.bf16.gmra.mrb[20].mxu1 %v717_v62 }
 0x20d   :  { %v7755_v1 = vpop.f32.mrb[25].mxu0  ;;  %917 = vmatprep.mubr.bf16.mxu1 %v10142_v57 }
 0x20e   :  { %v7756_v4 = vadd.f32 %v7755_v1, %v7754_v0  ;;  %v7757_v6 = vpop.f32.mrb[26].mxu0  ;;  %8041 = vmatpush3.bf16.msra.mxu0 %v10525_v7  ;;  %v9420_v0 = vld [vmem:[#allocation4 + $0x274] ss:$8 sps:$4 sm:$0xff]  }
 0x20f   :  { %v7758_v10 = vpop.f32.mrb[27].mxu0  ;;  %8042 = vmatprep.subr.bf16.mxu0 %v10531_v8 }
 0x210   :  { %v7759_v12 = vadd.f32 %v7758_v10, %v7757_v6 }
 0x211   :  { %2249 = vmatmul.mubr.bf16.gmra.mrb[132].mxu0 %v9398_v2 }
 0x212   :  { %v718_v16 = vpack.c.bf16 %v7759_v12, %v7756_v4  ;;  %8043 = vmatpush3.bf16.msra.mxu0 %v10537_v9  ;;  %2256 = vmatprep.mubr.bf16.mxu0 %v9399_v5  ;;  %v9422_v4 = vld [vmem:[#allocation4 + $0x270] ss:$8 sps:$4 sm:$0xff]  }
 0x213   :  { %8044 = vmatprep.subr.bf16.mxu0 %v10543_v11  ;;  %v9402_v11 = vld [vmem:[#allocation4 + $0x234] ss:$8 sps:$4 sm:$0xff]  }
 0x214   :  { %v7760_v18 = vpop.f32.mrb[28].mxu0  ;;  %918 = vmatmul.mubr.bf16.gmra.mrb[24].mxu1 %v718_v16 }
 0x215   :  { %v7761_v22 = vpop.f32.mrb[29].mxu0  ;;  %927 = vmatprep.mubr.bf16.mxu1 %v10142_v57 }
 0x216   :  { %v7762_v27 = vadd.f32 %v7761_v22, %v7760_v18  ;;  %v7763_v28 = vpop.f32.mrb[30].mxu0  ;;  %8045 = vmatpush3.bf16.msra.mxu0 %v10549_v13  ;;  %v9423_v18 = vld [vmem:[#allocation4 + $0x284] ss:$8 sps:$4 sm:$0xff]  }
 0x217   :  { %v7764_v8 = vpop.f32.mrb[31].mxu0  ;;  %8046 = vmatprep.subr.bf16.mxu0 %v10555_v14 }
 0x218   :  { %v7765_v29 = vadd.f32 %v7764_v8, %v7763_v28 }
 0x219   :  { %2257 = vmatmul.mubr.bf16.gmra.mrb[136].mxu0 %v9401_v24 }
 0x21a   :  { %v719_v30 = vpack.c.bf16 %v7765_v29, %v7762_v27  ;;  %8047 = vmatpush3.bf16.msra.mxu0 %v10561_v15  ;;  %2264 = vmatprep.mubr.bf16.mxu0 %v9402_v11  ;;  %v9425_v27 = vld [vmem:[#allocation4 + $0x280] ss:$8 sps:$4 sm:$0xff]  }
 0x21b   :  { %8048 = vmatprep.subr.bf16.mxu0 %v10567_v17  ;;  %v9405_v17 = vld [vmem:[#allocation4 + $0x244] ss:$8 sps:$4 sm:$0xff]  }
 0x21c   :  { %v7766_v31 = vpop.f32.mrb[32].mxu0  ;;  %928 = vmatmul.mubr.bf16.gmra.mrb[28].mxu1 %v719_v30 }
 0x21d   :  { %v7767_v32 = vpop.f32.mrb[33].mxu0  ;;  %937 = vmatprep.mubr.bf16.mxu1 %v10142_v57 }
 0x21e   :  { %v7768_v34 = vadd.f32 %v7767_v32, %v7766_v31  ;;  %v7769_v35 = vpop.f32.mrb[34].mxu0  ;;  %8049 = vmatpush3.bf16.msra.mxu0 %v10573_v19  ;;  %v9429_v31 = vld [vmem:[#allocation4 + $0x294] ss:$8 sps:$4 sm:$0xff]  }
 0x21f   :  { %v7770_v14 = vpop.f32.mrb[35].mxu0  ;;  %8050 = vmatprep.subr.bf16.mxu0 %v10579_v20 }
 0x220   :  { %v7771_v36 = vadd.f32 %v7770_v14, %v7769_v35 }
 0x221   :  { %2265 = vmatmul.mubr.bf16.gmra.mrb[140].mxu0 %v9404_v33 }
 0x222   :  { %v720_v37 = vpack.c.bf16 %v7771_v36, %v7768_v34  ;;  %8051 = vmatpush3.bf16.msra.mxu0 %v10585_v21  ;;  %2272 = vmatprep.mubr.bf16.mxu0 %v9405_v17  ;;  %v9431_v34 = vld [vmem:[#allocation4 + $0x290] ss:$8 sps:$4 sm:$0xff]  }
 0x223   :  { %8052 = vmatprep.subr.bf16.mxu0 %v10591_v23 }
 0x224   :  { %v7772_v38 = vpop.f32.mrb[36].mxu0  ;;  %938 = vmatmul.mubr.bf16.gmra.mrb[32].mxu1 %v720_v37 }
 0x225   :  { %v7773_v39 = vpop.f32.mrb[37].mxu0  ;;  %947 = vmatprep.mubr.bf16.mxu1 %v10142_v57 }
 0x226   :  { %v7774_v20 = vadd.f32 %v7773_v39, %v7772_v38  ;;  %v7775_v42 = vpop.f32.mrb[38].mxu0  ;;  %8053 = vmatpush3.bf16.msra.mxu0 %v10597_v25  ;;  %v9438_v38 = vld [vmem:[#allocation4 + $0x2a4] ss:$8 sps:$4 sm:$0xff]  }
 0x227   :  { %v7776_v43 = vpop.f32.mrb[39].mxu0 }
 0x228   :  { %v7777_v44 = vadd.f32 %v7776_v43, %v7775_v42 }
 0x229   :  { %2273 = vmatmul.mubr.bf16.gmra.mrb[144].mxu0 %v9407_v40 }
 0x22a   :  { %v721_v23 = vpack.c.bf16 %v7777_v44, %v7774_v20  ;;  %2280 = vmatprep.mubr.bf16.mxu0 %v9411_v45  ;;  %v9447_v45 = vld [vmem:[#allocation4 + $0x2b4] ss:$8 sps:$4 sm:$0xff]  }
 0x22c   :  { %v7778_v46 = vpop.f32.mrb[40].mxu0  ;;  %948 = vmatmul.mubr.bf16.gmra.mrb[36].mxu1 %v721_v23 }
 0x22d   :  { %v7779_v47 = vpop.f32.mrb[41].mxu0  ;;  %957 = vmatprep.mubr.bf16.mxu1 %v10142_v57 }
 0x22e   :  { %v7780_v49 = vadd.f32 %v7779_v47, %v7778_v46  ;;  %v7781_v50 = vpop.f32.mrb[42].mxu0 }
 0x22f   :  { %v7782_v51 = vpop.f32.mrb[43].mxu0 }
 0x230   :  { %v7783_v52 = vadd.f32 %v7782_v51, %v7781_v50 }
 0x231   :  { %2281 = vmatmul.mubr.bf16.gmra.mrb[148].mxu0 %v9413_v48  ;;  %v9449_v48 = vld [vmem:[#allocation4 + $0x2b0] ss:$8 sps:$4 sm:$0xff]  }
 0x232   :  { %v722_v53 = vpack.c.bf16 %v7783_v52, %v7780_v49  ;;  %2288 = vmatprep.mubr.bf16.mxu0 %v9414_v54  ;;  %v9419_v54 = vld [vmem:[%s12158_s19 + $0x114] ss:$8 sps:$4 sm:$0xff]  }
 0x234   :  { %v7784_v55 = vpop.f32.mrb[44].mxu0  ;;  %958 = vmatmul.mubr.bf16.gmra.mrb[40].mxu1 %v722_v53  ;;  %v9408_v53 = vld [vmem:[%s12158_s19 + $0x100] ss:$8 sps:$4 sm:$0xff]  }
 0x235   :  { %v7785_v56 = vpop.f32.mrb[45].mxu0  ;;  %967 = vmatprep.mubr.bf16.mxu1 %v10142_v57 }
 0x236   :  { %v7786_v59 = vadd.f32 %v7785_v56, %v7784_v55  ;;  %v7787_v60 = vpop.f32.mrb[46].mxu0  ;;  %v9453_v56 = vld [vmem:[#allocation4 + $0x2c4] ss:$8 sps:$4 sm:$0xff]  }
 0x237   :  { %v7788_v61 = vpop.f32.mrb[47].mxu0 }
 0x238   :  { %v7789_v62 = vadd.f32 %v7788_v61, %v7787_v60  ;;  %v9455_v61 = vld [vmem:[#allocation4 + $0x2c0] ss:$8 sps:$4 sm:$0xff]  }
 0x239   :  { %2289 = vmatmul.mubr.bf16.gmra.mrb[152].mxu0 %v9416_v58 }
 0x23a   :  { %v723_v63 = vpack.c.bf16 %v7789_v62, %v7786_v59  ;;  %2296 = vmatprep.mubr.bf16.mxu0 %v9420_v0  ;;  %v9417_v59 = vld [vmem:[%s12158_s19 + $0x110] ss:$8 sps:$4 sm:$0xff]   ;;  %v9428_v62 = vld [vmem:[%s12158_s19 + $0x124] ss:$8 sps:$4 sm:$0xff]  }
 0x23c   :  { %v7790_v1 = vpop.f32.mrb[48].mxu0  ;;  %968 = vmatmul.mubr.bf16.gmra.mrb[44].mxu1 %v723_v63 }
 0x23d   :  { %v7791_v2 = vpop.f32.mrb[49].mxu0  ;;  %977 = vmatprep.mubr.bf16.mxu1 %v10142_v57 }
 0x23e   :  { %v7792_v6 = vadd.f32 %v7791_v2, %v7790_v1  ;;  %v7793_v10 = vpop.f32.mrb[50].mxu0  ;;  %v9426_v2 = vld [vmem:[%s12158_s19 + $0x120] ss:$8 sps:$4 sm:$0xff]  }
 0x23f   :  { %v7794_v12 = vpop.f32.mrb[51].mxu0 }
 0x240   :  { %v7795_v16 = vadd.f32 %v7794_v12, %v7793_v10  ;;  %v9456_v10 = vld [vmem:[#allocation4 + $0x2d4] ss:$8 sps:$4 sm:$0xff]  }
 0x241   :  { %2297 = vmatmul.mubr.bf16.gmra.mrb[156].mxu0 %v9422_v4  ;;  %v9434_v4 = vld [vmem:[%s12158_s19 + $0x134] ss:$8 sps:$4 sm:$0xff]  }
 0x242   :  { %v724_v5 = vpack.c.bf16 %v7795_v16, %v7792_v6  ;;  %2304 = vmatprep.mubr.bf16.mxu0 %v9423_v18  ;;  %v9432_v16 = vld [vmem:[%s12158_s19 + $0x130] ss:$8 sps:$4 sm:$0xff]  }
 0x243   :  { %v9458_v18 = vld [vmem:[#allocation4 + $0x2d0] ss:$8 sps:$4 sm:$0xff]  }
 0x244   :  { %v7796_v22 = vpop.f32.mrb[52].mxu0  ;;  %978 = vmatmul.mubr.bf16.gmra.mrb[48].mxu1 %v724_v5 }
 0x245   :  { %v7797_v24 = vpop.f32.mrb[53].mxu0  ;;  %987 = vmatprep.mubr.bf16.mxu1 %v10142_v57 }
 0x246   :  { %v7798_v28 = vadd.f32 %v7797_v24, %v7796_v22  ;;  %v7799_v8 = vpop.f32.mrb[54].mxu0  ;;  %v9437_v22 = vld [vmem:[%s12158_s19 + $0x144] ss:$8 sps:$4 sm:$0xff]  }
 0x247   :  { %v7800_v29 = vpop.f32.mrb[55].mxu0 }
 0x248   :  { %v7801_v30 = vadd.f32 %v7800_v29, %v7799_v8  ;;  %v9435_v8 = vld [vmem:[%s12158_s19 + $0x140] ss:$8 sps:$4 sm:$0xff]   ;;  %v9443_v29 = vld [vmem:[%s12158_s19 + $0x154] ss:$8 sps:$4 sm:$0xff]  }
 0x249   :  { %2305 = vmatmul.mubr.bf16.gmra.mrb[160].mxu0 %v9425_v27 }
 0x24a   :  { %v725_v11 = vpack.c.bf16 %v7801_v30, %v7798_v28  ;;  %2312 = vmatprep.mubr.bf16.mxu0 %v9429_v31 }
 0x24c   :  { %v7802_v32 = vpop.f32.mrb[56].mxu0  ;;  %988 = vmatmul.mubr.bf16.gmra.mrb[52].mxu1 %v725_v11  ;;  %v9459_v11 = vld [vmem:[#allocation4 + $0x2e4] ss:$8 sps:$4 sm:$0xff]  }
 0x24d   :  { %v7803_v33 = vpop.f32.mrb[57].mxu0  ;;  %997 = vmatprep.mubr.bf16.mxu1 %v10142_v57 }
 0x24e   :  { %v7804_v35 = vadd.f32 %v7803_v33, %v7802_v32  ;;  %v7805_v14 = vpop.f32.mrb[58].mxu0  ;;  %v9441_v32 = vld [vmem:[%s12158_s19 + $0x150] ss:$8 sps:$4 sm:$0xff]  }
 0x24f   :  { %v7806_v36 = vpop.f32.mrb[59].mxu0 }
 0x250   :  { %v7807_v37 = vadd.f32 %v7806_v36, %v7805_v14 }
 0x251   :  { %2313 = vmatmul.mubr.bf16.gmra.mrb[164].mxu0 %v9431_v34  ;;  %v9461_v34 = vld [vmem:[#allocation4 + $0x2e0] ss:$8 sps:$4 sm:$0xff]  }
 0x252   :  { %v726_v17 = vpack.c.bf16 %v7807_v37, %v7804_v35  ;;  %2320 = vmatprep.mubr.bf16.mxu0 %v9438_v38  ;;  %v9446_v35 = vld [vmem:[%s12158_s19 + $0x164] ss:$8 sps:$4 sm:$0xff]   ;;  %v9452_v38 = vld [vmem:[%s12158_s19 + $0x174] ss:$8 sps:$4 sm:$0xff]  }
 0x254   :  { %v7808_v39 = vpop.f32.mrb[60].mxu0  ;;  %998 = vmatmul.mubr.bf16.gmra.mrb[56].mxu1 %v726_v17  ;;  %v9444_v17 = vld [vmem:[%s12158_s19 + $0x160] ss:$8 sps:$4 sm:$0xff]  }
 0x255   :  { %v7809_v40 = vpop.f32.mrb[61].mxu0  ;;  %1007 = vmatprep.mubr.bf16.mxu1 %v10142_v57 }
 0x256   :  { %v7810_v20 = vadd.f32 %v7809_v40, %v7808_v39  ;;  %v7811_v42 = vpop.f32.mrb[62].mxu0  ;;  %v9462_v40 = vld [vmem:[#allocation4 + $0x2f4] ss:$8 sps:$4 sm:$0xff]  }
 0x257   :  { %v7812_v43 = vpop.f32.mrb[63].mxu0 }
 0x258   :  { %v7813_v44 = vadd.f32 %v7812_v43, %v7811_v42  ;;  %v9464_v43 = vld [vmem:[#allocation4 + $0x2f0] ss:$8 sps:$4 sm:$0xff]  }
 0x259   :  { %2321 = vmatmul.mubr.bf16.gmra.mrb[168].mxu0 %v9440_v41 }
 0x25a   :  { %v727_v23 = vpack.c.bf16 %v7813_v44, %v7810_v20  ;;  %2328 = vmatprep.mubr.bf16.mxu0 %v9447_v45  ;;  %v9450_v20 = vld [vmem:[%s12158_s19 + $0x170] ss:$8 sps:$4 sm:$0xff]  }
 0x25c   :  { %1008 = vmatmul.mubr.bf16.gmra.mrb[60].mxu1 %v727_v23  ;;  %v7830_v46 = vpop.f32.mrb[64].mxu0 }
 0x25d   :  { %1130 = vmatprep.mubr.bf16.mxu1 %v10142_v57  ;;  %v7831_v47 = vpop.f32.mrb[65].mxu0 }
 0x25e   :  { %v10688_v49 = vadd.f32 %v7831_v47, %v7830_v46  ;;  %v7833_v50 = vpop.f32.mrb[66].mxu0  ;;  %v9467_v47 = vld [vmem:[#allocation4 + $0x304] ss:$8 sps:$4 sm:$0xff]  }
 0x25f   :  { %v7834_v51 = vpop.f32.mrb[67].mxu0 }
 0x260   :  { %v10690_v52 = vadd.f32 %v7834_v51, %v7833_v50  ;;  %v9465_v51 = vld [vmem:[#allocation4 + $0x300] ss:$8 sps:$4 sm:$0xff]  }
 0x261   :  { %2329 = vmatmul.mubr.bf16.gmra.mrb[172].mxu0 %v9449_v48 }
 0x262   :  { %v1645_v55 = vpack.c.bf16 %v10690_v52, %v10688_v49  ;;  %2336 = vmatprep.mubr.bf16.mxu0 %v9453_v56 }
 0x264   :  { %1131 = vmatmul.mubr.bf16.vlgmr.msra.gmra.mrb[0].mxu1 %v10513_v3  ;;  %v7836_v58 = vpop.f32.mrb[68].mxu0 }
 0x265   :  { %1140 = vmatprep.mubr.bf16.mxu1 %v10142_v57  ;;  %1759 = vmatpush1.bf16.msra.mxu1 %v9408_v53  ;;  %v7837_v60 = vpop.f32.mrb[69].mxu0 }
 0x266   :  { %1760 = vmatprep.subr.bf16.mxu1 %v9419_v54  ;;  %v10708_v63 = vadd.f32 %v7837_v60, %v7836_v58  ;;  %v7839_v0 = vpop.f32.mrb[70].mxu0  ;;  %v9468_v60 = vld [vmem:[#allocation4 + $0x314] ss:$8 sps:$4 sm:$0xff]  }
 0x267   :  { %v7840_v3 = vpop.f32.mrb[71].mxu0 }
 0x268   :  { %v10710_v1 = vadd.f32 %v7840_v3, %v7839_v0 }
 0x269   :  { %1761 = vmatpush1.bf16.msra.mxu1 %v9417_v59  ;;  %2337 = vmatmul.mubr.bf16.gmra.mrb[176].mxu0 %v9455_v61 }
 0x26a   :  { %1762 = vmatprep.subr.bf16.mxu1 %v9428_v62  ;;  %v1646_v6 = vpack.c.bf16 %v10710_v1, %v10708_v63  ;;  %2344 = vmatprep.mubr.bf16.mxu0 %v9456_v10  ;;  %v9470_v62 = vld [vmem:[#allocation4 + $0x310] ss:$8 sps:$4 sm:$0xff]  }
 0x26c   :  { %1141 = vmatmul.mubr.bf16.gmra.mrb[4].mxu1 %v10525_v7  ;;  %v7842_v12 = vpop.f32.mrb[72].mxu0 }
 0x26d   :  { %1150 = vmatprep.mubr.bf16.mxu1 %v10142_v57  ;;  %1763 = vmatpush1.bf16.msra.mxu1 %v9426_v2  ;;  %v7843_v5 = vpop.f32.mrb[73].mxu0 }
 0x26e   :  { %1764 = vmatprep.subr.bf16.mxu1 %v9434_v4  ;;  %v10728_v24 = vadd.f32 %v7843_v5, %v7842_v12  ;;  %v7845_v27 = vpop.f32.mrb[74].mxu0  ;;  %v9471_v12 = vld [vmem:[#allocation4 + $0x324] ss:$8 sps:$4 sm:$0xff]   ;;  %v9473_v5 = vld [vmem:[#allocation4 + $0x320] ss:$8 sps:$4 sm:$0xff]  }
 0x26f   :  { %v7846_v7 = vpop.f32.mrb[75].mxu0 }
 0x270   :  { %v10730_v28 = vadd.f32 %v7846_v7, %v7845_v27 }
 0x271   :  { %1765 = vmatpush1.bf16.msra.mxu1 %v9432_v16  ;;  %2345 = vmatmul.mubr.bf16.gmra.mrb[180].mxu0 %v9458_v18 }
 0x272   :  { %1766 = vmatprep.subr.bf16.mxu1 %v9437_v22  ;;  %v1647_v30 = vpack.c.bf16 %v10730_v28, %v10728_v24  ;;  %2352 = vmatprep.mubr.bf16.mxu0 %v9459_v11 }
 0x274   :  { %1151 = vmatmul.mubr.bf16.gmra.mrb[8].mxu1 %v10537_v9  ;;  %v7848_v31 = vpop.f32.mrb[76].mxu0 }
 0x275   :  { %1160 = vmatprep.mubr.bf16.mxu1 %v10142_v57  ;;  %1767 = vmatpush1.bf16.msra.mxu1 %v9435_v8  ;;  %v7849_v33 = vpop.f32.mrb[77].mxu0 }
 0x276   :  { %1768 = vmatprep.subr.bf16.mxu1 %v9443_v29  ;;  %v10748_v14 = vadd.f32 %v7849_v33, %v7848_v31  ;;  %v7851_v36 = vpop.f32.mrb[78].mxu0  ;;  %v9474_v29 = vld [vmem:[#allocation4 + $0x334] ss:$8 sps:$4 sm:$0xff]   ;;  %v9476_v31 = vld [vmem:[#allocation4 + $0x330] ss:$8 sps:$4 sm:$0xff]  }
 0x277   :  { %v7852_v9 = vpop.f32.mrb[79].mxu0 }
 0x278   :  { %v10750_v37 = vadd.f32 %v7852_v9, %v7851_v36  ;;  %v9477_v9 = vld [vmem:[#allocation4 + $0x344] ss:$8 sps:$4 sm:$0xff]  }
 0x279   :  { %1769 = vmatpush1.bf16.msra.mxu1 %v9441_v32  ;;  %2353 = vmatmul.mubr.bf16.gmra.mrb[184].mxu0 %v9461_v34 }
 0x27a   :  { %1770 = vmatprep.subr.bf16.mxu1 %v9446_v35  ;;  %v1648_v39 = vpack.c.bf16 %v10750_v37, %v10748_v14  ;;  %2360 = vmatprep.mubr.bf16.mxu0 %v9462_v40  ;;  %v9482_v40 = vld [vmem:[%s12158_s19 + $0x184] ss:$8 sps:$4 sm:$0xff]  }
 0x27c   :  { %1161 = vmatmul.mubr.bf16.gmra.mrb[12].mxu1 %v10549_v13  ;;  %v7854_v41 = vpop.f32.mrb[80].mxu0 }
 0x27d   :  { %1170 = vmatprep.mubr.bf16.mxu1 %v10142_v57  ;;  %1771 = vmatpush1.bf16.msra.mxu1 %v9444_v17  ;;  %v7855_v42 = vpop.f32.mrb[81].mxu0 }
 0x27e   :  { %1772 = vmatprep.subr.bf16.mxu1 %v9452_v38  ;;  %v10765_v44 = vadd.f32 %v7855_v42, %v7854_v41  ;;  %v7857_v23 = vpop.f32.mrb[82].mxu0  ;;  %v9479_v38 = vld [vmem:[#allocation4 + $0x340] ss:$8 sps:$4 sm:$0xff]  }
 0x27f   :  { %v7858_v45 = vpop.f32.mrb[83].mxu0 }
 0x280   :  { %v10767_v46 = vadd.f32 %v7858_v45, %v7857_v23  ;;  %v9483_v23 = vld [vmem:[#allocation4 + $0x354] ss:$8 sps:$4 sm:$0xff]   ;;  %v9841_v45 = vld [vmem:[%s12157_s3 + $0x48] sm:$0xff]  }
 0x281   :  { %1773 = vmatpush1.bf16.msra.mxu1 %v9450_v20  ;;  %2361 = vmatmul.mubr.bf16.gmra.mrb[188].mxu0 %v9464_v43 }
 0x282   :  { %v1649_v13 = vpack.c.bf16 %v10767_v46, %v10765_v44  ;;  %2964 = vmatprep.mubr.bf16.mxu0 %v9467_v47  ;;  %2482 = vmatprep.subr.bf16.mxu1 %v9482_v40  ;;  %v9495_v40 = vld [vmem:[#allocation4 + $0x384] ss:$8 sps:$4 sm:$0xff]  }
 0x284   :  { %1171 = vmatmul.mubr.bf16.gmra.mrb[16].mxu1 %v10561_v15  ;;  %v7860_v48 = vpop.f32.mrb[84].mxu0 }
 0x285   :  { %1180 = vmatprep.mubr.bf16.mxu1 %v10142_v57  ;;  %v7861_v50 = vpop.f32.mrb[85].mxu0 }
 0x286   :  { %v10773_v53 = vadd.f32 %v7861_v50, %v7860_v48  ;;  %v7863_v54 = vpop.f32.mrb[86].mxu0  ;;  %v9485_v50 = vld [vmem:[#allocation4 + $0x350] ss:$8 sps:$4 sm:$0xff]  }
 0x287   :  { %v7864_v56 = vpop.f32.mrb[87].mxu0 }
 0x288   :  { %v10775_v58 = vadd.f32 %v7864_v56, %v7863_v54 }
 0x289   :  { %2965 = vmatmul.mubr.bf16.vlgmr.msra.gmra.mrb[192].mxu0 %v9465_v51 }
 0x28a   :  { %v1650_v59 = vpack.c.bf16 %v10775_v58, %v10773_v53  ;;  %2972 = vmatprep.mubr.bf16.mxu0 %v9468_v60 }
 0x28c   :  { %1181 = vmatmul.mubr.bf16.gmra.mrb[20].mxu1 %v10573_v19  ;;  %v7866_v15 = vpop.f32.mrb[88].mxu0 }
 0x28d   :  { %1190 = vmatprep.mubr.bf16.mxu1 %v10142_v57  ;;  %v7867_v61 = vpop.f32.mrb[89].mxu0 }
 0x28e   :  { %v10781_v0 = vadd.f32 %v7867_v61, %v7866_v15  ;;  %v7869_v3 = vpop.f32.mrb[90].mxu0  ;;  %v9486_v61 = vld [vmem:[#allocation4 + $0x364] ss:$8 sps:$4 sm:$0xff]  }
 0x28f   :  { %v7870_v2 = vpop.f32.mrb[91].mxu0 }
 0x290   :  { %v10783_v4 = vadd.f32 %v7870_v2, %v7869_v3 }
 0x291   :  { %2973 = vmatmul.mubr.bf16.gmra.mrb[196].mxu0 %v9470_v62  ;;  %v9842_v62 = vld [vmem:[%s12157_s3 + $0x50] sm:$0xff]  }
 0x292   :  { %v1651_v10 = vpack.c.bf16 %v10783_v4, %v10781_v0  ;;  %2980 = vmatprep.mubr.bf16.mxu0 %v9471_v12  ;;  %v9488_v12 = vld [vmem:[#allocation4 + $0x360] ss:$8 sps:$4 sm:$0xff]  }
 0x294   :  { %1191 = vmatmul.mubr.bf16.gmra.mrb[24].mxu1 %v10585_v21  ;;  %v7872_v19 = vpop.f32.mrb[92].mxu0 }
 0x295   :  { %1200 = vmatprep.mubr.bf16.mxu1 %v10142_v57  ;;  %v7873_v16 = vpop.f32.mrb[93].mxu0 }
 0x296   :  { %v10789_v18 = vadd.f32 %v7873_v16, %v7872_v19  ;;  %v7875_v22 = vpop.f32.mrb[94].mxu0 }
 0x297   :  { %v7876_v27 = vpop.f32.mrb[95].mxu0 }
 0x298   :  { %v10791_v7 = vadd.f32 %v7876_v27, %v7875_v22 }
 0x299   :  { %2981 = vmatmul.mubr.bf16.gmra.mrb[200].mxu0 %v9473_v5 }
 0x29a   :  { %v1652_v8 = vpack.c.bf16 %v10791_v7, %v10789_v18  ;;  %2988 = vmatprep.mubr.bf16.mxu0 %v9474_v29  ;;  %v9492_v29 = vld [vmem:[#allocation4 + $0x374] ss:$8 sps:$4 sm:$0xff]   ;;  %v9539_v18 = vld [vmem:[%s12158_s19 + $0x204] ss:$8 sps:$4 sm:$0xff]  }
 0x29c   :  { %1201 = vmatmul.mubr.bf16.gmra.mrb[28].mxu1 %v10597_v25  ;;  %v7878_v21 = vpop.f32.mrb[96].mxu0 }
 0x29d   :  { %1210 = vmatprep.mubr.bf16.mxu1 %v10142_v57  ;;  %v7879_v11 = vpop.f32.mrb[97].mxu0 }
 0x29e   :  { %v10797_v32 = vadd.f32 %v7879_v11, %v7878_v21  ;;  %v7881_v33 = vpop.f32.mrb[98].mxu0  ;;  %v9843_v21 = vld [vmem:[%s12157_s3 + $0x58] sm:$0xff]  }
 0x29f   :  { %v7882_v34 = vpop.f32.mrb[99].mxu0 }
 0x2a0   :  { %v10799_v35 = vadd.f32 %v7882_v34, %v7881_v33  ;;  %v9494_v33 = vld [vmem:[#allocation4 + $0x370] ss:$8 sps:$4 sm:$0xff]  }
 0x2a1   :  { %2989 = vmatmul.mubr.bf16.gmra.mrb[204].mxu0 %v9476_v31 }
 0x2a2   :  { %v1653_v36 = vpack.c.bf16 %v10799_v35, %v10797_v32  ;;  %2996 = vmatprep.mubr.bf16.mxu0 %v9477_v9 }
 0x2a4   :  { %1211 = vmatmul.mubr.bf16.gmra.mrb[32].mxu1 %v10603_v26  ;;  %v7884_v25 = vpop.f32.mrb[100].mxu0 }
 0x2a5   :  { %1220 = vmatprep.mubr.bf16.mxu1 %v10142_v57  ;;  %v7885_v17 = vpop.f32.mrb[101].mxu0 }
 0x2a6   :  { %v10808_v41 = vadd.f32 %v7885_v17, %v7884_v25  ;;  %v7887_v20 = vpop.f32.mrb[102].mxu0 }
 0x2a7   :  { %v7888_v42 = vpop.f32.mrb[103].mxu0 }
 0x2a8   :  { %v10810_v43 = vadd.f32 %v7888_v42, %v7887_v20  ;;  %v9844_v20 = vld [vmem:[%s12157_s3 + $0x60] sm:$0xff]  }
 0x2a9   :  { %2997 = vmatmul.mubr.bf16.gmra.mrb[208].mxu0 %v9479_v38 }
 0x2aa   :  { %v1654_v26 = vpack.c.bf16 %v10810_v43, %v10808_v41  ;;  %3004 = vmatprep.mubr.bf16.mxu0 %v9483_v23 }
 0x2ac   :  { %1221 = vmatmul.mubr.bf16.gmra.mrb[36].mxu1 %v9841_v45  ;;  %v7890_v47 = vpop.f32.mrb[104].mxu0  ;;  %v9497_v45 = vld [vmem:[#allocation4 + $0x380] ss:$8 sps:$4 sm:$0xff]  }
 0x2ad   :  { %1230 = vmatprep.mubr.bf16.mxu1 %v10142_v57  ;;  %v7891_v48 = vpop.f32.mrb[105].mxu0 }
 0x2ae   :  { %v10818_v51 = vadd.f32 %v7891_v48, %v7890_v47  ;;  %v7893_v54 = vpop.f32.mrb[106].mxu0 }
 0x2af   :  { %v7894_v56 = vpop.f32.mrb[107].mxu0 }
 0x2b0   :  { %v10820_v60 = vadd.f32 %v7894_v56, %v7893_v54 }
 0x2b1   :  { %3005 = vmatmul.mubr.bf16.gmra.mrb[212].mxu0 %v9485_v50 }
 0x2b2   :  { %v1655_v15 = vpack.c.bf16 %v10820_v60, %v10818_v51  ;;  %3012 = vmatprep.mubr.bf16.mxu0 %v9486_v61  ;;  %v9504_v61 = vld [vmem:[#allocation4 + $0x394] ss:$8 sps:$4 sm:$0xff]  }
 0x2b4   :  { %1231 = vmatmul.mubr.bf16.gmra.mrb[40].mxu1 %v9842_v62  ;;  %v7896_v3 = vpop.f32.mrb[108].mxu0  ;;  %v9845_v62 = vld [vmem:[%s12157_s3 + $0x68] sm:$0xff]  }
 0x2b5   :  { %1240 = vmatprep.mubr.bf16.mxu1 %v10142_v57  ;;  %v7897_v2 = vpop.f32.mrb[109].mxu0 }
 0x2b6   :  { %v10828_v19 = vadd.f32 %v7897_v2, %v7896_v3  ;;  %v7899_v16 = vpop.f32.mrb[110].mxu0 }
 0x2b7   :  { %v7900_v5 = vpop.f32.mrb[111].mxu0 }
 0x2b8   :  { %v10830_v22 = vadd.f32 %v7900_v5, %v7899_v16 }
 0x2b9   :  { %3013 = vmatmul.mubr.bf16.gmra.mrb[216].mxu0 %v9488_v12  ;;  %v9506_v12 = vld [vmem:[#allocation4 + $0x390] ss:$8 sps:$4 sm:$0xff]  }
 0x2ba   :  { %v1656_v27 = vpack.c.bf16 %v10830_v22, %v10828_v19  ;;  %3020 = vmatprep.mubr.bf16.mxu0 %v9492_v29 }
 0x2bc   :  { %1241 = vmatmul.mubr.bf16.gmra.mrb[44].mxu1 %v9843_v21  ;;  %v7902_v11 = vpop.f32.mrb[112].mxu0 }
 0x2bd   :  { %1250 = vmatprep.mubr.bf16.mxu1 %v10142_v57  ;;  %v7903_v31 = vpop.f32.mrb[113].mxu0 }
 0x2be   :  { %v10838_v34 = vadd.f32 %v7903_v31, %v7902_v11  ;;  %v7905_v9 = vpop.f32.mrb[114].mxu0  ;;  %v9513_v31 = vld [vmem:[#allocation4 + $0x3a4] ss:$8 sps:$4 sm:$0xff]  }
 0x2bf   :  { %v7906_v25 = vpop.f32.mrb[115].mxu0 }
 0x2c0   :  { %v10840_v17 = vadd.f32 %v7906_v25, %v7905_v9 }
 0x2c1   :  { %3021 = vmatmul.mubr.bf16.gmra.mrb[220].mxu0 %v9494_v33  ;;  %v9846_v33 = vld [vmem:[%s12157_s3 + $0x70] sm:$0xff]  }
 0x2c2   :  { %v1657_v38 = vpack.c.bf16 %v10840_v17, %v10838_v34  ;;  %3028 = vmatprep.mubr.bf16.mxu0 %v9495_v40  ;;  %v9515_v40 = vld [vmem:[#allocation4 + $0x3a0] ss:$8 sps:$4 sm:$0xff]  }
 0x2c4   :  { %1251 = vmatmul.mubr.bf16.gmra.mrb[48].mxu1 %v9844_v20  ;;  %v7908_v42 = vpop.f32.mrb[116].mxu0 }
 0x2c5   :  { %1260 = vmatprep.mubr.bf16.mxu1 %v10142_v57  ;;  %v7909_v23 = vpop.f32.mrb[117].mxu0 }
 0x2c6   :  { %v10848_v47 = vadd.f32 %v7909_v23, %v7908_v42  ;;  %v7911_v48 = vpop.f32.mrb[118].mxu0 }
 0x2c7   :  { %v7912_v50 = vpop.f32.mrb[119].mxu0 }
 0x2c8   :  { %v10850_v54 = vadd.f32 %v7912_v50, %v7911_v48  ;;  %v9522_v50 = vld [vmem:[#allocation4 + $0x3b4] ss:$8 sps:$4 sm:$0xff]  }
 0x2c9   :  { %3029 = vmatmul.mubr.bf16.gmra.mrb[224].mxu0 %v9497_v45 }
 0x2ca   :  { %v1658_v56 = vpack.c.bf16 %v10850_v54, %v10848_v47  ;;  %3036 = vmatprep.mubr.bf16.mxu0 %v9504_v61  ;;  %v9847_v61 = vld [vmem:[%s12157_s3 + $0x78] sm:$0xff]  }
 0x2cc   :  { %1261 = vmatmul.mubr.bf16.gmra.mrb[52].mxu1 %v9845_v62  ;;  %v7914_v3 = vpop.f32.mrb[120].mxu0 }
 0x2cd   :  { %1270 = vmatprep.mubr.bf16.mxu1 %v10142_v57  ;;  %v7915_v2 = vpop.f32.mrb[121].mxu0 }
 0x2ce   :  { %v10858_v16 = vadd.f32 %v7915_v2, %v7914_v3  ;;  %v7917_v5 = vpop.f32.mrb[122].mxu0  ;;  %v9524_v2 = vld [vmem:[#allocation4 + $0x3b0] ss:$8 sps:$4 sm:$0xff]  }
 0x2cf   :  { %v7918_v29 = vpop.f32.mrb[123].mxu0 }
 0x2d0   :  { %v10860_v21 = vadd.f32 %v7918_v29, %v7917_v5 }
 0x2d1   :  { %3037 = vmatmul.mubr.bf16.gmra.mrb[228].mxu0 %v9506_v12 }
 0x2d2   :  { %v1659_v11 = vpack.c.bf16 %v10860_v21, %v10858_v16  ;;  %3044 = vmatprep.mubr.bf16.mxu0 %v9513_v31 }
 0x2d4   :  { %1271 = vmatmul.mubr.bf16.gmra.mrb[56].mxu1 %v9846_v33  ;;  %v7920_v9 = vpop.f32.mrb[124].mxu0  ;;  %v9480_v33 = vld [vmem:[%s12158_s19 + $0x180] ss:$8 sps:$4 sm:$0xff]  }
 0x2d5   :  { %1280 = vmatprep.mubr.bf16.mxu1 %v10142_v57  ;;  %v7921_v25 = vpop.f32.mrb[125].mxu0 }
 0x2d6   :  { %v10868_v20 = vadd.f32 %v7921_v25, %v7920_v9  ;;  %v7923_v42 = vpop.f32.mrb[126].mxu0  ;;  %v9491_v9 = vld [vmem:[%s12158_s19 + $0x194] ss:$8 sps:$4 sm:$0xff]  }
 0x2d7   :  { %v7924_v23 = vpop.f32.mrb[127].mxu0 }
 0x2d8   :  { %v10870_v45 = vadd.f32 %v7924_v23, %v7923_v42  ;;  %v9489_v23 = vld [vmem:[%s12158_s19 + $0x190] ss:$8 sps:$4 sm:$0xff]  }
 0x2d9   :  { %3045 = vmatmul.mubr.bf16.gmra.mrb[232].mxu0 %v9515_v40  ;;  %v9525_v40 = vld [vmem:[#allocation4 + $0x3c4] ss:$8 sps:$4 sm:$0xff]  }
 0x2da   :  { %v1660_v48 = vpack.c.bf16 %v10870_v45, %v10868_v20  ;;  %3052 = vmatprep.mubr.bf16.mxu0 %v9522_v50 }
 0x2dc   :  { %1281 = vmatmul.mubr.bf16.gmra.mrb[60].mxu1 %v9847_v61  ;;  %v7942_v62 = vpop.f32.mrb[128].mxu0  ;;  %v9527_v61 = vld [vmem:[#allocation4 + $0x3c0] ss:$8 sps:$4 sm:$0xff]  }
 0x2dd   :  { %1790 = vmatprep.mubr.bf16.mxu1 %v10142_v57  ;;  %v7943_v3 = vpop.f32.mrb[129].mxu0 }
 0x2de   :  { %v10878_v12 = vadd.f32 %v7943_v3, %v7942_v62  ;;  %v7945_v5 = vpop.f32.mrb[130].mxu0  ;;  %v9500_v62 = vld [vmem:[%s12158_s19 + $0x1a4] ss:$8 sps:$4 sm:$0xff]  }
 0x2df   :  { %v7946_v29 = vpop.f32.mrb[131].mxu0 }
 0x2e0   :  { %v10880_v31 = vadd.f32 %v7946_v29, %v7945_v5  ;;  %v9503_v5 = vld [vmem:[%s12158_s19 + $0x1b4] ss:$8 sps:$4 sm:$0xff]  }
 0x2e1   :  { %3053 = vmatmul.mubr.bf16.gmra.mrb[236].mxu0 %v9524_v2 }
 0x2e2   :  { %v2369_v25 = vpack.c.bf16 %v10880_v31, %v10878_v12  ;;  %3060 = vmatprep.mubr.bf16.mxu0 %v9525_v40  ;;  %v9501_v40 = vld [vmem:[%s12158_s19 + $0x1b0] ss:$8 sps:$4 sm:$0xff]   ;;  %v9543_v31 = vld [vmem:[%s12158_s19 + $0x220] ss:$8 sps:$4 sm:$0xff]  }
 0x2e4   :  { %1791 = vmatmul.mubr.bf16.vlgmr.msra.gmra.mrb[0].mxu1 %v1645_v55  ;;  %v7948_v42 = vpop.f32.mrb[132].mxu0  ;;  %v9498_v55 = vld [vmem:[%s12158_s19 + $0x1a0] ss:$8 sps:$4 sm:$0xff]  }
 0x2e5   :  { %1800 = vmatprep.mubr.bf16.mxu1 %v10142_v57  ;;  %2483 = vmatpush1.bf16.msra.mxu1 %v9480_v33  ;;  %v7949_v50 = vpop.f32.mrb[133].mxu0  ;;  %v9528_v33 = vld [vmem:[#allocation4 + $0x3d4] ss:$8 sps:$4 sm:$0xff]  }
 0x2e6   :  { %2484 = vmatprep.subr.bf16.mxu1 %v9491_v9  ;;  %v10900_v3 = vadd.f32 %v7949_v50, %v7948_v42  ;;  %v7951_v2 = vpop.f32.mrb[134].mxu0  ;;  %v9509_v50 = vld [vmem:[%s12158_s19 + $0x1c4] ss:$8 sps:$4 sm:$0xff]  }
 0x2e7   :  { %v7952_v49 = vpop.f32.mrb[135].mxu0 }
 0x2e8   :  { %v10902_v52 = vadd.f32 %v7952_v49, %v7951_v2  ;;  %v9512_v2 = vld [vmem:[%s12158_s19 + $0x1d4] ss:$8 sps:$4 sm:$0xff]  }
 0x2e9   :  { %2485 = vmatpush1.bf16.msra.mxu1 %v9489_v23  ;;  %3061 = vmatmul.mubr.bf16.gmra.mrb[240].mxu0 %v9527_v61  ;;  %v9530_v23 = vld [vmem:[#allocation4 + $0x3d0] ss:$8 sps:$4 sm:$0xff]  }
 0x2ea   :  { %2486 = vmatprep.subr.bf16.mxu1 %v9500_v62  ;;  %v2370_v29 = vpack.c.bf16 %v10902_v52, %v10900_v3  ;;  %3068 = vmatprep.mubr.bf16.mxu0 %v9528_v33  ;;  %v9510_v33 = vld [vmem:[%s12158_s19 + $0x1d0] ss:$8 sps:$4 sm:$0xff]   ;;  %v9549_v52 = vld [vmem:[%s12158_s19 + $0x240] ss:$8 sps:$4 sm:$0xff]  }
 0x2ec   :  { %1801 = vmatmul.mubr.bf16.gmra.mrb[4].mxu1 %v1646_v6  ;;  %v7954_v9 = vpop.f32.mrb[136].mxu0  ;;  %v9507_v6 = vld [vmem:[%s12158_s19 + $0x1c0] ss:$8 sps:$4 sm:$0xff]  }
 0x2ed   :  { %1810 = vmatprep.mubr.bf16.mxu1 %v10142_v57  ;;  %2487 = vmatpush1.bf16.msra.mxu1 %v9498_v55  ;;  %v7955_v42 = vpop.f32.mrb[137].mxu0  ;;  %v9531_v55 = vld [vmem:[#allocation4 + $0x3e4] ss:$8 sps:$4 sm:$0xff]  }
 0x2ee   :  { %2488 = vmatprep.subr.bf16.mxu1 %v9503_v5  ;;  %v10922_v61 = vadd.f32 %v7955_v42, %v7954_v9  ;;  %v7957_v62 = vpop.f32.mrb[138].mxu0  ;;  %v9518_v42 = vld [vmem:[%s12158_s19 + $0x1e4] ss:$8 sps:$4 sm:$0xff]  }
 0x2ef   :  { %v7958_v63 = vpop.f32.mrb[139].mxu0 }
 0x2f0   :  { %v10924_v1 = vadd.f32 %v7958_v63, %v7957_v62  ;;  %v9521_v62 = vld [vmem:[%s12158_s19 + $0x1f4] ss:$8 sps:$4 sm:$0xff]  }
 0x2f1   :  { %2489 = vmatpush1.bf16.msra.mxu1 %v9501_v40  ;;  %3069 = vmatmul.mubr.bf16.gmra.mrb[244].mxu0 %v9530_v23  ;;  %v9533_v40 = vld [vmem:[#allocation4 + $0x3e0] ss:$8 sps:$4 sm:$0xff]  }
 0x2f2   :  { %2490 = vmatprep.subr.bf16.mxu1 %v9509_v50  ;;  %v2371_v49 = vpack.c.bf16 %v10924_v1, %v10922_v61  ;;  %3076 = vmatprep.mubr.bf16.mxu0 %v9531_v55  ;;  %v9519_v55 = vld [vmem:[%s12158_s19 + $0x1f0] ss:$8 sps:$4 sm:$0xff]   ;;  %v9555_v1 = vld [vmem:[%s12158_s19 + $0x260] ss:$8 sps:$4 sm:$0xff]  }
 0x2f4   :  { %1811 = vmatmul.mubr.bf16.gmra.mrb[8].mxu1 %v1647_v30  ;;  %v7960_v5 = vpop.f32.mrb[140].mxu0  ;;  %v9516_v30 = vld [vmem:[%s12158_s19 + $0x1e0] ss:$8 sps:$4 sm:$0xff]  }
 0x2f5   :  { %1820 = vmatprep.mubr.bf16.mxu1 %v10142_v57  ;;  %2491 = vmatpush1.bf16.msra.mxu1 %v9507_v6  ;;  %v7961_v9 = vpop.f32.mrb[141].mxu0  ;;  %v9534_v6 = vld [vmem:[#allocation4 + $0x3f4] ss:$8 sps:$4 sm:$0xff]  }
 0x2f6   :  { %2492 = vmatprep.subr.bf16.mxu1 %v9512_v2  ;;  %v10944_v23 = vadd.f32 %v7961_v9, %v7960_v5  ;;  %v7963_v50 = vpop.f32.mrb[142].mxu0 }
 0x2f7   :  { %v7964_v24 = vpop.f32.mrb[143].mxu0 }
 0x2f8   :  { %v10946_v28 = vadd.f32 %v7964_v24, %v7963_v50 }
 0x2f9   :  { %2493 = vmatpush1.bf16.msra.mxu1 %v9510_v33  ;;  %3077 = vmatmul.mubr.bf16.gmra.mrb[248].mxu0 %v9533_v40  ;;  %v9536_v33 = vld [vmem:[#allocation4 + $0x3f0] ss:$8 sps:$4 sm:$0xff]  }
 0x2fa   :  { %2494 = vmatprep.subr.bf16.mxu1 %v9518_v42  ;;  %v2372_v63 = vpack.c.bf16 %v10946_v28, %v10944_v23  ;;  %3084 = vmatprep.mubr.bf16.mxu0 %v9534_v6 }
 0x2fc   :  { %1821 = vmatmul.mubr.bf16.gmra.mrb[12].mxu1 %v1648_v39  ;;  %v7966_v2 = vpop.f32.mrb[144].mxu0 }
 0x2fd   :  { %1830 = vmatprep.mubr.bf16.mxu1 %v10142_v57  ;;  %2495 = vmatpush1.bf16.msra.mxu1 %v9516_v30  ;;  %v7967_v5 = vpop.f32.mrb[145].mxu0 }
 0x2fe   :  { %2496 = vmatprep.subr.bf16.mxu1 %v9521_v62  ;;  %v10963_v9 = vadd.f32 %v7967_v5, %v7966_v2  ;;  %v7969_v40 = vpop.f32.mrb[146].mxu0 }
 0x2ff   :  { %v7970_v42 = vpop.f32.mrb[147].mxu0 }
 0x300   :  { %v10965_v50 = vadd.f32 %v7970_v42, %v7969_v40 }
 0x301   :  { %2497 = vmatpush1.bf16.msra.mxu1 %v9519_v55  ;;  %3085 = vmatmul.mubr.bf16.gmra.mrb[252].mxu0 %v9536_v33 }
 0x302   :  { %v2373_v14 = vpack.c.bf16 %v10965_v50, %v10963_v9  ;;  %3206 = vmatprep.subr.bf16.mxu1 %v9539_v18 }
 0x304   :  { %1831 = vmatmul.mubr.bf16.gmra.mrb[16].mxu1 %v1649_v13  ;;  %v7972_v37 = vpop.f32.mrb[148].mxu0 }
 0x305   :  { %1840 = vmatprep.mubr.bf16.mxu1 %v10142_v57  ;;  %v7973_v39 = vpop.f32.mrb[149].mxu0 }
 0x306   :  { %v10973_v24 = vadd.f32 %v7973_v39, %v7972_v37  ;;  %v7975_v30 = vpop.f32.mrb[150].mxu0 }
 0x307   :  { %v7976_v62 = vpop.f32.mrb[151].mxu0 }
 0x308   :  { %v10975_v6 = vadd.f32 %v7976_v62, %v7975_v30 }
 0x30a   :  { %v2374_v2 = vpack.c.bf16 %v10975_v6, %v10973_v24 }
 0x30c   :  { %1841 = vmatmul.mubr.bf16.gmra.mrb[20].mxu1 %v1650_v59  ;;  %v7978_v55 = vpop.f32.mrb[152].mxu0 }
 0x30d   :  { %1850 = vmatprep.mubr.bf16.mxu1 %v10142_v57  ;;  %v7979_v44 = vpop.f32.mrb[153].mxu0 }
 0x30e   :  { %v10983_v46 = vadd.f32 %v7979_v44, %v7978_v55  ;;  %v7981_v13 = vpop.f32.mrb[154].mxu0 }
 0x30f   :  { %v7982_v5 = vpop.f32.mrb[155].mxu0 }
 0x310   :  { %v10985_v33 = vadd.f32 %v7982_v5, %v7981_v13 }
 0x312   :  { %v2375_v40 = vpack.c.bf16 %v10985_v33, %v10983_v46 }
 0x314   :  { %1851 = vmatmul.mubr.bf16.gmra.mrb[24].mxu1 %v1651_v10  ;;  %v7984_v42 = vpop.f32.mrb[156].mxu0 }
 0x315   :  { %1860 = vmatprep.mubr.bf16.mxu1 %v10142_v57  ;;  %v7985_v53 = vpop.f32.mrb[157].mxu0 }
 0x316   :  { %v10993_v58 = vadd.f32 %v7985_v53, %v7984_v42  ;;  %v7987_v59 = vpop.f32.mrb[158].mxu0 }
 0x317   :  { %v7988_v37 = vpop.f32.mrb[159].mxu0 }
 0x318   :  { %v10995_v39 = vadd.f32 %v7988_v37, %v7987_v59 }
 0x31a   :  { %v2376_v30 = vpack.c.bf16 %v10995_v39, %v10993_v58 }
 0x31c   :  { %1861 = vmatmul.mubr.bf16.gmra.mrb[28].mxu1 %v1652_v8  ;;  %v7990_v62 = vpop.f32.mrb[160].mxu0 }
 0x31d   :  { %1870 = vmatprep.mubr.bf16.mxu1 %v10142_v57  ;;  %v7991_v0 = vpop.f32.mrb[161].mxu0 }
 0x31e   :  { %v11003_v4 = vadd.f32 %v7991_v0, %v7990_v62  ;;  %v7993_v10 = vpop.f32.mrb[162].mxu0 }
 0x31f   :  { %v7994_v55 = vpop.f32.mrb[163].mxu0 }
 0x320   :  { %v11005_v44 = vadd.f32 %v7994_v55, %v7993_v10 }
 0x322   :  { %v2377_v13 = vpack.c.bf16 %v11005_v44, %v11003_v4 }
 0x324   :  { %1871 = vmatmul.mubr.bf16.gmra.mrb[32].mxu1 %v1653_v36  ;;  %v7996_v5 = vpop.f32.mrb[164].mxu0 }
 0x325   :  { %1880 = vmatprep.mubr.bf16.mxu1 %v10142_v57  ;;  %v7997_v7 = vpop.f32.mrb[165].mxu0 }
 0x326   :  { %v11016_v8 = vadd.f32 %v7997_v7, %v7996_v5  ;;  %v7999_v42 = vpop.f32.mrb[166].mxu0 }
 0x327   :  { %v8000_v53 = vpop.f32.mrb[167].mxu0 }
 0x328   :  { %v11018_v59 = vadd.f32 %v8000_v53, %v7999_v42 }
 0x32a   :  { %v2378_v37 = vpack.c.bf16 %v11018_v59, %v11016_v8 }
 0x32c   :  { %1881 = vmatmul.mubr.bf16.gmra.mrb[36].mxu1 %v1654_v26  ;;  %v8002_v32 = vpop.f32.mrb[168].mxu0 }
 0x32d   :  { %1890 = vmatprep.mubr.bf16.mxu1 %v10142_v57  ;;  %v8003_v35 = vpop.f32.mrb[169].mxu0 }
 0x32e   :  { %v11026_v36 = vadd.f32 %v8003_v35, %v8002_v32  ;;  %v8005_v62 = vpop.f32.mrb[170].mxu0 }
 0x32f   :  { %v8006_v0 = vpop.f32.mrb[171].mxu0 }
 0x330   :  { %v11028_v10 = vadd.f32 %v8006_v0, %v8005_v62 }
 0x332   :  { %v2379_v55 = vpack.c.bf16 %v11028_v10, %v11026_v36 }
 0x334   :  { %1891 = vmatmul.mubr.bf16.gmra.mrb[40].mxu1 %v1655_v15  ;;  %v8008_v5 = vpop.f32.mrb[172].mxu0 }
 0x335   :  { %1900 = vmatprep.mubr.bf16.mxu1 %v10142_v57  ;;  %v8009_v41 = vpop.f32.mrb[173].mxu0 }
 0x336   :  { %v11036_v43 = vadd.f32 %v8009_v41, %v8008_v5  ;;  %v8011_v26 = vpop.f32.mrb[174].mxu0 }
 0x337   :  { %v8012_v18 = vpop.f32.mrb[175].mxu0 }
 0x338   :  { %v11038_v7 = vadd.f32 %v8012_v18, %v8011_v26 }
 0x33a   :  { %v2380_v42 = vpack.c.bf16 %v11038_v7, %v11036_v43 }
 0x33c   :  { %1901 = vmatmul.mubr.bf16.gmra.mrb[44].mxu1 %v1656_v27  ;;  %v8014_v53 = vpop.f32.mrb[176].mxu0 }
 0x33d   :  { %1910 = vmatprep.mubr.bf16.mxu1 %v10142_v57  ;;  %v8015_v51 = vpop.f32.mrb[177].mxu0 }
 0x33e   :  { %v11046_v60 = vadd.f32 %v8015_v51, %v8014_v53  ;;  %v8017_v15 = vpop.f32.mrb[178].mxu0 }
 0x33f   :  { %v8018_v32 = vpop.f32.mrb[179].mxu0 }
 0x340   :  { %v11048_v35 = vadd.f32 %v8018_v32, %v8017_v15 }
 0x342   :  { %v2381_v62 = vpack.c.bf16 %v11048_v35, %v11046_v60 }
 0x344   :  { %1911 = vmatmul.mubr.bf16.gmra.mrb[48].mxu1 %v1657_v38  ;;  %v8020_v0 = vpop.f32.mrb[180].mxu0 }
 0x345   :  { %1920 = vmatprep.mubr.bf16.mxu1 %v10142_v57  ;;  %v8021_v19 = vpop.f32.mrb[181].mxu0 }
 0x346   :  { %v11056_v22 = vadd.f32 %v8021_v19, %v8020_v0  ;;  %v8023_v27 = vpop.f32.mrb[182].mxu0 }
 0x347   :  { %v8024_v5 = vpop.f32.mrb[183].mxu0 }
 0x348   :  { %v11058_v41 = vadd.f32 %v8024_v5, %v8023_v27 }
 0x34a   :  { %v2382_v26 = vpack.c.bf16 %v11058_v41, %v11056_v22 }
 0x34c   :  { %1921 = vmatmul.mubr.bf16.gmra.mrb[52].mxu1 %v1658_v56  ;;  %v8026_v18 = vpop.f32.mrb[184].mxu0 }
 0x34d   :  { %1930 = vmatprep.mubr.bf16.mxu1 %v10142_v57  ;;  %v8027_v34 = vpop.f32.mrb[185].mxu0 }
 0x34e   :  { %v11066_v17 = vadd.f32 %v8027_v34, %v8026_v18  ;;  %v8029_v38 = vpop.f32.mrb[186].mxu0 }
 0x34f   :  { %v8030_v53 = vpop.f32.mrb[187].mxu0 }
 0x350   :  { %v11068_v51 = vadd.f32 %v8030_v53, %v8029_v38  ;;  %v9537_v38 = vld [vmem:[%s12158_s19 + $0x200] ss:$8 sps:$4 sm:$0xff]   ;;  %v9542_v53 = vld [vmem:[%s12158_s19 + $0x214] ss:$8 sps:$4 sm:$0xff]  }
 0x352   :  { %v2383_v15 = vpack.c.bf16 %v11068_v51, %v11066_v17  ;;  %v3465_v17 = vlaneseq }
 0x354   :  { %1931 = vmatmul.mubr.bf16.gmra.mrb[56].mxu1 %v1659_v11  ;;  %v8032_v32 = vpop.f32.mrb[188].mxu0  ;;  %v11313_v51 = vshrl.u32 %v3465_v17, 7 }
 0x355   :  { %1940 = vmatprep.mubr.bf16.mxu1 %v10142_v57  ;;  %v8033_v47 = vpop.f32.mrb[189].mxu0 }
 0x356   :  { %v11076_v54 = vadd.f32 %v8033_v47, %v8032_v32  ;;  %v8035_v56 = vpop.f32.mrb[190].mxu0  ;;  %v9545_v47 = vld [vmem:[%s12158_s19 + $0x224] ss:$8 sps:$4 sm:$0xff]  }
 0x357   :  { %v8036_v0 = vpop.f32.mrb[191].mxu0 }
 0x358   :  { %v11078_v19 = vadd.f32 %v8036_v0, %v8035_v56 }
 0x35a   :  { %v2384_v27 = vpack.c.bf16 %v11078_v19, %v11076_v54  ;;  %v3463_v54 = vld [vmem:[#allocation2] sm:$0x3]  ;;  %v12150_v19 = vsub.s32 1, %v11313_v51 }
 0x35c   :  { %1941 = vmatmul.mubr.bf16.gmra.mrb[60].mxu1 %v1660_v48  ;;  %v8054_v5 = vpop.f32.mrb[192].mxu0  ;;  %v9540_v48 = vld [vmem:[%s12158_s19 + $0x210] ss:$8 sps:$4 sm:$0xff]  }
 0x35d   :  { %2514 = vmatprep.mubr.bf16.mxu1 %v10142_v57  ;;  %v8055_v16 = vpop.f32.mrb[193].mxu0 }
 0x35e   :  { %v11086_v21 = vadd.f32 %v8055_v16, %v8054_v5  ;;  %v8057_v11 = vpop.f32.mrb[194].mxu0 }
 0x35f   :  { %v8058_v18 = vpop.f32.mrb[195].mxu0 }
 0x360   :  { %v11088_v34 = vadd.f32 %v8058_v18, %v8057_v11  ;;  %v9546_v18 = vld [vmem:[%s12158_s19 + $0x230] ss:$8 sps:$4 sm:$0xff]  }
 0x362   :  { %v3093_v20 = vpack.c.bf16 %v11088_v34, %v11086_v21  ;;  %v11323_v21 = vrot.slane %v3463_v54, %v12150_v19 }
 0x364   :  { %2515 = vmatmul.mubr.bf16.vlgmr.msra.gmra.mrb[0].mxu1 %v2369_v25  ;;  %v8060_v45 = vpop.f32.mrb[196].mxu0  ;;  %v9548_v25 = vld [vmem:[%s12158_s19 + $0x234] ss:$8 sps:$4 sm:$0xff]  }
 0x365   :  { %2524 = vmatprep.mubr.bf16.mxu1 %v10142_v57  ;;  %3207 = vmatpush1.bf16.msra.mxu1 %v9537_v38  ;;  %v8061_v32 = vpop.f32.mrb[197].mxu0 }
 0x366   :  { %3208 = vmatprep.subr.bf16.mxu1 %v9542_v53  ;;  %v11108_v56 = vadd.f32 %v8061_v32, %v8060_v45  ;;  %v8063_v0 = vpop.f32.mrb[198].mxu0  ;;  %v9551_v53 = vld [vmem:[%s12158_s19 + $0x244] ss:$8 sps:$4 sm:$0xff]  }
 0x367   :  { %v8064_v5 = vpop.f32.mrb[199].mxu0 }
 0x368   :  { %v11110_v12 = vadd.f32 %v8064_v5, %v8063_v0  ;;  %v9552_v5 = vld [vmem:[%s12158_s19 + $0x250] ss:$8 sps:$4 sm:$0xff]  }
 0x369   :  { %3209 = vmatpush1.bf16.msra.mxu1 %v9540_v48 }
 0x36a   :  { %3210 = vmatprep.subr.bf16.mxu1 %v9545_v47  ;;  %v3094_v16 = vpack.c.bf16 %v11110_v12, %v11108_v56 }
 0x36c   :  { %2525 = vmatmul.mubr.bf16.gmra.mrb[4].mxu1 %v2370_v29  ;;  %v8066_v11 = vpop.f32.mrb[200].mxu0  ;;  %v9554_v29 = vld [vmem:[%s12158_s19 + $0x254] ss:$8 sps:$4 sm:$0xff]  }
 0x36d   :  { %2534 = vmatprep.mubr.bf16.mxu1 %v10142_v57  ;;  %3211 = vmatpush1.bf16.msra.mxu1 %v9543_v31  ;;  %v8067_v38 = vpop.f32.mrb[201].mxu0 }
 0x36e   :  { %3212 = vmatprep.subr.bf16.mxu1 %v9548_v25  ;;  %v11130_v45 = vadd.f32 %v8067_v38, %v8066_v11  ;;  %v8069_v48 = vpop.f32.mrb[202].mxu0  ;;  %v9557_v25 = vld [vmem:[%s12158_s19 + $0x264] ss:$8 sps:$4 sm:$0xff]  }
 0x36f   :  { %v8070_v32 = vpop.f32.mrb[203].mxu0 }
 0x370   :  { %v11132_v3 = vadd.f32 %v8070_v32, %v8069_v48  ;;  %v9558_v32 = vld [vmem:[%s12158_s19 + $0x270] ss:$8 sps:$4 sm:$0xff]  }
 0x371   :  { %3213 = vmatpush1.bf16.msra.mxu1 %v9546_v18 }
 0x372   :  { %3214 = vmatprep.subr.bf16.mxu1 %v9551_v53  ;;  %v3095_v47 = vpack.c.bf16 %v11132_v3, %v11130_v45 }
 0x374   :  { %2535 = vmatmul.mubr.bf16.gmra.mrb[8].mxu1 %v2371_v49  ;;  %v8072_v0 = vpop.f32.mrb[204].mxu0  ;;  %v9560_v49 = vld [vmem:[%s12158_s19 + $0x274] ss:$8 sps:$4 sm:$0xff]  }
 0x375   :  { %2544 = vmatprep.mubr.bf16.mxu1 %v10142_v57  ;;  %3215 = vmatpush1.bf16.msra.mxu1 %v9549_v52  ;;  %v8073_v31 = vpop.f32.mrb[205].mxu0 }
 0x376   :  { %3216 = vmatprep.subr.bf16.mxu1 %v9554_v29  ;;  %v11152_v11 = vadd.f32 %v8073_v31, %v8072_v0  ;;  %v8075_v18 = vpop.f32.mrb[206].mxu0 }
 0x377   :  { %v8076_v38 = vpop.f32.mrb[207].mxu0 }
 0x378   :  { %v11154_v61 = vadd.f32 %v8076_v38, %v8075_v18 }
 0x379   :  { %3217 = vmatpush1.bf16.msra.mxu1 %v9552_v5 }
 0x37a   :  { %3218 = vmatprep.subr.bf16.mxu1 %v9557_v25  ;;  %v3096_v53 = vpack.c.bf16 %v11154_v61, %v11152_v11 }
 0x37c   :  { %2545 = vmatmul.mubr.bf16.gmra.mrb[12].mxu1 %v2372_v63  ;;  %v8078_v48 = vpop.f32.mrb[208].mxu0 }
 0x37d   :  { %2554 = vmatprep.mubr.bf16.mxu1 %v10142_v57  ;;  %3219 = vmatpush1.bf16.msra.mxu1 %v9555_v1  ;;  %v8079_v52 = vpop.f32.mrb[209].mxu0 }
 0x37e   :  { %3220 = vmatprep.subr.bf16.mxu1 %v9560_v49  ;;  %v11171_v29 = vadd.f32 %v8079_v52, %v8078_v48  ;;  %v8081_v0 = vpop.f32.mrb[210].mxu0 }
 0x37f   :  { %v8082_v5 = vpop.f32.mrb[211].mxu0 }
 0x380   :  { %v11173_v31 = vadd.f32 %v8082_v5, %v8081_v0 }
 0x381   :  { %3221 = vmatpush1.bf16.msra.mxu1 %v9558_v32 }
 0x382   :  { %v3097_v23 = vpack.c.bf16 %v11173_v31, %v11171_v29  ;;  %v9563_v29 = vld [vmem:[%s12132_s4 + $0x4] ss:$8 sps:$4 sm:$0xff]  }
 0x383   :  { %3779 = vmatprep.mubr.bf16.mxu0 %v9563_v29 }
 0x384   :  { %2555 = vmatmul.mubr.bf16.gmra.mrb[16].mxu1 %v2373_v14  ;;  %v8084_v28 = vpop.f32.mrb[212].mxu0 }
 0x385   :  { %2564 = vmatprep.mubr.bf16.mxu1 %v10142_v57  ;;  %v8085_v63 = vpop.f32.mrb[213].mxu0 }
 0x386   :  { %v11181_v25 = vadd.f32 %v8085_v63, %v8084_v28  ;;  %v8087_v18 = vpop.f32.mrb[214].mxu0 }
 0x387   :  { %v8088_v38 = vpop.f32.mrb[215].mxu0 }
 0x388   :  { %v11183_v1 = vadd.f32 %v8088_v38, %v8087_v18 }
 0x38a   :  { %v3098_v49 = vpack.c.bf16 %v11183_v1, %v11181_v25 }
 0x38c   :  { %2565 = vmatmul.mubr.bf16.gmra.mrb[20].mxu1 %v2374_v2  ;;  %v8090_v48 = vpop.f32.mrb[216].mxu0 }
 0x38d   :  { %2574 = vmatprep.mubr.bf16.mxu1 %v10142_v57  ;;  %v8091_v9 = vpop.f32.mrb[217].mxu0 }
 0x38e   :  { %v11191_v50 = vadd.f32 %v8091_v9, %v8090_v48  ;;  %v8093_v14 = vpop.f32.mrb[218].mxu0 }
 0x38f   :  { %v8094_v32 = vpop.f32.mrb[219].mxu0 }
 0x390   :  { %v11193_v52 = vadd.f32 %v8094_v32, %v8093_v14 }
 0x392   :  { %v3099_v0 = vpack.c.bf16 %v11193_v52, %v11191_v50 }
 0x394   :  { %2575 = vmatmul.mubr.bf16.gmra.mrb[24].mxu1 %v2375_v40  ;;  %v8096_v5 = vpop.f32.mrb[220].mxu0 }
 0x395   :  { %2584 = vmatprep.mubr.bf16.mxu1 %v10142_v57  ;;  %v8097_v24 = vpop.f32.mrb[221].mxu0 }
 0x396   :  { %v11201_v6 = vadd.f32 %v8097_v24, %v8096_v5  ;;  %v8099_v2 = vpop.f32.mrb[222].mxu0 }
 0x397   :  { %v8100_v28 = vpop.f32.mrb[223].mxu0 }
 0x398   :  { %v11203_v63 = vadd.f32 %v8100_v28, %v8099_v2 }
 0x39a   :  { %v3100_v18 = vpack.c.bf16 %v11203_v63, %v11201_v6 }
 0x39c   :  { %2585 = vmatmul.mubr.bf16.gmra.mrb[28].mxu1 %v2376_v30  ;;  %v8102_v38 = vpop.f32.mrb[224].mxu0 }
 0x39d   :  { %2594 = vmatprep.mubr.bf16.mxu1 %v10142_v57  ;;  %v8103_v46 = vpop.f32.mrb[225].mxu0 }
 0x39e   :  { %v11211_v33 = vadd.f32 %v8103_v46, %v8102_v38  ;;  %v8105_v40 = vpop.f32.mrb[226].mxu0 }
 0x39f   :  { %v8106_v48 = vpop.f32.mrb[227].mxu0 }
 0x3a0   :  { %v11213_v9 = vadd.f32 %v8106_v48, %v8105_v40 }
 0x3a2   :  { %v3101_v14 = vpack.c.bf16 %v11213_v9, %v11211_v33 }
 0x3a4   :  { %2595 = vmatmul.mubr.bf16.gmra.mrb[32].mxu1 %v2377_v13  ;;  %v8108_v32 = vpop.f32.mrb[228].mxu0 }
 0x3a5   :  { %2604 = vmatprep.mubr.bf16.mxu1 %v10142_v57  ;;  %v8109_v58 = vpop.f32.mrb[229].mxu0 }
 0x3a6   :  { %v11221_v39 = vadd.f32 %v8109_v58, %v8108_v32  ;;  %v8111_v30 = vpop.f32.mrb[230].mxu0 }
 0x3a7   :  { %v8112_v5 = vpop.f32.mrb[231].mxu0 }
 0x3a8   :  { %v11223_v24 = vadd.f32 %v8112_v5, %v8111_v30 }
 0x3aa   :  { %v3102_v2 = vpack.c.bf16 %v11223_v24, %v11221_v39 }
 0x3ac   :  { %2605 = vmatmul.mubr.bf16.gmra.mrb[36].mxu1 %v2378_v37  ;;  %v8114_v28 = vpop.f32.mrb[232].mxu0 }
 0x3ad   :  { %2614 = vmatprep.mubr.bf16.mxu1 %v10142_v57  ;;  %v8115_v4 = vpop.f32.mrb[233].mxu0 }
 0x3ae   :  { %v11231_v44 = vadd.f32 %v8115_v4, %v8114_v28  ;;  %v8117_v13 = vpop.f32.mrb[234].mxu0 }
 0x3af   :  { %v8118_v38 = vpop.f32.mrb[235].mxu0 }
 0x3b0   :  { %v11233_v46 = vadd.f32 %v8118_v38, %v8117_v13 }
 0x3b2   :  { %v3103_v40 = vpack.c.bf16 %v11233_v46, %v11231_v44 }
 0x3b4   :  { %2615 = vmatmul.mubr.bf16.gmra.mrb[40].mxu1 %v2379_v55  ;;  %v8120_v48 = vpop.f32.mrb[236].mxu0 }
 0x3b5   :  { %2624 = vmatprep.mubr.bf16.mxu1 %v10142_v57  ;;  %v8121_v8 = vpop.f32.mrb[237].mxu0 }
 0x3b6   :  { %v11241_v59 = vadd.f32 %v8121_v8, %v8120_v48  ;;  %v8123_v37 = vpop.f32.mrb[238].mxu0 }
 0x3b7   :  { %v8124_v32 = vpop.f32.mrb[239].mxu0 }
 0x3b8   :  { %v8125_v58 = vadd.f32 %v8124_v32, %v8123_v37 }
 0x3ba   :  { %v3104_v30 = vpack.c.bf16 %v8125_v58, %v11241_v59 }
 0x3bc   :  { %2625 = vmatmul.mubr.bf16.gmra.mrb[44].mxu1 %v2380_v42  ;;  %v8126_v5 = vpop.f32.mrb[240].mxu0 }
 0x3bd   :  { %2634 = vmatprep.mubr.bf16.mxu1 %v10142_v57  ;;  %v8127_v36 = vpop.f32.mrb[241].mxu0 }
 0x3be   :  { %v8128_v10 = vadd.f32 %v8127_v36, %v8126_v5  ;;  %v8129_v55 = vpop.f32.mrb[242].mxu0 }
 0x3bf   :  { %v8130_v28 = vpop.f32.mrb[243].mxu0 }
 0x3c0   :  { %v8131_v4 = vadd.f32 %v8130_v28, %v8129_v55 }
 0x3c2   :  { %v3105_v13 = vpack.c.bf16 %v8131_v4, %v8128_v10 }
 0x3c4   :  { %2635 = vmatmul.mubr.bf16.gmra.mrb[48].mxu1 %v2381_v62  ;;  %v8132_v38 = vpop.f32.mrb[244].mxu0 }
 0x3c5   :  { %2644 = vmatprep.mubr.bf16.mxu1 %v10142_v57  ;;  %v8133_v48 = vpop.f32.mrb[245].mxu0 }
 0x3c6   :  { %v8134_v8 = vadd.f32 %v8133_v48, %v8132_v38  ;;  %v8135_v43 = vpop.f32.mrb[246].mxu0 }
 0x3c7   :  { %v8136_v7 = vpop.f32.mrb[247].mxu0 }
 0x3c8   :  { %v8137_v42 = vadd.f32 %v8136_v7, %v8135_v43 }
 0x3ca   :  { %v3106_v59 = vpack.c.bf16 %v8137_v42, %v8134_v8 }
 0x3cc   :  { %2645 = vmatmul.mubr.bf16.gmra.mrb[52].mxu1 %v2382_v26  ;;  %v8138_v37 = vpop.f32.mrb[248].mxu0 }
 0x3cd   :  { %2654 = vmatprep.mubr.bf16.mxu1 %v10142_v57  ;;  %v8139_v32 = vpop.f32.mrb[249].mxu0 }
 0x3ce   :  { %v8140_v58 = vadd.f32 %v8139_v32, %v8138_v37  ;;  %v8141_v60 = vpop.f32.mrb[250].mxu0 }
 0x3cf   :  { %v8142_v35 = vpop.f32.mrb[251].mxu0 }
 0x3d0   :  { %v8143_v62 = vadd.f32 %v8142_v35, %v8141_v60 }
 0x3d2   :  { %v3107_v5 = vpack.c.bf16 %v8143_v62, %v8140_v58 }
 0x3d4   :  { %2655 = vmatmul.mubr.bf16.gmra.mrb[56].mxu1 %v2383_v15  ;;  %v8144_v36 = vpop.f32.mrb[252].mxu0  ;;  %v12151_v15 = vsub.s32 0, %v11313_v51 }
 0x3d5   :  { %2664 = vmatprep.mubr.bf16.mxu1 %v10142_v57  ;;  %v8145_v10 = vpop.f32.mrb[253].mxu0 }
 0x3d6   :  { %v8146_v55 = vadd.f32 %v8145_v10, %v8144_v36  ;;  %v8147_v22 = vpop.f32.mrb[254].mxu0 }
 0x3d7   :  { %v8148_v41 = vpop.f32.mrb[255].mxu0 }
 0x3d8   :  { %v8149_v26 = vadd.f32 %v8148_v41, %v8147_v22 }
 0x3da   :  { %v3108_v28 = vpack.c.bf16 %v8149_v26, %v8146_v55 }
 0x3dc   :  { %2665 = vmatmul.mubr.bf16.gmra.mrb[60].mxu1 %v2384_v27  ;;  %v11319_v27 = vrot.slane %v3463_v54, %v12151_v15 }
 0x3dd   :  { %3238 = vmatprep.mubr.bf16.mxu1 %v10142_v57 }
 0x3e4   :  { %3239 = vmatmul.mubr.bf16.vlgmr.msra.gmra.mrb[0].mxu1 %v3093_v20 }
 0x3e5   :  { %3248 = vmatprep.mubr.bf16.mxu1 %v10142_v57 }
 0x3ec   :  { %3249 = vmatmul.mubr.bf16.gmra.mrb[4].mxu1 %v3094_v16 }
 0x3ed   :  { %3258 = vmatprep.mubr.bf16.mxu1 %v10142_v57 }
 0x3f4   :  { %3259 = vmatmul.mubr.bf16.gmra.mrb[8].mxu1 %v3095_v47 }
 0x3f5   :  { %3268 = vmatprep.mubr.bf16.mxu1 %v10142_v57 }
 0x3fc   :  { %3269 = vmatmul.mubr.bf16.gmra.mrb[12].mxu1 %v3096_v53 }
 0x3fd   :  { %3278 = vmatprep.mubr.bf16.mxu1 %v10142_v57 }
 0x404   :  { %3279 = vmatmul.mubr.bf16.gmra.mrb[16].mxu1 %v3097_v23 }
 0x405   :  { %3288 = vmatprep.mubr.bf16.mxu1 %v10142_v57 }
 0x40c   :  { %3289 = vmatmul.mubr.bf16.gmra.mrb[20].mxu1 %v3098_v49 }
 0x40d   :  { %3298 = vmatprep.mubr.bf16.mxu1 %v10142_v57 }
 0x414   :  { %3299 = vmatmul.mubr.bf16.gmra.mrb[24].mxu1 %v3099_v0 }
 0x415   :  { %3308 = vmatprep.mubr.bf16.mxu1 %v10142_v57 }
 0x41c   :  { %3309 = vmatmul.mubr.bf16.gmra.mrb[28].mxu1 %v3100_v18 }
 0x41d   :  { %3318 = vmatprep.mubr.bf16.mxu1 %v10142_v57 }
 0x424   :  { %3319 = vmatmul.mubr.bf16.gmra.mrb[32].mxu1 %v3101_v14 }
 0x425   :  { %3328 = vmatprep.mubr.bf16.mxu1 %v10142_v57 }
 0x42c   :  { %3329 = vmatmul.mubr.bf16.gmra.mrb[36].mxu1 %v3102_v2 }
 0x42d   :  { %3338 = vmatprep.mubr.bf16.mxu1 %v10142_v57 }
 0x434   :  { %3339 = vmatmul.mubr.bf16.gmra.mrb[40].mxu1 %v3103_v40 }
 0x435   :  { %3348 = vmatprep.mubr.bf16.mxu1 %v10142_v57 }
 0x43c   :  { %3349 = vmatmul.mubr.bf16.gmra.mrb[44].mxu1 %v3104_v30 }
 0x43d   :  { %3358 = vmatprep.mubr.bf16.mxu1 %v10142_v57 }
 0x444   :  { %3359 = vmatmul.mubr.bf16.gmra.mrb[48].mxu1 %v3105_v13 }
 0x445   :  { %3368 = vmatprep.mubr.bf16.mxu1 %v10142_v57 }
 0x44c   :  { %3369 = vmatmul.mubr.bf16.gmra.mrb[52].mxu1 %v3106_v59 }
 0x44d   :  { %3378 = vmatprep.mubr.bf16.mxu1 %v10142_v57 }
 0x454   :  { %3379 = vmatmul.mubr.bf16.gmra.mrb[56].mxu1 %v3107_v5 }
 0x455   :  { %3388 = vmatprep.mubr.bf16.mxu1 %v10142_v57 }
 0x45c   :  { %3389 = vmatmul.mubr.bf16.gmra.mrb[60].mxu1 %v3108_v28 }
 0x45d   :  { %4375 = vmatprep.mubr.bf16.mxu1 %v10142_v57 }
 0x4b7   :  { %v3240_v34 = vpop.f32.mrb[0].mxu1 }
 0x4b8   :  { %v3475_v20 = vadd.f32 %v11319_v27, %v3240_v34  ;;  %v3242_v56 = vpop.f32.mrb[1].mxu1 }
 0x4b9   :  { %v3476_v12 = vadd.f32 %v11323_v21, %v3242_v56  ;;  %v3244_v16 = vpop.f32.mrb[2].mxu1 }
 0x4ba   :  { %v3539_v45 = vmax.f32 %v3475_v20, 0.0  ;;  %v3477_v3 = vadd.f32 %v11319_v27, %v3244_v16  ;;  %v3246_v47 = vpop.f32.mrb[3].mxu1 }
 0x4bb   :  { %v3540_v11 = vmax.f32 %v3476_v12, 0.0  ;;  %v3478_v61 = vadd.f32 %v11323_v21, %v3246_v47 }
 0x4bc   :  { %v3541_v53 = vmax.f32 %v3477_v3, 0.0 }
 0x4bd   :  { %v3603_v31 = vmax.f32 %v3539_v45, %v3540_v11  ;;  %v3542_v23 = vmax.f32 %v3478_v61, 0.0 }
 0x4bf   :  { %v3604_v25 = vmax.f32 %v3541_v53, %v3542_v23  ;;  %v3250_v1 = vpop.f32.mrb[4].mxu1 }
 0x4c0   :  { %v3479_v49 = vadd.f32 %v11319_v27, %v3250_v1  ;;  %v3252_v50 = vpop.f32.mrb[5].mxu1 }
 0x4c1   :  { %v11333_v52 = vpack.c.bf16 %v3604_v25, %v3603_v31  ;;  %v3480_v0 = vadd.f32 %v11323_v21, %v3252_v50  ;;  %v3254_v6 = vpop.f32.mrb[6].mxu1 }
 0x4c2   :  { %v3543_v63 = vmax.f32 %v3479_v49, 0.0  ;;  %v3481_v18 = vadd.f32 %v11319_v27, %v3254_v6  ;;  %v3256_v33 = vpop.f32.mrb[7].mxu1 }
 0x4c3   :  { %v3544_v9 = vmax.f32 %v3480_v0, 0.0  ;;  %v3482_v14 = vadd.f32 %v11323_v21, %v3256_v33 }
 0x4c4   :  { %v3545_v39 = vmax.f32 %v3481_v18, 0.0 }
 0x4c5   :  { %v3605_v24 = vmax.f32 %v3543_v63, %v3544_v9  ;;  %v3546_v2 = vmax.f32 %v3482_v14, 0.0 }
 0x4c7   :  { %v3606_v44 = vmax.f32 %v3545_v39, %v3546_v2  ;;  %v3260_v46 = vpop.f32.mrb[8].mxu1 }
 0x4c8   :  { %v3483_v40 = vadd.f32 %v11319_v27, %v3260_v46  ;;  %v3262_v30 = vpop.f32.mrb[9].mxu1 }
 0x4c9   :  { %v11339_v4 = vpack.c.bf16 %v3606_v44, %v3605_v24  ;;  %v3484_v13 = vadd.f32 %v11323_v21, %v3262_v30  ;;  %v3264_v38 = vpop.f32.mrb[10].mxu1 }
 0x4ca   :  { %v3547_v48 = vmax.f32 %v3483_v40, 0.0  ;;  %v3485_v8 = vadd.f32 %v11319_v27, %v3264_v38  ;;  %v3266_v43 = vpop.f32.mrb[11].mxu1 }
 0x4cb   :  { %v3548_v7 = vmax.f32 %v3484_v13, 0.0  ;;  %v3486_v42 = vadd.f32 %v11323_v21, %v3266_v43 }
 0x4cc   :  { %v3549_v59 = vmax.f32 %v3485_v8, 0.0 }
 0x4cd   :  { %v3607_v37 = vmax.f32 %v3547_v48, %v3548_v7  ;;  %v3550_v32 = vmax.f32 %v3486_v42, 0.0 }
 0x4cf   :  { %v3608_v58 = vmax.f32 %v3549_v59, %v3550_v32  ;;  %v3270_v60 = vpop.f32.mrb[12].mxu1 }
 0x4d0   :  { %v3487_v35 = vadd.f32 %v11319_v27, %v3270_v60  ;;  %v3272_v62 = vpop.f32.mrb[13].mxu1 }
 0x4d1   :  { %v11345_v5 = vpack.c.bf16 %v3608_v58, %v3607_v37  ;;  %v3488_v36 = vadd.f32 %v11323_v21, %v3272_v62  ;;  %v3274_v10 = vpop.f32.mrb[14].mxu1 }
 0x4d2   :  { %v3551_v55 = vmax.f32 %v3487_v35, 0.0  ;;  %v3489_v22 = vadd.f32 %v11319_v27, %v3274_v10  ;;  %v3276_v41 = vpop.f32.mrb[15].mxu1 }
 0x4d3   :  { %v3552_v26 = vmax.f32 %v3488_v36, 0.0  ;;  %v3490_v28 = vadd.f32 %v11323_v21, %v3276_v41 }
 0x4d4   :  { %v3553_v17 = vmax.f32 %v3489_v22, 0.0 }
 0x4d5   :  { %v3609_v54 = vmax.f32 %v3551_v55, %v3552_v26  ;;  %v3554_v34 = vmax.f32 %v3490_v28, 0.0 }
 0x4d7   :  { %v3610_v20 = vmax.f32 %v3553_v17, %v3554_v34  ;;  %v3280_v56 = vpop.f32.mrb[16].mxu1 }
 0x4d8   :  { %v3491_v12 = vadd.f32 %v11319_v27, %v3280_v56  ;;  %v3282_v16 = vpop.f32.mrb[17].mxu1 }
 0x4d9   :  { %v11351_v45 = vpack.c.bf16 %v3610_v20, %v3609_v54  ;;  %v3492_v3 = vadd.f32 %v11323_v21, %v3282_v16  ;;  %v3284_v47 = vpop.f32.mrb[18].mxu1 }
 0x4da   :  { %v3555_v11 = vmax.f32 %v3491_v12, 0.0  ;;  %v3493_v61 = vadd.f32 %v11319_v27, %v3284_v47  ;;  %v3286_v53 = vpop.f32.mrb[19].mxu1 }
 0x4db   :  { %v3556_v29 = vmax.f32 %v3492_v3, 0.0  ;;  %v3494_v31 = vadd.f32 %v11323_v21, %v3286_v53 }
 0x4dc   :  { %v3557_v23 = vmax.f32 %v3493_v61, 0.0 }
 0x4dd   :  { %v3611_v25 = vmax.f32 %v3555_v11, %v3556_v29  ;;  %v3558_v1 = vmax.f32 %v3494_v31, 0.0 }
 0x4df   :  { %v3612_v49 = vmax.f32 %v3557_v23, %v3558_v1  ;;  %v3290_v50 = vpop.f32.mrb[20].mxu1 }
 0x4e0   :  { %v3495_v0 = vadd.f32 %v11319_v27, %v3290_v50  ;;  %v3292_v6 = vpop.f32.mrb[21].mxu1 }
 0x4e1   :  { %v11357_v63 = vpack.c.bf16 %v3612_v49, %v3611_v25  ;;  %v3496_v18 = vadd.f32 %v11323_v21, %v3292_v6  ;;  %v3294_v33 = vpop.f32.mrb[22].mxu1 }
 0x4e2   :  { %v3559_v9 = vmax.f32 %v3495_v0, 0.0  ;;  %v3497_v14 = vadd.f32 %v11319_v27, %v3294_v33  ;;  %v3296_v39 = vpop.f32.mrb[23].mxu1 }
 0x4e3   :  { %v3560_v24 = vmax.f32 %v3496_v18, 0.0  ;;  %v3498_v2 = vadd.f32 %v11323_v21, %v3296_v39 }
 0x4e4   :  { %v3561_v44 = vmax.f32 %v3497_v14, 0.0 }
 0x4e5   :  { %v3613_v46 = vmax.f32 %v3559_v9, %v3560_v24  ;;  %v3562_v40 = vmax.f32 %v3498_v2, 0.0 }
 0x4e7   :  { %v3614_v30 = vmax.f32 %v3561_v44, %v3562_v40  ;;  %v3300_v13 = vpop.f32.mrb[24].mxu1 }
 0x4e8   :  { %v3499_v38 = vadd.f32 %v11319_v27, %v3300_v13  ;;  %v3302_v48 = vpop.f32.mrb[25].mxu1 }
 0x4e9   :  { %v11363_v8 = vpack.c.bf16 %v3614_v30, %v3613_v46  ;;  %v3500_v43 = vadd.f32 %v11323_v21, %v3302_v48  ;;  %v3304_v7 = vpop.f32.mrb[26].mxu1 }
 0x4ea   :  { %v3563_v42 = vmax.f32 %v3499_v38, 0.0  ;;  %v3501_v59 = vadd.f32 %v11319_v27, %v3304_v7  ;;  %v3306_v37 = vpop.f32.mrb[27].mxu1 }
 0x4eb   :  { %v3564_v32 = vmax.f32 %v3500_v43, 0.0  ;;  %v3502_v58 = vadd.f32 %v11323_v21, %v3306_v37 }
 0x4ec   :  { %v3565_v60 = vmax.f32 %v3501_v59, 0.0 }
 0x4ed   :  { %v3615_v35 = vmax.f32 %v3563_v42, %v3564_v32  ;;  %v3566_v62 = vmax.f32 %v3502_v58, 0.0 }
 0x4ef   :  { %v3616_v36 = vmax.f32 %v3565_v60, %v3566_v62  ;;  %v3310_v10 = vpop.f32.mrb[28].mxu1 }
 0x4f0   :  { %v3503_v55 = vadd.f32 %v11319_v27, %v3310_v10  ;;  %v3312_v22 = vpop.f32.mrb[29].mxu1 }
 0x4f1   :  { %v11369_v41 = vpack.c.bf16 %v3616_v36, %v3615_v35  ;;  %v3504_v26 = vadd.f32 %v11323_v21, %v3312_v22  ;;  %v3314_v28 = vpop.f32.mrb[30].mxu1 }
 0x4f2   :  { %v3567_v17 = vmax.f32 %v3503_v55, 0.0  ;;  %v3505_v54 = vadd.f32 %v11319_v27, %v3314_v28  ;;  %v3316_v34 = vpop.f32.mrb[31].mxu1 }
 0x4f3   :  { %v3568_v20 = vmax.f32 %v3504_v26, 0.0  ;;  %v3506_v56 = vadd.f32 %v11323_v21, %v3316_v34 }
 0x4f4   :  { %v3569_v12 = vmax.f32 %v3505_v54, 0.0 }
 0x4f5   :  { %v3617_v16 = vmax.f32 %v3567_v17, %v3568_v20  ;;  %v3570_v3 = vmax.f32 %v3506_v56, 0.0 }
 0x4f7   :  { %v3618_v47 = vmax.f32 %v3569_v12, %v3570_v3  ;;  %v3320_v11 = vpop.f32.mrb[32].mxu1 }
 0x4f8   :  { %v3507_v61 = vadd.f32 %v11319_v27, %v3320_v11  ;;  %v3322_v53 = vpop.f32.mrb[33].mxu1 }
 0x4f9   :  { %v11375_v29 = vpack.c.bf16 %v3618_v47, %v3617_v16  ;;  %v3508_v31 = vadd.f32 %v11323_v21, %v3322_v53  ;;  %v3324_v23 = vpop.f32.mrb[34].mxu1 }
 0x4fa   :  { %v3571_v25 = vmax.f32 %v3507_v61, 0.0  ;;  %v3509_v1 = vadd.f32 %v11319_v27, %v3324_v23  ;;  %v3326_v49 = vpop.f32.mrb[35].mxu1 }
 0x4fb   :  { %v3572_v50 = vmax.f32 %v3508_v31, 0.0  ;;  %v3510_v0 = vadd.f32 %v11323_v21, %v3326_v49 }
 0x4fc   :  { %v3573_v6 = vmax.f32 %v3509_v1, 0.0 }
 0x4fd   :  { %v3619_v18 = vmax.f32 %v3571_v25, %v3572_v50  ;;  %v3574_v33 = vmax.f32 %v3510_v0, 0.0 }
 0x4ff   :  { %v3620_v9 = vmax.f32 %v3573_v6, %v3574_v33  ;;  %v3330_v14 = vpop.f32.mrb[36].mxu1 }
 0x500   :  { %v3511_v39 = vadd.f32 %v11319_v27, %v3330_v14  ;;  %v3332_v24 = vpop.f32.mrb[37].mxu1 }
 0x501   :  { %v3512_v2 = vadd.f32 %v11323_v21, %v3332_v24  ;;  %v3334_v44 = vpop.f32.mrb[38].mxu1  ;;  %v11382_v46 = vpack.c.bf16 %v3620_v9, %v3619_v18 }
 0x502   :  { %v3575_v40 = vmax.f32 %v3511_v39, 0.0  ;;  %v3513_v30 = vadd.f32 %v11319_v27, %v3334_v44  ;;  %v3336_v13 = vpop.f32.mrb[39].mxu1 }
 0x503   :  { %v3576_v38 = vmax.f32 %v3512_v2, 0.0  ;;  %v3514_v48 = vadd.f32 %v11323_v21, %v3336_v13  ;;  %8150 = vmatprep.subr.bf16.mxu0 %v11382_v46 }
 0x504   :  { %v3577_v43 = vmax.f32 %v3513_v30, 0.0  ;;  %8151 = vmatpush3.bf16.msra.mxu0 %v11333_v52 }
 0x505   :  { %v3621_v7 = vmax.f32 %v3575_v40, %v3576_v38  ;;  %v3578_v42 = vmax.f32 %v3514_v48, 0.0 }
 0x507   :  { %v3622_v59 = vmax.f32 %v3577_v43, %v3578_v42  ;;  %v3340_v37 = vpop.f32.mrb[40].mxu1 }
 0x508   :  { %v3515_v32 = vadd.f32 %v11319_v27, %v3340_v37  ;;  %v3342_v58 = vpop.f32.mrb[41].mxu1 }
 0x509   :  { %v3516_v60 = vadd.f32 %v11323_v21, %v3342_v58  ;;  %v3344_v35 = vpop.f32.mrb[42].mxu1  ;;  %v11390_v62 = vpack.c.bf16 %v3622_v59, %v3621_v7 }
 0x50a   :  { %v3579_v36 = vmax.f32 %v3515_v32, 0.0  ;;  %v3517_v10 = vadd.f32 %v11319_v27, %v3344_v35  ;;  %v3346_v55 = vpop.f32.mrb[43].mxu1 }
 0x50b   :  { %v3580_v22 = vmax.f32 %v3516_v60, 0.0  ;;  %v3518_v26 = vadd.f32 %v11323_v21, %v3346_v55  ;;  %8152 = vmatprep.subr.bf16.mxu0 %v11390_v62 }
 0x50c   :  { %v3581_v28 = vmax.f32 %v3517_v10, 0.0  ;;  %8153 = vmatpush3.bf16.msra.mxu0 %v11339_v4 }
 0x50d   :  { %v3623_v17 = vmax.f32 %v3579_v36, %v3580_v22  ;;  %v3582_v54 = vmax.f32 %v3518_v26, 0.0 }
 0x50f   :  { %v3624_v34 = vmax.f32 %v3581_v28, %v3582_v54  ;;  %v3350_v20 = vpop.f32.mrb[44].mxu1 }
 0x510   :  { %v3519_v56 = vadd.f32 %v11319_v27, %v3350_v20  ;;  %v3352_v12 = vpop.f32.mrb[45].mxu1 }
 0x511   :  { %v3520_v16 = vadd.f32 %v11323_v21, %v3352_v12  ;;  %v3354_v3 = vpop.f32.mrb[46].mxu1  ;;  %v11398_v47 = vpack.c.bf16 %v3624_v34, %v3623_v17 }
 0x512   :  { %v3583_v11 = vmax.f32 %v3519_v56, 0.0  ;;  %v3521_v61 = vadd.f32 %v11319_v27, %v3354_v3  ;;  %v3356_v53 = vpop.f32.mrb[47].mxu1 }
 0x513   :  { %v3584_v31 = vmax.f32 %v3520_v16, 0.0  ;;  %v3522_v23 = vadd.f32 %v11323_v21, %v3356_v53  ;;  %8154 = vmatprep.subr.bf16.mxu0 %v11398_v47 }
 0x514   :  { %v3585_v25 = vmax.f32 %v3521_v61, 0.0  ;;  %8155 = vmatpush3.bf16.msra.mxu0 %v11345_v5 }
 0x515   :  { %v3625_v1 = vmax.f32 %v3583_v11, %v3584_v31  ;;  %v3586_v49 = vmax.f32 %v3522_v23, 0.0 }
 0x517   :  { %v3626_v50 = vmax.f32 %v3585_v25, %v3586_v49  ;;  %v3360_v0 = vpop.f32.mrb[48].mxu1 }
 0x518   :  { %v3523_v6 = vadd.f32 %v11319_v27, %v3360_v0  ;;  %v3362_v18 = vpop.f32.mrb[49].mxu1 }
 0x519   :  { %v3524_v33 = vadd.f32 %v11323_v21, %v3362_v18  ;;  %v3364_v9 = vpop.f32.mrb[50].mxu1  ;;  %v11406_v14 = vpack.c.bf16 %v3626_v50, %v3625_v1 }
 0x51a   :  { %v3587_v39 = vmax.f32 %v3523_v6, 0.0  ;;  %v3525_v24 = vadd.f32 %v11319_v27, %v3364_v9  ;;  %v3366_v2 = vpop.f32.mrb[51].mxu1 }
 0x51b   :  { %v3588_v44 = vmax.f32 %v3524_v33, 0.0  ;;  %v3526_v40 = vadd.f32 %v11323_v21, %v3366_v2  ;;  %8156 = vmatprep.subr.bf16.mxu0 %v11406_v14 }
 0x51c   :  { %v3589_v30 = vmax.f32 %v3525_v24, 0.0  ;;  %8157 = vmatpush3.bf16.msra.mxu0 %v11351_v45 }
 0x51d   :  { %v3627_v13 = vmax.f32 %v3587_v39, %v3588_v44  ;;  %v3590_v38 = vmax.f32 %v3526_v40, 0.0 }
 0x51f   :  { %v3628_v48 = vmax.f32 %v3589_v30, %v3590_v38  ;;  %v3370_v43 = vpop.f32.mrb[52].mxu1 }
 0x520   :  { %v3527_v7 = vadd.f32 %v11319_v27, %v3370_v43  ;;  %v3372_v42 = vpop.f32.mrb[53].mxu1  ;;  %v9561_v43 = vld [vmem:[%s12132_s4] ss:$8 sps:$4 sm:$0xff]  }
 0x521   :  { %v3528_v59 = vadd.f32 %v11323_v21, %v3372_v42  ;;  %v3374_v37 = vpop.f32.mrb[54].mxu1  ;;  %v11414_v32 = vpack.c.bf16 %v3628_v48, %v3627_v13  ;;  %v9585_v42 = vld [vmem:[#allocation6] ss:$8 sps:$4 sm:$0xff]  }
 0x522   :  { %v3591_v58 = vmax.f32 %v3527_v7, 0.0  ;;  %v3529_v60 = vadd.f32 %v11319_v27, %v3374_v37  ;;  %v3376_v35 = vpop.f32.mrb[55].mxu1  ;;  %v9569_v7 = vld [vmem:[%s12132_s4 + $0x24] ss:$8 sps:$4 sm:$0xff]   ;;  %v9588_v37 = vld [vmem:[#allocation6 + $0x10] ss:$8 sps:$4 sm:$0xff]  }
 0x523   :  { %v3592_v36 = vmax.f32 %v3528_v59, 0.0  ;;  %v3530_v10 = vadd.f32 %v11323_v21, %v3376_v35  ;;  %8158 = vmatprep.subr.bf16.mxu0 %v11414_v32  ;;  %v9590_v59 = vld [vmem:[#allocation6 + $0x14] ss:$8 sps:$4 sm:$0xff]   ;;  %v9594_v35 = vld [vmem:[#allocation6 + $0x30] ss:$8 sps:$4 sm:$0xff]  }
 0x524   :  { %v3593_v55 = vmax.f32 %v3529_v60, 0.0  ;;  %8159 = vmatpush3.bf16.msra.mxu0 %v11357_v63  ;;  %v9596_v60 = vld [vmem:[#allocation6 + $0x34] ss:$8 sps:$4 sm:$0xff]  }
 0x525   :  { %v3629_v22 = vmax.f32 %v3591_v58, %v3592_v36  ;;  %v3594_v26 = vmax.f32 %v3530_v10, 0.0  ;;  %v9591_v58 = vld [vmem:[#allocation6 + $0x20] ss:$8 sps:$4 sm:$0xff]   ;;  %v9599_v36 = vld [vmem:[#allocation6 + $0x44] ss:$8 sps:$4 sm:$0xff]  }
 0x526   :  { %v9597_v10 = vld [vmem:[#allocation6 + $0x40] ss:$8 sps:$4 sm:$0xff]  }
 0x527   :  { %v3630_v28 = vmax.f32 %v3593_v55, %v3594_v26  ;;  %v3380_v17 = vpop.f32.mrb[56].mxu1  ;;  %v9602_v55 = vld [vmem:[#allocation6 + $0x54] ss:$8 sps:$4 sm:$0xff]   ;;  %v9605_v26 = vld [vmem:[#allocation6 + $0x64] ss:$8 sps:$4 sm:$0xff]  }
 0x528   :  { %v3531_v54 = vadd.f32 %v11319_v27, %v3380_v17  ;;  %v3382_v34 = vpop.f32.mrb[57].mxu1  ;;  %v9608_v17 = vld [vmem:[#allocation6 + $0x74] ss:$8 sps:$4 sm:$0xff]  }
 0x529   :  { %v3532_v20 = vadd.f32 %v11323_v21, %v3382_v34  ;;  %v3384_v56 = vpop.f32.mrb[58].mxu1  ;;  %v3648_v12 = vpack.c.bf16 %v3630_v28, %v3629_v22  ;;  %v9600_v22 = vld [vmem:[#allocation6 + $0x50] ss:$8 sps:$4 sm:$0xff]   ;;  %v9603_v28 = vld [vmem:[#allocation6 + $0x60] ss:$8 sps:$4 sm:$0xff]  }
 0x52a   :  { %v3595_v16 = vmax.f32 %v3531_v54, 0.0  ;;  %v3533_v3 = vadd.f32 %v11319_v27, %v3384_v56  ;;  %v3386_v11 = vpop.f32.mrb[59].mxu1  ;;  %v9606_v54 = vld [vmem:[#allocation6 + $0x70] ss:$8 sps:$4 sm:$0xff]  }
 0x52b   :  { %v3596_v61 = vmax.f32 %v3532_v20, 0.0  ;;  %v3534_v53 = vadd.f32 %v11323_v21, %v3386_v11  ;;  %8160 = vmatprep.subr.bf16.mxu0 %v3648_v12 }
 0x52c   :  { %v3597_v31 = vmax.f32 %v3533_v3, 0.0  ;;  %8161 = vmatpush3.bf16.msra.mxu0 %v11363_v8  ;;  %v9609_v3 = vld [vmem:[#allocation10] sm:$0xff]  }
 0x52d   :  { %v3631_v23 = vmax.f32 %v3595_v16, %v3596_v61  ;;  %v3598_v25 = vmax.f32 %v3534_v53, 0.0 }
 0x52f   :  { %v3632_v1 = vmax.f32 %v3597_v31, %v3598_v25  ;;  %v3390_v49 = vpop.f32.mrb[60].mxu1 }
 0x530   :  { %v3535_v50 = vadd.f32 %v11319_v27, %v3390_v49  ;;  %v3392_v0 = vpop.f32.mrb[61].mxu1 }
 0x531   :  { %v3536_v6 = vadd.f32 %v11323_v21, %v3392_v0  ;;  %v3394_v18 = vpop.f32.mrb[62].mxu1  ;;  %v3649_v33 = vpack.c.bf16 %v3632_v1, %v3631_v23 }
 0x532   :  { %v3599_v9 = vmax.f32 %v3535_v50, 0.0  ;;  %v3537_v39 = vadd.f32 %v11319_v27, %v3394_v18  ;;  %v3396_v24 = vpop.f32.mrb[63].mxu1  ;;  %v9566_v27 = vld [vmem:[%s12132_s4 + $0x14] ss:$8 sps:$4 sm:$0xff]  }
 0x533   :  { %v3600_v2 = vmax.f32 %v3536_v6, 0.0  ;;  %v3538_v44 = vadd.f32 %v11323_v21, %v3396_v24  ;;  %8162 = vmatprep.subr.bf16.mxu0 %v3649_v33  ;;  %v9564_v21 = vld [vmem:[%s12132_s4 + $0x10] ss:$8 sps:$4 sm:$0xff]  }
 0x534   :  { %v3601_v40 = vmax.f32 %v3537_v39, 0.0  ;;  %8163 = vmatpush3.bf16.msra.mxu0 %v11369_v41 }
 0x535   :  { %v3633_v30 = vmax.f32 %v3599_v9, %v3600_v2  ;;  %v3602_v13 = vmax.f32 %v3538_v44, 0.0 }
 0x537   :  { %v3634_v38 = vmax.f32 %v3601_v40, %v3602_v13 }
 0x539   :  { %v3650_v48 = vpack.c.bf16 %v3634_v38, %v3633_v30 }
 0x53b   :  { %8164 = vmatprep.subr.bf16.mxu0 %v3650_v48 }
 0x53c   :  { %8165 = vmatpush3.bf16.msra.mxu0 %v11375_v29 }
 0x53d   :  { %8214 = vmatprep.subr.bf16.mxu0 %v11382_v46  ;;  %v9576_v46 = vld [vmem:[%s12132_s4 + $0x50] ss:$8 sps:$4 sm:$0xff]  }
 0x53f   :  { %3780 = vmatmul.mubr.bf16.vlgmr.msra.gmra.mrb[0].mxu0 %v9561_v43 }
 0x540   :  { %8215 = vmatpush3.bf16.msra.mxu0 %v11333_v52  ;;  %3787 = vmatprep.mubr.bf16.mxu0 %v9566_v27  ;;  %v9567_v52 = vld [vmem:[%s12132_s4 + $0x20] ss:$8 sps:$4 sm:$0xff]  }
 0x541   :  { %8216 = vmatprep.subr.bf16.mxu0 %v11390_v62  ;;  %v9584_v62 = vld [vmem:[%s12132_s4 + $0x74] ss:$8 sps:$4 sm:$0xff]  }
 0x544   :  { %8217 = vmatpush3.bf16.msra.mxu0 %v11339_v4  ;;  %v9572_v4 = vld [vmem:[%s12132_s4 + $0x34] ss:$8 sps:$4 sm:$0xff]  }
 0x545   :  { %8218 = vmatprep.subr.bf16.mxu0 %v11398_v47  ;;  %v9582_v47 = vld [vmem:[%s12132_s4 + $0x70] ss:$8 sps:$4 sm:$0xff]  }
 0x547   :  { %3788 = vmatmul.mubr.bf16.gmra.mrb[4].mxu0 %v9564_v21 }
 0x548   :  { %8219 = vmatpush3.bf16.msra.mxu0 %v11345_v5  ;;  %3795 = vmatprep.mubr.bf16.mxu0 %v9569_v7  ;;  %v9570_v5 = vld [vmem:[%s12132_s4 + $0x30] ss:$8 sps:$4 sm:$0xff]  }
 0x549   :  { %8220 = vmatprep.subr.bf16.mxu0 %v11406_v14  ;;  %v9587_v14 = vld [vmem:[#allocation6 + $0x4] ss:$8 sps:$4 sm:$0xff]  }
 0x54c   :  { %8221 = vmatpush3.bf16.msra.mxu0 %v11351_v45  ;;  %v9575_v45 = vld [vmem:[%s12132_s4 + $0x44] ss:$8 sps:$4 sm:$0xff]  }
 0x54d   :  { %8222 = vmatprep.subr.bf16.mxu0 %v11414_v32  ;;  %v9593_v32 = vld [vmem:[#allocation6 + $0x24] ss:$8 sps:$4 sm:$0xff]  }
 0x54f   :  { %3796 = vmatmul.mubr.bf16.gmra.mrb[8].mxu0 %v9567_v52 }
 0x550   :  { %8223 = vmatpush3.bf16.msra.mxu0 %v11357_v63  ;;  %3803 = vmatprep.mubr.bf16.mxu0 %v9572_v4  ;;  %v9573_v63 = vld [vmem:[%s12132_s4 + $0x40] ss:$8 sps:$4 sm:$0xff]  }
 0x551   :  { %8224 = vmatprep.subr.bf16.mxu0 %v3648_v12 }
 0x554   :  { %8225 = vmatpush3.bf16.msra.mxu0 %v11363_v8  ;;  %v9578_v8 = vld [vmem:[%s12132_s4 + $0x54] ss:$8 sps:$4 sm:$0xff]  }
 0x555   :  { %8226 = vmatprep.subr.bf16.mxu0 %v3649_v33 }
 0x557   :  { %3804 = vmatmul.mubr.bf16.gmra.mrb[12].mxu0 %v9570_v5 }
 0x558   :  { %8227 = vmatpush3.bf16.msra.mxu0 %v11369_v41  ;;  %3811 = vmatprep.mubr.bf16.mxu0 %v9575_v45  ;;  %v9581_v41 = vld [vmem:[%s12132_s4 + $0x64] ss:$8 sps:$4 sm:$0xff]  }
 0x559   :  { %8228 = vmatprep.subr.bf16.mxu0 %v3650_v48 }
 0x55c   :  { %8229 = vmatpush3.bf16.msra.mxu0 %v11375_v29  ;;  %v9579_v29 = vld [vmem:[%s12132_s4 + $0x60] ss:$8 sps:$4 sm:$0xff]  }
 0x55f   :  { %3812 = vmatmul.mubr.bf16.gmra.mrb[16].mxu0 %v9573_v63 }
 0x560   :  { %3819 = vmatprep.mubr.bf16.mxu0 %v9578_v8 }
 0x567   :  { %3820 = vmatmul.mubr.bf16.gmra.mrb[20].mxu0 %v9576_v46 }
 0x568   :  { %3827 = vmatprep.mubr.bf16.mxu0 %v9581_v41 }
 0x56f   :  { %3828 = vmatmul.mubr.bf16.gmra.mrb[24].mxu0 %v9579_v29 }
 0x570   :  { %3835 = vmatprep.mubr.bf16.mxu0 %v9584_v62 }
 0x577   :  { %3836 = vmatmul.mubr.bf16.gmra.mrb[28].mxu0 %v9582_v47 }
 0x578   :  { %3980 = vmatprep.mubr.bf16.mxu0 %v9587_v14 }
 0x57f   :  { %3981 = vmatmul.mubr.bf16.vlgmr.msra.gmra.mrb[32].mxu0 %v9585_v42 }
 0x580   :  { %3988 = vmatprep.mubr.bf16.mxu0 %v9590_v59 }
 0x587   :  { %3989 = vmatmul.mubr.bf16.gmra.mrb[36].mxu0 %v9588_v37 }
 0x588   :  { %3996 = vmatprep.mubr.bf16.mxu0 %v9593_v32 }
 0x58f   :  { %3997 = vmatmul.mubr.bf16.gmra.mrb[40].mxu0 %v9591_v58 }
 0x590   :  { %4004 = vmatprep.mubr.bf16.mxu0 %v9596_v60 }
 0x597   :  { %4005 = vmatmul.mubr.bf16.gmra.mrb[44].mxu0 %v9594_v35 }
 0x598   :  { %4012 = vmatprep.mubr.bf16.mxu0 %v9599_v36 }
 0x59f   :  { %4013 = vmatmul.mubr.bf16.gmra.mrb[48].mxu0 %v9597_v10 }
 0x5a0   :  { %4020 = vmatprep.mubr.bf16.mxu0 %v9602_v55 }
 0x5a7   :  { %4021 = vmatmul.mubr.bf16.gmra.mrb[52].mxu0 %v9600_v22 }
 0x5a8   :  { %4028 = vmatprep.mubr.bf16.mxu0 %v9605_v26 }
 0x5af   :  { %4029 = vmatmul.mubr.bf16.gmra.mrb[56].mxu0 %v9603_v28 }
 0x5b0   :  { %4036 = vmatprep.mubr.bf16.mxu0 %v9608_v17 }
 0x5b7   :  { %4037 = vmatmul.mubr.bf16.gmra.mrb[60].mxu0 %v9606_v54 }
 0x5b8   :  { %8470 = vmatprep.mubr.bf16.mxu0 %v9609_v3 }
 0x612   :  { %v8166_v34 = vpop.f32.mrb[0].mxu0 }
 0x613   :  { %v8167_v20 = vpop.f32.mrb[1].mxu0 }
 0x614   :  { %v11489_v56 = vadd.f32 %v8167_v20, %v8166_v34  ;;  %v8169_v12 = vpop.f32.mrb[2].mxu0 }
 0x615   :  { %v8170_v16 = vpop.f32.mrb[3].mxu0 }
 0x616   :  { %v8171_v11 = vadd.f32 %v8170_v16, %v8169_v12 }
 0x618   :  { %v3844_v61 = vpack.c.bf16 %v8171_v11, %v11489_v56 }
 0x61a   :  { %v8172_v53 = vpop.f32.mrb[4].mxu0 }
 0x61b   :  { %v8173_v31 = vpop.f32.mrb[5].mxu0 }
 0x61c   :  { %v11492_v23 = vadd.f32 %v8173_v31, %v8172_v53  ;;  %v8175_v25 = vpop.f32.mrb[6].mxu0 }
 0x61d   :  { %v8176_v1 = vpop.f32.mrb[7].mxu0 }
 0x61e   :  { %v8177_v49 = vadd.f32 %v8176_v1, %v8175_v25 }
 0x620   :  { %v3845_v50 = vpack.c.bf16 %v8177_v49, %v11492_v23 }
 0x622   :  { %v8178_v0 = vpop.f32.mrb[8].mxu0 }
 0x623   :  { %v8179_v6 = vpop.f32.mrb[9].mxu0 }
 0x624   :  { %v11495_v18 = vadd.f32 %v8179_v6, %v8178_v0  ;;  %v8181_v33 = vpop.f32.mrb[10].mxu0 }
 0x625   :  { %v8182_v9 = vpop.f32.mrb[11].mxu0 }
 0x626   :  { %v11497_v39 = vadd.f32 %v8182_v9, %v8181_v33 }
 0x628   :  { %v3846_v24 = vpack.c.bf16 %v11497_v39, %v11495_v18 }
 0x62a   :  { %v8184_v2 = vpop.f32.mrb[12].mxu0 }
 0x62b   :  { %v8185_v44 = vpop.f32.mrb[13].mxu0 }
 0x62c   :  { %v11501_v40 = vadd.f32 %v8185_v44, %v8184_v2  ;;  %v8187_v30 = vpop.f32.mrb[14].mxu0 }
 0x62d   :  { %v8188_v13 = vpop.f32.mrb[15].mxu0 }
 0x62e   :  { %v11503_v38 = vadd.f32 %v8188_v13, %v8187_v30 }
 0x630   :  { %v3847_v48 = vpack.c.bf16 %v11503_v38, %v11501_v40  ;;  %v9635_v40 = vld [vmem:[#allocation7 + $0xa4] ss:$8 sps:$4 sm:$0xff]  }
 0x632   :  { %v8190_v43 = vpop.f32.mrb[16].mxu0 }
 0x633   :  { %v8191_v27 = vpop.f32.mrb[17].mxu0 }
 0x634   :  { %v11507_v21 = vadd.f32 %v8191_v27, %v8190_v43  ;;  %v8193_v7 = vpop.f32.mrb[18].mxu0 }
 0x635   :  { %v8194_v52 = vpop.f32.mrb[19].mxu0 }
 0x636   :  { %v11509_v4 = vadd.f32 %v8194_v52, %v8193_v7 }
 0x638   :  { %v3848_v5 = vpack.c.bf16 %v11509_v4, %v11507_v21  ;;  %v9641_v21 = vld [vmem:[#allocation7 + $0xc4] ss:$8 sps:$4 sm:$0xff]  }
 0x63a   :  { %v8196_v45 = vpop.f32.mrb[20].mxu0 }
 0x63b   :  { %v8197_v63 = vpop.f32.mrb[21].mxu0 }
 0x63c   :  { %v11513_v8 = vadd.f32 %v8197_v63, %v8196_v45  ;;  %v8199_v46 = vpop.f32.mrb[22].mxu0 }
 0x63d   :  { %v8200_v41 = vpop.f32.mrb[23].mxu0 }
 0x63e   :  { %v11515_v29 = vadd.f32 %v8200_v41, %v8199_v46 }
 0x640   :  { %v3849_v62 = vpack.c.bf16 %v11515_v29, %v11513_v8  ;;  %v9649_v8 = vld [vmem:[#allocation7 + $0xe4] ss:$8 sps:$4 sm:$0xff]  }
 0x642   :  { %v8202_v47 = vpop.f32.mrb[24].mxu0 }
 0x643   :  { %v8203_v14 = vpop.f32.mrb[25].mxu0 }
 0x644   :  { %v11519_v42 = vadd.f32 %v8203_v14, %v8202_v47  ;;  %v8205_v59 = vpop.f32.mrb[26].mxu0  ;;  %v9627_v47 = vld [vmem:[#allocation7 + $0x80] ss:$8 sps:$4 sm:$0xff]   ;;  %v9629_v14 = vld [vmem:[#allocation7 + $0x84] ss:$8 sps:$4 sm:$0xff]  }
 0x645   :  { %v8206_v37 = vpop.f32.mrb[27].mxu0  ;;  %4343 = vmatprep.subr.bf16.mxu1 %v9629_v14  ;;  %v9626_v14 = vld [vmem:[#allocation10 + $0x88] sm:$0xff]  }
 0x646   :  { %v11521_v32 = vadd.f32 %v8206_v37, %v8205_v59  ;;  %v9632_v37 = vld [vmem:[#allocation7 + $0x94] ss:$8 sps:$4 sm:$0xff]   ;;  %4344 = vmatpush1.bf16.msra.mxu1 %v9627_v47  ;;  %v9625_v47 = vld [vmem:[#allocation10 + $0x80] sm:$0xff]  }
 0x647   :  { %4345 = vmatprep.subr.bf16.mxu1 %v9632_v37  ;;  %v9646_v37 = vld [vmem:[#allocation10 + $0x98] sm:$0xff]  }
 0x648   :  { %v3850_v58 = vpack.c.bf16 %v11521_v32, %v11519_v42  ;;  %v9610_v32 = vld [vmem:[#allocation10 + $0x8] sm:$0xff]  }
 0x64a   :  { %v8208_v60 = vpop.f32.mrb[28].mxu0 }
 0x64b   :  { %v8209_v35 = vpop.f32.mrb[29].mxu0 }
 0x64c   :  { %v11525_v36 = vadd.f32 %v8209_v35, %v8208_v60  ;;  %v8211_v10 = vpop.f32.mrb[30].mxu0  ;;  %v9630_v35 = vld [vmem:[#allocation7 + $0x90] ss:$8 sps:$4 sm:$0xff]  }
 0x64d   :  { %v8212_v55 = vpop.f32.mrb[31].mxu0  ;;  %4346 = vmatpush1.bf16.msra.mxu1 %v9630_v35  ;;  %v9650_v35 = vld [vmem:[#allocation7 + $0xf0] ss:$8 sps:$4 sm:$0xff]  }
 0x64e   :  { %v11527_v22 = vadd.f32 %v8212_v55, %v8211_v10  ;;  %4347 = vmatprep.subr.bf16.mxu1 %v9635_v40  ;;  %v9653_v40 = vld [vmem:[#allocation10 + $0xa0] sm:$0xff]  }
 0x650   :  { %v3851_v26 = vpack.c.bf16 %v11527_v22, %v11525_v36  ;;  %v9613_v36 = vld [vmem:[#allocation10 + $0x20] sm:$0xff]   ;;  %v9614_v22 = vld [vmem:[#allocation10 + $0x28] sm:$0xff]  }
 0x652   :  { %v8230_v28 = vpop.f32.mrb[32].mxu0 }
 0x653   :  { %v8231_v17 = vpop.f32.mrb[33].mxu0 }
 0x654   :  { %v8232_v54 = vadd.f32 %v8231_v17, %v8230_v28  ;;  %v8233_v34 = vpop.f32.mrb[34].mxu0  ;;  %v9633_v17 = vld [vmem:[#allocation7 + $0xa0] ss:$8 sps:$4 sm:$0xff]  }
 0x655   :  { %v8234_v20 = vpop.f32.mrb[35].mxu0  ;;  %4348 = vmatpush1.bf16.msra.mxu1 %v9633_v17  ;;  %v9663_v17 = vld [vmem:[#allocation10 + $0xc0] sm:$0xff]  }
 0x656   :  { %v8235_v56 = vadd.f32 %v8234_v20, %v8233_v34  ;;  %v9638_v34 = vld [vmem:[#allocation7 + $0xb4] ss:$8 sps:$4 sm:$0xff]  }
 0x657   :  { %4349 = vmatprep.subr.bf16.mxu1 %v9638_v34  ;;  %v9677_v34 = vld [vmem:[#allocation10 + $0xd0] sm:$0xff]  }
 0x658   :  { %v4045_v12 = vpack.c.bf16 %v8235_v56, %v8232_v54 }
 0x65a   :  { %v11531_v16 = vmax.bf16 %v4045_v12, %v3844_v61  ;;  %v8236_v3 = vpop.f32.mrb[36].mxu0  ;;  %v9636_v12 = vld [vmem:[#allocation7 + $0xb0] ss:$8 sps:$4 sm:$0xff]  }
 0x65b   :  { %v8237_v11 = vpop.f32.mrb[37].mxu0  ;;  %4350 = vmatpush1.bf16.msra.mxu1 %v9636_v12  ;;  %v9686_v12 = vld [vmem:[#allocation10 + $0xe8] sm:$0xff]  }
 0x65c   :  { %v8238_v53 = vadd.f32 %v8237_v11, %v8236_v3  ;;  %v8239_v31 = vpop.f32.mrb[38].mxu0  ;;  %8454 = vmatprep.subr.bf16.mxu0 %v11531_v16  ;;  %4351 = vmatprep.subr.bf16.mxu1 %v9641_v21  ;;  %v9687_v21 = vld [vmem:[#allocation10 + $0xf0] sm:$0xff]  }
 0x65d   :  { %v8240_v23 = vpop.f32.mrb[39].mxu0  ;;  %8455 = vmatpush3.bf16.msra.mxu0 %v11531_v16 }
 0x65e   :  { %v8241_v25 = vadd.f32 %v8240_v23, %v8239_v31  ;;  %v9639_v31 = vld [vmem:[#allocation7 + $0xc0] ss:$8 sps:$4 sm:$0xff]  }
 0x65f   :  { %4352 = vmatpush1.bf16.msra.mxu1 %v9639_v31 }
 0x660   :  { %v4046_v1 = vpack.c.bf16 %v8241_v25, %v8238_v53  ;;  %v9644_v25 = vld [vmem:[#allocation7 + $0xd4] ss:$8 sps:$4 sm:$0xff]  }
 0x661   :  { %4353 = vmatprep.subr.bf16.mxu1 %v9644_v25  ;;  %v9657_v25 = vld [vmem:[#allocation7] ss:$8 sps:$4 sm:$0xff]  }
 0x662   :  { %v11535_v49 = vmax.bf16 %v4046_v1, %v3845_v50  ;;  %v8242_v0 = vpop.f32.mrb[40].mxu0 }
 0x663   :  { %v8243_v6 = vpop.f32.mrb[41].mxu0 }
 0x664   :  { %v8244_v33 = vadd.f32 %v8243_v6, %v8242_v0  ;;  %v8245_v9 = vpop.f32.mrb[42].mxu0  ;;  %8456 = vmatprep.subr.bf16.mxu0 %v11535_v49  ;;  %v9642_v6 = vld [vmem:[#allocation7 + $0xd0] ss:$8 sps:$4 sm:$0xff]  }
 0x665   :  { %v8246_v61 = vpop.f32.mrb[43].mxu0  ;;  %8457 = vmatpush3.bf16.msra.mxu0 %v11535_v49  ;;  %4354 = vmatpush1.bf16.msra.mxu1 %v9642_v6  ;;  %v9660_v6 = vld [vmem:[#allocation7 + $0x10] ss:$8 sps:$4 sm:$0xff]  }
 0x666   :  { %v8247_v2 = vadd.f32 %v8246_v61, %v8245_v9  ;;  %4355 = vmatprep.subr.bf16.mxu1 %v9649_v8 }
 0x668   :  { %v4047_v44 = vpack.c.bf16 %v8247_v2, %v8244_v33  ;;  %v9647_v2 = vld [vmem:[#allocation7 + $0xe0] ss:$8 sps:$4 sm:$0xff]  }
 0x669   :  { %4356 = vmatpush1.bf16.msra.mxu1 %v9647_v2 }
 0x66a   :  { %v11542_v30 = vmax.bf16 %v4047_v44, %v3846_v24  ;;  %v8248_v13 = vpop.f32.mrb[44].mxu0 }
 0x66b   :  { %v8249_v43 = vpop.f32.mrb[45].mxu0 }
 0x66c   :  { %v8250_v50 = vadd.f32 %v8249_v43, %v8248_v13  ;;  %v8251_v27 = vpop.f32.mrb[46].mxu0  ;;  %8458 = vmatprep.subr.bf16.mxu0 %v11542_v30 }
 0x66d   :  { %v8252_v7 = vpop.f32.mrb[47].mxu0  ;;  %8459 = vmatpush3.bf16.msra.mxu0 %v11542_v30 }
 0x66e   :  { %v8253_v52 = vadd.f32 %v8252_v7, %v8251_v27  ;;  %v9616_v27 = vld [vmem:[#allocation10 + $0x38] sm:$0xff]   ;;  %v9617_v7 = vld [vmem:[#allocation10 + $0x40] sm:$0xff]  }
 0x670   :  { %v4048_v45 = vpack.c.bf16 %v8253_v52, %v8250_v50  ;;  %v9612_v50 = vld [vmem:[#allocation10 + $0x18] sm:$0xff]   ;;  %v9618_v52 = vld [vmem:[#allocation10 + $0x48] sm:$0xff]  }
 0x672   :  { %v11549_v63 = vmax.bf16 %v4048_v45, %v3847_v48  ;;  %v8254_v46 = vpop.f32.mrb[48].mxu0  ;;  %v9619_v45 = vld [vmem:[#allocation10 + $0x50] sm:$0xff]  }
 0x673   :  { %v8255_v18 = vpop.f32.mrb[49].mxu0 }
 0x674   :  { %v8256_v39 = vadd.f32 %v8255_v18, %v8254_v46  ;;  %v8257_v24 = vpop.f32.mrb[50].mxu0  ;;  %8460 = vmatprep.subr.bf16.mxu0 %v11549_v63  ;;  %v9620_v46 = vld [vmem:[#allocation10 + $0x58] sm:$0xff]   ;;  %v9621_v18 = vld [vmem:[#allocation10 + $0x60] sm:$0xff]  }
 0x675   :  { %v8258_v41 = vpop.f32.mrb[51].mxu0  ;;  %8461 = vmatpush3.bf16.msra.mxu0 %v11549_v63 }
 0x676   :  { %v8259_v59 = vadd.f32 %v8258_v41, %v8257_v24  ;;  %v9623_v24 = vld [vmem:[#allocation10 + $0x70] sm:$0xff]   ;;  %v9624_v41 = vld [vmem:[#allocation10 + $0x78] sm:$0xff]  }
 0x678   :  { %v4049_v60 = vpack.c.bf16 %v8259_v59, %v8256_v39  ;;  %v9622_v39 = vld [vmem:[#allocation10 + $0x68] sm:$0xff]   ;;  %v9645_v59 = vld [vmem:[#allocation10 + $0x90] sm:$0xff]  }
 0x67a   :  { %v11556_v38 = vmax.bf16 %v4049_v60, %v3848_v5  ;;  %v8260_v48 = vpop.f32.mrb[52].mxu0  ;;  %v9652_v60 = vld [vmem:[#allocation7 + $0xf4] ss:$8 sps:$4 sm:$0xff]  }
 0x67b   :  { %v8261_v10 = vpop.f32.mrb[53].mxu0  ;;  %4357 = vmatprep.subr.bf16.mxu1 %v9652_v60  ;;  %v9684_v60 = vld [vmem:[#allocation7 + $0x74] ss:$8 sps:$4 sm:$0xff]  }
 0x67c   :  { %v8262_v55 = vadd.f32 %v8261_v10, %v8260_v48  ;;  %v8263_v28 = vpop.f32.mrb[54].mxu0  ;;  %8462 = vmatprep.subr.bf16.mxu0 %v11556_v38  ;;  %4358 = vmatpush1.bf16.msra.mxu1 %v9650_v35  ;;  %v9654_v48 = vld [vmem:[#allocation10 + $0xa8] sm:$0xff]   ;;  %v9655_v10 = vld [vmem:[#allocation10 + $0xb0] sm:$0xff]  }
 0x67d   :  { %v8264_v54 = vpop.f32.mrb[55].mxu0  ;;  %8463 = vmatpush3.bf16.msra.mxu0 %v11556_v38  ;;  %v9682_v35 = vld [vmem:[#allocation7 + $0x70] ss:$8 sps:$4 sm:$0xff]  }
 0x67e   :  { %v8265_v20 = vadd.f32 %v8264_v54, %v8263_v28  ;;  %v9659_v28 = vld [vmem:[#allocation7 + $0x4] ss:$8 sps:$4 sm:$0xff]  }
 0x67f   :  { %4536 = vmatprep.subr.bf16.mxu1 %v9659_v28  ;;  %v9664_v54 = vld [vmem:[#allocation10 + $0xc8] sm:$0xff]  }
 0x680   :  { %v4050_v56 = vpack.c.bf16 %v8265_v20, %v8262_v55  ;;  %v9656_v55 = vld [vmem:[#allocation10 + $0xb8] sm:$0xff]  }
 0x681   :  { %v9678_v20 = vld [vmem:[#allocation10 + $0xd8] sm:$0xff]  }
 0x682   :  { %v11563_v4 = vmax.bf16 %v4050_v56, %v3849_v62  ;;  %v8266_v5 = vpop.f32.mrb[56].mxu0  ;;  %v9685_v56 = vld [vmem:[#allocation10 + $0xe0] sm:$0xff]  }
 0x683   :  { %v8267_v3 = vpop.f32.mrb[57].mxu0 }
 0x684   :  { %v8268_v11 = vadd.f32 %v8267_v3, %v8266_v5  ;;  %v8269_v53 = vpop.f32.mrb[58].mxu0  ;;  %8464 = vmatprep.subr.bf16.mxu0 %v11563_v4  ;;  %v9688_v5 = vld [vmem:[#allocation10 + $0xf8] sm:$0xff]  }
 0x685   :  { %v8270_v23 = vpop.f32.mrb[59].mxu0  ;;  %8465 = vmatpush3.bf16.msra.mxu0 %v11563_v4 }
 0x686   :  { %v8271_v1 = vadd.f32 %v8270_v23, %v8269_v53 }
 0x688   :  { %v4051_v0 = vpack.c.bf16 %v8271_v1, %v8268_v11 }
 0x68a   :  { %v11570_v29 = vmax.bf16 %v4051_v0, %v3850_v58  ;;  %v8272_v62 = vpop.f32.mrb[60].mxu0  ;;  %v9611_v58 = vld [vmem:[#allocation10 + $0x10] sm:$0xff]  }
 0x68b   :  { %v8273_v33 = vpop.f32.mrb[61].mxu0  ;;  %v9662_v0 = vld [vmem:[#allocation7 + $0x14] ss:$8 sps:$4 sm:$0xff]  }
 0x68c   :  { %v8274_v9 = vadd.f32 %v8273_v33, %v8272_v62  ;;  %v8275_v61 = vpop.f32.mrb[62].mxu0  ;;  %8466 = vmatprep.subr.bf16.mxu0 %v11570_v29  ;;  %v9667_v62 = vld [vmem:[#allocation7 + $0x24] ss:$8 sps:$4 sm:$0xff]  }
 0x68d   :  { %v8276_v44 = vpop.f32.mrb[63].mxu0  ;;  %8467 = vmatpush3.bf16.msra.mxu0 %v11570_v29 }
 0x68e   :  { %v8277_v13 = vadd.f32 %v8276_v44, %v8275_v61  ;;  %v9665_v44 = vld [vmem:[#allocation7 + $0x20] ss:$8 sps:$4 sm:$0xff]  }
 0x690   :  { %v4052_v43 = vpack.c.bf16 %v8277_v13, %v8274_v9 }
 0x692   :  { %v11577_v42 = vmax.bf16 %v4052_v43, %v3851_v26  ;;  %v9615_v26 = vld [vmem:[#allocation10 + $0x30] sm:$0xff]  }
 0x693   :  { %v9670_v43 = vld [vmem:[#allocation7 + $0x34] ss:$8 sps:$4 sm:$0xff]  }
 0x694   :  { %8468 = vmatprep.subr.bf16.mxu0 %v11577_v42 }
 0x695   :  { %8469 = vmatpush3.bf16.msra.mxu0 %v11577_v42 }
 0x696   :  { %8486 = vmatprep.subr.bf16.mxu0 %v11531_v16 }
 0x698   :  { %8471 = vmatmul.mubr.bf16.vlgmr.msra.gmra.mrb[64].mxu0 %v9610_v32  ;;  %v9668_v32 = vld [vmem:[#allocation7 + $0x30] ss:$8 sps:$4 sm:$0xff]  }
 0x699   :  { %8487 = vmatpush3.bf16.msra.mxu0 %v11531_v16  ;;  %8474 = vmatprep.mubr.bf16.mxu0 %v9611_v58 }
 0x69a   :  { %8488 = vmatprep.subr.bf16.mxu0 %v11535_v49 }
 0x69d   :  { %8489 = vmatpush3.bf16.msra.mxu0 %v11535_v49 }
 0x69e   :  { %8490 = vmatprep.subr.bf16.mxu0 %v11542_v30 }
 0x6a0   :  { %8475 = vmatmul.mubr.bf16.gmra.mrb[68].mxu0 %v9612_v50  ;;  %v9673_v50 = vld [vmem:[#allocation7 + $0x44] ss:$8 sps:$4 sm:$0xff]  }
 0x6a1   :  { %8491 = vmatpush3.bf16.msra.mxu0 %v11542_v30  ;;  %8478 = vmatprep.mubr.bf16.mxu0 %v9613_v36 }
 0x6a2   :  { %8492 = vmatprep.subr.bf16.mxu0 %v11549_v63 }
 0x6a5   :  { %8493 = vmatpush3.bf16.msra.mxu0 %v11549_v63 }
 0x6a6   :  { %8494 = vmatprep.subr.bf16.mxu0 %v11556_v38 }
 0x6a8   :  { %8479 = vmatmul.mubr.bf16.gmra.mrb[72].mxu0 %v9614_v22 }
 0x6a9   :  { %8495 = vmatpush3.bf16.msra.mxu0 %v11556_v38  ;;  %8482 = vmatprep.mubr.bf16.mxu0 %v9615_v26 }
 0x6aa   :  { %8496 = vmatprep.subr.bf16.mxu0 %v11563_v4 }
 0x6ad   :  { %8497 = vmatpush3.bf16.msra.mxu0 %v11563_v4 }
 0x6ae   :  { %8498 = vmatprep.subr.bf16.mxu0 %v11570_v29 }
 0x6b0   :  { %8483 = vmatmul.mubr.bf16.gmra.mrb[76].mxu0 %v9616_v27 }
 0x6b1   :  { %8499 = vmatpush3.bf16.msra.mxu0 %v11570_v29  ;;  %8502 = vmatprep.mubr.bf16.mxu0 %v9617_v7  ;;  %v9671_v7 = vld [vmem:[#allocation7 + $0x40] ss:$8 sps:$4 sm:$0xff]  }
 0x6b2   :  { %8500 = vmatprep.subr.bf16.mxu0 %v11577_v42 }
 0x6b5   :  { %8501 = vmatpush3.bf16.msra.mxu0 %v11577_v42 }
 0x6b6   :  { %8518 = vmatprep.subr.bf16.mxu0 %v11531_v16 }
 0x6b8   :  { %8503 = vmatmul.mubr.bf16.vlgmr.msra.gmra.mrb[80].mxu0 %v9618_v52 }
 0x6b9   :  { %8519 = vmatpush3.bf16.msra.mxu0 %v11531_v16  ;;  %8506 = vmatprep.mubr.bf16.mxu0 %v9619_v45  ;;  %v9676_v45 = vld [vmem:[#allocation7 + $0x54] ss:$8 sps:$4 sm:$0xff]  }
 0x6ba   :  { %8520 = vmatprep.subr.bf16.mxu0 %v11535_v49 }
 0x6bd   :  { %8521 = vmatpush3.bf16.msra.mxu0 %v11535_v49 }
 0x6be   :  { %8522 = vmatprep.subr.bf16.mxu0 %v11542_v30 }
 0x6c0   :  { %8507 = vmatmul.mubr.bf16.gmra.mrb[84].mxu0 %v9620_v46  ;;  %v9674_v46 = vld [vmem:[#allocation7 + $0x50] ss:$8 sps:$4 sm:$0xff]  }
 0x6c1   :  { %8523 = vmatpush3.bf16.msra.mxu0 %v11542_v30  ;;  %8510 = vmatprep.mubr.bf16.mxu0 %v9621_v18 }
 0x6c2   :  { %8524 = vmatprep.subr.bf16.mxu0 %v11549_v63 }
 0x6c5   :  { %8525 = vmatpush3.bf16.msra.mxu0 %v11549_v63 }
 0x6c6   :  { %8526 = vmatprep.subr.bf16.mxu0 %v11556_v38 }
 0x6c8   :  { %8511 = vmatmul.mubr.bf16.gmra.mrb[88].mxu0 %v9622_v39  ;;  %v9681_v39 = vld [vmem:[#allocation7 + $0x64] ss:$8 sps:$4 sm:$0xff]  }
 0x6c9   :  { %8527 = vmatpush3.bf16.msra.mxu0 %v11556_v38  ;;  %8514 = vmatprep.mubr.bf16.mxu0 %v9623_v24 }
 0x6ca   :  { %8528 = vmatprep.subr.bf16.mxu0 %v11563_v4 }
 0x6cd   :  { %8529 = vmatpush3.bf16.msra.mxu0 %v11563_v4 }
 0x6ce   :  { %8530 = vmatprep.subr.bf16.mxu0 %v11570_v29 }
 0x6d0   :  { %8515 = vmatmul.mubr.bf16.gmra.mrb[92].mxu0 %v9624_v41 }
 0x6d1   :  { %8531 = vmatpush3.bf16.msra.mxu0 %v11570_v29  ;;  %8534 = vmatprep.mubr.bf16.mxu0 %v9625_v47 }
 0x6d2   :  { %8532 = vmatprep.subr.bf16.mxu0 %v11577_v42 }
 0x6d5   :  { %8533 = vmatpush3.bf16.msra.mxu0 %v11577_v42 }
 0x6d6   :  { %8550 = vmatprep.subr.bf16.mxu0 %v11531_v16 }
 0x6d8   :  { %8535 = vmatmul.mubr.bf16.vlgmr.msra.gmra.mrb[96].mxu0 %v9626_v14 }
 0x6d9   :  { %8551 = vmatpush3.bf16.msra.mxu0 %v11531_v16  ;;  %8538 = vmatprep.mubr.bf16.mxu0 %v9645_v59  ;;  %v9679_v59 = vld [vmem:[#allocation7 + $0x60] ss:$8 sps:$4 sm:$0xff]  }
 0x6da   :  { %8552 = vmatprep.subr.bf16.mxu0 %v11535_v49 }
 0x6dd   :  { %8553 = vmatpush3.bf16.msra.mxu0 %v11535_v49 }
 0x6de   :  { %8554 = vmatprep.subr.bf16.mxu0 %v11542_v30 }
 0x6e0   :  { %8539 = vmatmul.mubr.bf16.gmra.mrb[100].mxu0 %v9646_v37 }
 0x6e1   :  { %8555 = vmatpush3.bf16.msra.mxu0 %v11542_v30  ;;  %8542 = vmatprep.mubr.bf16.mxu0 %v9653_v40  ;;  %v9691_v40 = vld [vmem:[#allocation7 + $0x104] ss:$8 sps:$4 sm:$0xff]  }
 0x6e2   :  { %8556 = vmatprep.subr.bf16.mxu0 %v11549_v63 }
 0x6e5   :  { %8557 = vmatpush3.bf16.msra.mxu0 %v11549_v63 }
 0x6e6   :  { %8558 = vmatprep.subr.bf16.mxu0 %v11556_v38 }
 0x6e8   :  { %8543 = vmatmul.mubr.bf16.gmra.mrb[104].mxu0 %v9654_v48 }
 0x6e9   :  { %8559 = vmatpush3.bf16.msra.mxu0 %v11556_v38  ;;  %8546 = vmatprep.mubr.bf16.mxu0 %v9655_v10 }
 0x6ea   :  { %8560 = vmatprep.subr.bf16.mxu0 %v11563_v4 }
 0x6ed   :  { %8561 = vmatpush3.bf16.msra.mxu0 %v11563_v4 }
 0x6ee   :  { %8562 = vmatprep.subr.bf16.mxu0 %v11570_v29 }
 0x6f0   :  { %8547 = vmatmul.mubr.bf16.gmra.mrb[108].mxu0 %v9656_v55 }
 0x6f1   :  { %8563 = vmatpush3.bf16.msra.mxu0 %v11570_v29  ;;  %8566 = vmatprep.mubr.bf16.mxu0 %v9663_v17 }
 0x6f2   :  { %8564 = vmatprep.subr.bf16.mxu0 %v11577_v42 }
 0x6f5   :  { %8565 = vmatpush3.bf16.msra.mxu0 %v11577_v42 }
 0x6f8   :  { %8567 = vmatmul.mubr.bf16.vlgmr.msra.gmra.mrb[112].mxu0 %v9664_v54 }
 0x6f9   :  { %8570 = vmatprep.mubr.bf16.mxu0 %v9677_v34 }
 0x700   :  { %8571 = vmatmul.mubr.bf16.gmra.mrb[116].mxu0 %v9678_v20 }
 0x701   :  { %8574 = vmatprep.mubr.bf16.mxu0 %v9685_v56 }
 0x708   :  { %8575 = vmatmul.mubr.bf16.gmra.mrb[120].mxu0 %v9686_v12 }
 0x709   :  { %8578 = vmatprep.mubr.bf16.mxu0 %v9687_v21 }
 0x710   :  { %8579 = vmatmul.mubr.bf16.gmra.mrb[124].mxu0 %v9688_v5 }
 0x76b   :  { %v8472_v3 = vpop.f32.mrb[64].mxu0 }
 0x76c   :  { %v4175_v11 = vpop.f32.mrb[65].mxu0 }
 0x76d   :  { %v8473_v53 = vpop.f32.mrb[66].mxu0 }
 0x76e   :  { %v4239_v31 = vpack.c.bf16 %v8473_v53, %v8472_v3  ;;  %v4178_v23 = vpop.f32.mrb[67].mxu0 }
 0x76f   :  { %v4238_v1 = vpack.c.bf16 %v4178_v23, %v4175_v11 }
 0x771   :  { %4376 = vmatmul.mubr.bf16.vlgmr.msra.gmra.mrb[64].mxu1 %v4238_v1 }
 0x772   :  { %4385 = vmatprep.mubr.bf16.mxu1 %v10142_v57  ;;  %4537 = vmatpush1.bf16.msra.mxu1 %v9657_v25 }
 0x773   :  { %v8476_v8 = vpop.f32.mrb[68].mxu0  ;;  %4538 = vmatprep.subr.bf16.mxu1 %v9662_v0 }
 0x774   :  { %v4191_v33 = vpop.f32.mrb[69].mxu0 }
 0x775   :  { %v8477_v9 = vpop.f32.mrb[70].mxu0 }
 0x776   :  { %v4241_v61 = vpack.c.bf16 %v8477_v9, %v8476_v8  ;;  %v4194_v2 = vpop.f32.mrb[71].mxu0  ;;  %4539 = vmatpush1.bf16.msra.mxu1 %v9660_v6 }
 0x777   :  { %v4240_v13 = vpack.c.bf16 %v4194_v2, %v4191_v33  ;;  %4540 = vmatprep.subr.bf16.mxu1 %v9667_v62 }
 0x779   :  { %4386 = vmatmul.mubr.bf16.gmra.mrb[68].mxu1 %v4239_v31 }
 0x77a   :  { %4395 = vmatprep.mubr.bf16.mxu1 %v10142_v57  ;;  %4541 = vmatpush1.bf16.msra.mxu1 %v9665_v44  ;;  %v9689_v44 = vld [vmem:[#allocation7 + $0x100] ss:$8 sps:$4 sm:$0xff]  }
 0x77b   :  { %v8480_v58 = vpop.f32.mrb[72].mxu0  ;;  %4542 = vmatprep.subr.bf16.mxu1 %v9670_v43 }
 0x77c   :  { %v4207_v36 = vpop.f32.mrb[73].mxu0 }
 0x77d   :  { %v8481_v22 = vpop.f32.mrb[74].mxu0 }
 0x77e   :  { %v4243_v26 = vpack.c.bf16 %v8481_v22, %v8480_v58  ;;  %v4210_v27 = vpop.f32.mrb[75].mxu0  ;;  %4543 = vmatpush1.bf16.msra.mxu1 %v9668_v32  ;;  %v9694_v32 = vld [vmem:[#allocation7 + $0x114] ss:$8 sps:$4 sm:$0xff]   ;;  %v9695_v22 = vld [vmem:[#allocation7 + $0x120] ss:$8 sps:$4 sm:$0xff]  }
 0x77f   :  { %v4242_v52 = vpack.c.bf16 %v4210_v27, %v4207_v36  ;;  %4544 = vmatprep.subr.bf16.mxu1 %v9673_v50  ;;  %v9692_v50 = vld [vmem:[#allocation7 + $0x110] ss:$8 sps:$4 sm:$0xff]   ;;  %v9697_v36 = vld [vmem:[#allocation7 + $0x124] ss:$8 sps:$4 sm:$0xff]  }
 0x781   :  { %4396 = vmatmul.mubr.bf16.gmra.mrb[72].mxu1 %v4240_v13 }
 0x782   :  { %4405 = vmatprep.mubr.bf16.mxu1 %v10142_v57  ;;  %4545 = vmatpush1.bf16.msra.mxu1 %v9671_v7 }
 0x783   :  { %v8484_v18 = vpop.f32.mrb[76].mxu0  ;;  %4546 = vmatprep.subr.bf16.mxu1 %v9676_v45  ;;  %v9703_v45 = vld [vmem:[#allocation7 + $0x144] ss:$8 sps:$4 sm:$0xff]  }
 0x784   :  { %v4223_v24 = vpop.f32.mrb[77].mxu0 }
 0x785   :  { %v8485_v41 = vpop.f32.mrb[78].mxu0 }
 0x786   :  { %v4245_v47 = vpack.c.bf16 %v8485_v41, %v8484_v18  ;;  %v4226_v14 = vpop.f32.mrb[79].mxu0  ;;  %4547 = vmatpush1.bf16.msra.mxu1 %v9674_v46  ;;  %v9704_v41 = vld [vmem:[#allocation7 + $0x150] ss:$8 sps:$4 sm:$0xff]  }
 0x787   :  { %v4244_v37 = vpack.c.bf16 %v4226_v14, %v4223_v24  ;;  %4548 = vmatprep.subr.bf16.mxu1 %v9681_v39  ;;  %v9706_v24 = vld [vmem:[#allocation7 + $0x154] ss:$8 sps:$4 sm:$0xff]   ;;  %v9707_v14 = vld [vmem:[#allocation7 + $0x160] ss:$8 sps:$4 sm:$0xff]  }
 0x789   :  { %4406 = vmatmul.mubr.bf16.gmra.mrb[76].mxu1 %v4241_v61 }
 0x78a   :  { %4415 = vmatprep.mubr.bf16.mxu1 %v10142_v57  ;;  %4549 = vmatpush1.bf16.msra.mxu1 %v9679_v59  ;;  %v9712_v59 = vld [vmem:[#allocation7 + $0x174] ss:$8 sps:$4 sm:$0xff]  }
 0x78b   :  { %4550 = vmatprep.subr.bf16.mxu1 %v9684_v60  ;;  %v11633_v48 = vpop.f32.mrb[80].mxu0 }
 0x78c   :  { %v11635_v10 = vpop.f32.mrb[81].mxu0 }
 0x78d   :  { %v11637_v55 = vpop.f32.mrb[82].mxu0 }
 0x78e   :  { %4551 = vmatpush1.bf16.msra.mxu1 %v9682_v35  ;;  %v4812_v28 = vpack.c.bf16 %v11637_v55, %v11633_v48  ;;  %v11641_v17 = vpop.f32.mrb[83].mxu0  ;;  %v9725_v48 = vld [vmem:[#allocation7 + $0x1c0] ss:$8 sps:$4 sm:$0xff]   ;;  %v9730_v55 = vld [vmem:[#allocation7 + $0x1d4] ss:$8 sps:$4 sm:$0xff]  }
 0x78f   :  { %4916 = vmatprep.subr.bf16.mxu1 %v9691_v40  ;;  %v4811_v54 = vpack.c.bf16 %v11641_v17, %v11635_v10  ;;  %v9715_v40 = vld [vmem:[#allocation7 + $0x184] ss:$8 sps:$4 sm:$0xff]   ;;  %v9722_v10 = vld [vmem:[#allocation7 + $0x1b0] ss:$8 sps:$4 sm:$0xff]  }
 0x791   :  { %4416 = vmatmul.mubr.bf16.gmra.mrb[80].mxu1 %v4242_v52 }
 0x792   :  { %4425 = vmatprep.mubr.bf16.mxu1 %v10142_v57 }
 0x793   :  { %v11646_v34 = vpop.f32.mrb[84].mxu0 }
 0x794   :  { %v11648_v20 = vpop.f32.mrb[85].mxu0 }
 0x795   :  { %v11650_v56 = vpop.f32.mrb[86].mxu0 }
 0x796   :  { %v4814_v12 = vpack.c.bf16 %v11650_v56, %v11646_v34  ;;  %v11654_v21 = vpop.f32.mrb[87].mxu0 }
 0x797   :  { %v4813_v5 = vpack.c.bf16 %v11654_v21, %v11648_v20  ;;  %v9734_v20 = vld [vmem:[#allocation7 + $0x1f0] ss:$8 sps:$4 sm:$0xff]  }
 0x799   :  { %4426 = vmatmul.mubr.bf16.gmra.mrb[84].mxu1 %v4243_v26  ;;  %v9700_v26 = vld [vmem:[#allocation7 + $0x134] ss:$8 sps:$4 sm:$0xff]  }
 0x79a   :  { %4435 = vmatprep.mubr.bf16.mxu1 %v10142_v57 }
 0x79b   :  { %v11659_v3 = vpop.f32.mrb[88].mxu0 }
 0x79c   :  { %v11661_v11 = vpop.f32.mrb[89].mxu0 }
 0x79d   :  { %v11663_v53 = vpop.f32.mrb[90].mxu0 }
 0x79e   :  { %v4816_v31 = vpack.c.bf16 %v11663_v53, %v11659_v3  ;;  %v11667_v23 = vpop.f32.mrb[91].mxu0  ;;  %v9737_v3 = vld [vmem:[#allocation7 + $0x200] ss:$8 sps:$4 sm:$0xff]   ;;  %v9742_v53 = vld [vmem:[#allocation7 + $0x214] ss:$8 sps:$4 sm:$0xff]  }
 0x79f   :  { %v4815_v25 = vpack.c.bf16 %v11667_v23, %v11661_v11  ;;  %v9745_v23 = vld [vmem:[#allocation7 + $0x224] ss:$8 sps:$4 sm:$0xff]  }
 0x7a1   :  { %4436 = vmatmul.mubr.bf16.gmra.mrb[88].mxu1 %v4244_v37 }
 0x7a2   :  { %4445 = vmatprep.mubr.bf16.mxu1 %v10142_v57 }
 0x7a3   :  { %v11672_v1 = vpop.f32.mrb[92].mxu0 }
 0x7a4   :  { %v11674_v0 = vpop.f32.mrb[93].mxu0 }
 0x7a5   :  { %v11676_v6 = vpop.f32.mrb[94].mxu0 }
 0x7a6   :  { %v4818_v8 = vpack.c.bf16 %v11676_v6, %v11672_v1  ;;  %v11680_v62 = vpop.f32.mrb[95].mxu0  ;;  %v9746_v1 = vld [vmem:[#allocation7 + $0x230] ss:$8 sps:$4 sm:$0xff]   ;;  %v9751_v6 = vld [vmem:[#allocation7 + $0x244] ss:$8 sps:$4 sm:$0xff]  }
 0x7a7   :  { %v4817_v33 = vpack.c.bf16 %v11680_v62, %v11674_v0  ;;  %v9748_v0 = vld [vmem:[#allocation7 + $0x234] ss:$8 sps:$4 sm:$0xff]  }
 0x7a8   :  { %v9754_v62 = vld [vmem:[#allocation7 + $0x254] ss:$8 sps:$4 sm:$0xff]  }
 0x7a9   :  { %4446 = vmatmul.mubr.bf16.gmra.mrb[92].mxu1 %v4245_v47  ;;  %v9709_v47 = vld [vmem:[#allocation7 + $0x164] ss:$8 sps:$4 sm:$0xff]  }
 0x7aa   :  { %4568 = vmatprep.mubr.bf16.mxu1 %v10142_v57 }
 0x7ab   :  { %v11685_v9 = vpop.f32.mrb[96].mxu0 }
 0x7ac   :  { %v11687_v61 = vpop.f32.mrb[97].mxu0 }
 0x7ad   :  { %v11689_v2 = vpop.f32.mrb[98].mxu0 }
 0x7ae   :  { %v5224_v13 = vpack.c.bf16 %v11689_v2, %v11685_v9  ;;  %v11693_v43 = vpop.f32.mrb[99].mxu0  ;;  %v9757_v9 = vld [vmem:[#allocation7 + $0x264] ss:$8 sps:$4 sm:$0xff]   ;;  %v9760_v2 = vld [vmem:[#allocation7 + $0x274] ss:$8 sps:$4 sm:$0xff]  }
 0x7af   :  { %v5223_v58 = vpack.c.bf16 %v11693_v43, %v11687_v61  ;;  %v9755_v61 = vld [vmem:[#allocation7 + $0x260] ss:$8 sps:$4 sm:$0xff]  }
 0x7b1   :  { %4569 = vmatmul.mubr.bf16.vlgmr.msra.gmra.mrb[64].mxu1 %v11531_v16  ;;  %v9698_v16 = vld [vmem:[#allocation7 + $0x130] ss:$8 sps:$4 sm:$0xff]  }
 0x7b2   :  { %4578 = vmatprep.mubr.bf16.mxu1 %v10142_v57  ;;  %4917 = vmatpush1.bf16.msra.mxu1 %v9689_v44 }
 0x7b3   :  { %4918 = vmatprep.subr.bf16.mxu1 %v9694_v32  ;;  %v11699_v27 = vpop.f32.mrb[100].mxu0 }
 0x7b4   :  { %v11702_v7 = vpop.f32.mrb[101].mxu0 }
 0x7b5   :  { %v11705_v52 = vpop.f32.mrb[102].mxu0 }
 0x7b6   :  { %4919 = vmatpush1.bf16.msra.mxu1 %v9692_v50  ;;  %v5226_v46 = vpack.c.bf16 %v11705_v52, %v11699_v27  ;;  %v11709_v18 = vpop.f32.mrb[103].mxu0 }
 0x7b7   :  { %4920 = vmatprep.subr.bf16.mxu1 %v9697_v36  ;;  %v5225_v39 = vpack.c.bf16 %v11709_v18, %v11702_v7  ;;  %v12161_v7 = vsub.s32 1, %v11313_v51 }
 0x7b9   :  { %4579 = vmatmul.mubr.bf16.gmra.mrb[68].mxu1 %v11535_v49  ;;  %v9701_v49 = vld [vmem:[#allocation7 + $0x140] ss:$8 sps:$4 sm:$0xff]  }
 0x7ba   :  { %4588 = vmatprep.mubr.bf16.mxu1 %v10142_v57  ;;  %4921 = vmatpush1.bf16.msra.mxu1 %v9695_v22 }
 0x7bb   :  { %4922 = vmatprep.subr.bf16.mxu1 %v9700_v26  ;;  %v11715_v37 = vpop.f32.mrb[104].mxu0 }
 0x7bc   :  { %v11718_v60 = vpop.f32.mrb[105].mxu0 }
 0x7bd   :  { %v11721_v35 = vpop.f32.mrb[106].mxu0 }
 0x7be   :  { %4923 = vmatpush1.bf16.msra.mxu1 %v9698_v16  ;;  %v5228_v44 = vpack.c.bf16 %v11721_v35, %v11715_v37  ;;  %v11725_v32 = vpop.f32.mrb[107].mxu0 }
 0x7bf   :  { %4924 = vmatprep.subr.bf16.mxu1 %v9703_v45  ;;  %v5227_v50 = vpack.c.bf16 %v11725_v32, %v11718_v60 }
 0x7c1   :  { %4589 = vmatmul.mubr.bf16.gmra.mrb[72].mxu1 %v11542_v30  ;;  %v9710_v30 = vld [vmem:[#allocation7 + $0x170] ss:$8 sps:$4 sm:$0xff]  }
 0x7c2   :  { %4598 = vmatprep.mubr.bf16.mxu1 %v10142_v57  ;;  %4925 = vmatpush1.bf16.msra.mxu1 %v9701_v49 }
 0x7c3   :  { %4926 = vmatprep.subr.bf16.mxu1 %v9706_v24 }
 0x7c6   :  { %4927 = vmatpush1.bf16.msra.mxu1 %v9704_v41 }
 0x7c7   :  { %4928 = vmatprep.subr.bf16.mxu1 %v9709_v47  ;;  %v9713_v47 = vld [vmem:[#allocation7 + $0x180] ss:$8 sps:$4 sm:$0xff]  }
 0x7c9   :  { %4599 = vmatmul.mubr.bf16.gmra.mrb[76].mxu1 %v11549_v63  ;;  %v11731_v63 = vpop.f32.mrb[108].mxu0 }
 0x7ca   :  { %4608 = vmatprep.mubr.bf16.mxu1 %v10142_v57  ;;  %4929 = vmatpush1.bf16.msra.mxu1 %v9707_v14  ;;  %v11734_v36 = vpop.f32.mrb[109].mxu0  ;;  %v9718_v14 = vld [vmem:[#allocation7 + $0x194] ss:$8 sps:$4 sm:$0xff]  }
 0x7cb   :  { %4930 = vmatprep.subr.bf16.mxu1 %v9712_v59  ;;  %v11737_v22 = vpop.f32.mrb[110].mxu0  ;;  %v9721_v59 = vld [vmem:[#allocation7 + $0x1a4] ss:$8 sps:$4 sm:$0xff]  }
 0x7cc   :  { %v5230_v26 = vpack.c.bf16 %v11737_v22, %v11731_v63  ;;  %v11741_v16 = vpop.f32.mrb[111].mxu0 }
 0x7cd   :  { %v11747_v45 = vpop.f32.mrb[112].mxu0 }
 0x7ce   :  { %4931 = vmatpush1.bf16.msra.mxu1 %v9710_v30  ;;  %v9719_v30 = vld [vmem:[#allocation7 + $0x1a0] ss:$8 sps:$4 sm:$0xff]  }
 0x7cf   :  { %5328 = vmatprep.subr.bf16.mxu1 %v9715_v40  ;;  %v9724_v40 = vld [vmem:[#allocation7 + $0x1b4] ss:$8 sps:$4 sm:$0xff]  }
 0x7d1   :  { %4609 = vmatmul.mubr.bf16.gmra.mrb[80].mxu1 %v11556_v38  ;;  %v5229_v38 = vpack.c.bf16 %v11741_v16, %v11734_v36 }
 0x7d2   :  { %4618 = vmatprep.mubr.bf16.mxu1 %v10142_v57 }
 0x7d9   :  { %4619 = vmatmul.mubr.bf16.gmra.mrb[84].mxu1 %v11563_v4  ;;  %v11750_v4 = vpop.f32.mrb[113].mxu0 }
 0x7da   :  { %4628 = vmatprep.mubr.bf16.mxu1 %v10142_v57  ;;  %v11753_v49 = vpop.f32.mrb[114].mxu0 }
 0x7db   :  { %v5636_v24 = vpack.c.bf16 %v11753_v49, %v11747_v45  ;;  %v11757_v41 = vpop.f32.mrb[115].mxu0 }
 0x7dc   :  { %v11765_v19 = vpop.f32.mrb[116].mxu0 }
 0x7dd   :  { %v11770_v15 = vpop.f32.mrb[117].mxu0 }
 0x7de   :  { %v11773_v17 = vpop.f32.mrb[118].mxu0 }
 0x7df   :  { %v12159_v43 = vpack.c.bf16 %v11773_v17, %v11765_v19  ;;  %v5885_v19 = vld [vmem:[#allocation9] sm:$0x3] }
 0x7e0   :  { %v11898_v52 = vrot.slane %v5885_v19, %v12161_v7 }
 0x7e1   :  { %4629 = vmatmul.mubr.bf16.gmra.mrb[88].mxu1 %v11570_v29  ;;  %v5635_v29 = vpack.c.bf16 %v11757_v41, %v11750_v4 }
 0x7e2   :  { %4638 = vmatprep.mubr.bf16.mxu1 %v10142_v57 }
 0x7e9   :  { %4639 = vmatmul.mubr.bf16.gmra.mrb[92].mxu1 %v11577_v42  ;;  %v9716_v42 = vld [vmem:[#allocation7 + $0x190] ss:$8 sps:$4 sm:$0xff]  }
 0x7ea   :  { %4948 = vmatprep.mubr.bf16.mxu1 %v10142_v57 }
 0x7f1   :  { %4949 = vmatmul.mubr.bf16.vlgmr.msra.gmra.mrb[64].mxu1 %v4811_v54  ;;  %v9727_v54 = vld [vmem:[#allocation7 + $0x1c4] ss:$8 sps:$4 sm:$0xff]  }
 0x7f2   :  { %4958 = vmatprep.mubr.bf16.mxu1 %v10142_v57  ;;  %5329 = vmatpush1.bf16.msra.mxu1 %v9713_v47 }
 0x7f3   :  { %5330 = vmatprep.subr.bf16.mxu1 %v9718_v14  ;;  %v11777_v14 = vpop.f32.mrb[119].mxu0 }
 0x7f4   :  { %v11785_v47 = vpop.f32.mrb[120].mxu0 }
 0x7f6   :  { %5331 = vmatpush1.bf16.msra.mxu1 %v9716_v42  ;;  %v5637_v42 = vpack.c.bf16 %v11777_v14, %v11770_v15  ;;  %v9761_v15 = vld [vmem:[%s12137_s9] sm:$0xff]  }
 0x7f7   :  { %5332 = vmatprep.subr.bf16.mxu1 %v9721_v59  ;;  %v9733_v59 = vld [vmem:[#allocation7 + $0x1e4] ss:$8 sps:$4 sm:$0xff]   ;;  %8598 = vmatprep.mubr.bf16.mxu0 %v9761_v15 }
 0x7f9   :  { %4959 = vmatmul.mubr.bf16.gmra.mrb[68].mxu1 %v4812_v28  ;;  %v9728_v28 = vld [vmem:[#allocation7 + $0x1d0] ss:$8 sps:$4 sm:$0xff]  }
 0x7fa   :  { %4968 = vmatprep.mubr.bf16.mxu1 %v10142_v57  ;;  %5333 = vmatpush1.bf16.msra.mxu1 %v9719_v30  ;;  %v9731_v30 = vld [vmem:[#allocation7 + $0x1e0] ss:$8 sps:$4 sm:$0xff]  }
 0x7fb   :  { %5334 = vmatprep.subr.bf16.mxu1 %v9724_v40  ;;  %v9736_v40 = vld [vmem:[#allocation7 + $0x1f4] ss:$8 sps:$4 sm:$0xff]  }
 0x7fe   :  { %5335 = vmatpush1.bf16.msra.mxu1 %v9722_v10  ;;  %v11790_v10 = vpop.f32.mrb[121].mxu0 }
 0x7ff   :  { %5336 = vmatprep.subr.bf16.mxu1 %v9727_v54  ;;  %v11793_v21 = vpop.f32.mrb[122].mxu0 }
 0x800   :  { %v5640_v54 = vpack.c.bf16 %v11793_v21, %v11785_v47 }
 0x801   :  { %4969 = vmatmul.mubr.bf16.gmra.mrb[72].mxu1 %v4813_v5  ;;  %v9739_v5 = vld [vmem:[#allocation7 + $0x204] ss:$8 sps:$4 sm:$0xff]  }
 0x802   :  { %4978 = vmatprep.mubr.bf16.mxu1 %v10142_v57  ;;  %5337 = vmatpush1.bf16.msra.mxu1 %v9725_v48  ;;  %v11797_v48 = vpop.f32.mrb[123].mxu0 }
 0x803   :  { %5338 = vmatprep.subr.bf16.mxu1 %v9730_v55  ;;  %v5639_v55 = vpack.c.bf16 %v11797_v48, %v11790_v10  ;;  %v11805_v34 = vpop.f32.mrb[124].mxu0 }
 0x804   :  { %v11810_v56 = vpop.f32.mrb[125].mxu0 }
 0x806   :  { %5339 = vmatpush1.bf16.msra.mxu1 %v9728_v28 }
 0x807   :  { %5340 = vmatprep.subr.bf16.mxu1 %v9733_v59 }
 0x809   :  { %4979 = vmatmul.mubr.bf16.gmra.mrb[76].mxu1 %v4814_v12  ;;  %v11813_v12 = vpop.f32.mrb[126].mxu0 }
 0x80a   :  { %4988 = vmatprep.mubr.bf16.mxu1 %v10142_v57  ;;  %5341 = vmatpush1.bf16.msra.mxu1 %v9731_v30  ;;  %v5642_v28 = vpack.c.bf16 %v11813_v12, %v11805_v34  ;;  %v11817_v59 = vpop.f32.mrb[127].mxu0 }
 0x80b   :  { %5342 = vmatprep.subr.bf16.mxu1 %v9736_v40  ;;  %v5641_v11 = vpack.c.bf16 %v11817_v59, %v11810_v56 }
 0x80e   :  { %5343 = vmatpush1.bf16.msra.mxu1 %v9734_v20 }
 0x80f   :  { %5740 = vmatprep.subr.bf16.mxu1 %v9739_v5 }
 0x811   :  { %4989 = vmatmul.mubr.bf16.gmra.mrb[80].mxu1 %v4815_v25  ;;  %v9743_v25 = vld [vmem:[#allocation7 + $0x220] ss:$8 sps:$4 sm:$0xff]  }
 0x812   :  { %4998 = vmatprep.mubr.bf16.mxu1 %v10142_v57 }
 0x819   :  { %4999 = vmatmul.mubr.bf16.gmra.mrb[84].mxu1 %v4816_v31  ;;  %v9740_v31 = vld [vmem:[#allocation7 + $0x210] ss:$8 sps:$4 sm:$0xff]  }
 0x81a   :  { %5008 = vmatprep.mubr.bf16.mxu1 %v10142_v57 }
 0x821   :  { %5009 = vmatmul.mubr.bf16.gmra.mrb[88].mxu1 %v4817_v33  ;;  %v9752_v33 = vld [vmem:[#allocation7 + $0x250] ss:$8 sps:$4 sm:$0xff]  }
 0x822   :  { %5018 = vmatprep.mubr.bf16.mxu1 %v10142_v57 }
 0x829   :  { %5019 = vmatmul.mubr.bf16.gmra.mrb[92].mxu1 %v4818_v8  ;;  %v9749_v8 = vld [vmem:[#allocation7 + $0x240] ss:$8 sps:$4 sm:$0xff]  }
 0x82a   :  { %5360 = vmatprep.mubr.bf16.mxu1 %v10142_v57 }
 0x831   :  { %5361 = vmatmul.mubr.bf16.vlgmr.msra.gmra.mrb[64].mxu1 %v5223_v58  ;;  %v12160_v58 = vsub.s32 0, %v11313_v51 }
 0x832   :  { %5370 = vmatprep.mubr.bf16.mxu1 %v10142_v57  ;;  %5741 = vmatpush1.bf16.msra.mxu1 %v9737_v3 }
 0x833   :  { %5742 = vmatprep.subr.bf16.mxu1 %v9742_v53  ;;  %v11894_v27 = vrot.slane %v5885_v19, %v12160_v58 }
 0x836   :  { %5743 = vmatpush1.bf16.msra.mxu1 %v9740_v31 }
 0x837   :  { %5744 = vmatprep.subr.bf16.mxu1 %v9745_v23 }
 0x839   :  { %5371 = vmatmul.mubr.bf16.gmra.mrb[68].mxu1 %v5224_v13  ;;  %v9758_v13 = vld [vmem:[#allocation7 + $0x270] ss:$8 sps:$4 sm:$0xff]  }
 0x83a   :  { %5380 = vmatprep.mubr.bf16.mxu1 %v10142_v57  ;;  %5745 = vmatpush1.bf16.msra.mxu1 %v9743_v25 }
 0x83b   :  { %5746 = vmatprep.subr.bf16.mxu1 %v9748_v0 }
 0x83e   :  { %5747 = vmatpush1.bf16.msra.mxu1 %v9746_v1 }
 0x83f   :  { %5748 = vmatprep.subr.bf16.mxu1 %v9751_v6 }
 0x841   :  { %5381 = vmatmul.mubr.bf16.gmra.mrb[72].mxu1 %v5225_v39 }
 0x842   :  { %5390 = vmatprep.mubr.bf16.mxu1 %v10142_v57  ;;  %5749 = vmatpush1.bf16.msra.mxu1 %v9749_v8 }
 0x843   :  { %5750 = vmatprep.subr.bf16.mxu1 %v9754_v62 }
 0x846   :  { %5751 = vmatpush1.bf16.msra.mxu1 %v9752_v33 }
 0x847   :  { %5752 = vmatprep.subr.bf16.mxu1 %v9757_v9 }
 0x849   :  { %5391 = vmatmul.mubr.bf16.gmra.mrb[76].mxu1 %v5226_v46 }
 0x84a   :  { %5400 = vmatprep.mubr.bf16.mxu1 %v10142_v57  ;;  %5753 = vmatpush1.bf16.msra.mxu1 %v9755_v61 }
 0x84b   :  { %5754 = vmatprep.subr.bf16.mxu1 %v9760_v2 }
 0x84e   :  { %5755 = vmatpush1.bf16.msra.mxu1 %v9758_v13 }
 0x851   :  { %5401 = vmatmul.mubr.bf16.gmra.mrb[80].mxu1 %v5227_v50 }
 0x852   :  { %5410 = vmatprep.mubr.bf16.mxu1 %v10142_v57 }
 0x859   :  { %5411 = vmatmul.mubr.bf16.gmra.mrb[84].mxu1 %v5228_v44 }
 0x85a   :  { %5420 = vmatprep.mubr.bf16.mxu1 %v10142_v57 }
 0x861   :  { %5421 = vmatmul.mubr.bf16.gmra.mrb[88].mxu1 %v5229_v38 }
 0x862   :  { %5430 = vmatprep.mubr.bf16.mxu1 %v10142_v57 }
 0x869   :  { %5431 = vmatmul.mubr.bf16.gmra.mrb[92].mxu1 %v5230_v26 }
 0x86a   :  { %5772 = vmatprep.mubr.bf16.mxu1 %v10142_v57 }
 0x871   :  { %5773 = vmatmul.mubr.bf16.vlgmr.msra.gmra.mrb[64].mxu1 %v5635_v29 }
 0x872   :  { %5782 = vmatprep.mubr.bf16.mxu1 %v10142_v57 }
 0x879   :  { %5783 = vmatmul.mubr.bf16.gmra.mrb[68].mxu1 %v5636_v24 }
 0x87a   :  { %5792 = vmatprep.mubr.bf16.mxu1 %v10142_v57 }
 0x881   :  { %5793 = vmatmul.mubr.bf16.gmra.mrb[72].mxu1 %v5637_v42 }
 0x882   :  { %5802 = vmatprep.mubr.bf16.mxu1 %v10142_v57 }
 0x889   :  { %5803 = vmatmul.mubr.bf16.gmra.mrb[76].mxu1 %v12159_v43 }
 0x88a   :  { %5812 = vmatprep.mubr.bf16.mxu1 %v10142_v57 }
 0x891   :  { %5813 = vmatmul.mubr.bf16.gmra.mrb[80].mxu1 %v5639_v55 }
 0x892   :  { %5822 = vmatprep.mubr.bf16.mxu1 %v10142_v57 }
 0x899   :  { %5823 = vmatmul.mubr.bf16.gmra.mrb[84].mxu1 %v5640_v54 }
 0x89a   :  { %5832 = vmatprep.mubr.bf16.mxu1 %v10142_v57 }
 0x8a1   :  { %5833 = vmatmul.mubr.bf16.gmra.mrb[88].mxu1 %v5641_v11 }
 0x8a2   :  { %5842 = vmatprep.mubr.bf16.mxu1 %v10142_v57 }
 0x8a9   :  { %5843 = vmatmul.mubr.bf16.gmra.mrb[92].mxu1 %v5642_v28 }
 0x944   :  { %v5774_v46 = vpop.f32.mrb[64].mxu1 }
 0x945   :  { %v5897_v57 = vadd.f32 %v11894_v27, %v5774_v46  ;;  %v5776_v18 = vpop.f32.mrb[65].mxu1 }
 0x946   :  { %v5898_v39 = vadd.f32 %v11898_v52, %v5776_v18  ;;  %v5778_v37 = vpop.f32.mrb[66].mxu1 }
 0x947   :  { %v5929_v60 = vmax.f32 %v5897_v57, 0.0  ;;  %v5899_v35 = vadd.f32 %v11894_v27, %v5778_v37  ;;  %v5780_v44 = vpop.f32.mrb[67].mxu1 }
 0x948   :  { %v5930_v32 = vmax.f32 %v5898_v39, 0.0  ;;  %v5900_v50 = vadd.f32 %v11898_v52, %v5780_v44 }
 0x949   :  { %v5931_v63 = vmax.f32 %v5899_v35, 0.0 }
 0x94a   :  { %v5961_v36 = vmax.f32 %v5929_v60, %v5930_v32  ;;  %v5932_v22 = vmax.f32 %v5900_v50, 0.0 }
 0x94c   :  { %v5962_v51 = vmax.f32 %v5931_v63, %v5932_v22  ;;  %v5784_v26 = vpop.f32.mrb[68].mxu1 }
 0x94d   :  { %v5901_v16 = vadd.f32 %v11894_v27, %v5784_v26  ;;  %v5786_v38 = vpop.f32.mrb[69].mxu1 }
 0x94e   :  { %v11905_v45 = vpack.c.bf16 %v5962_v51, %v5961_v36  ;;  %v5902_v4 = vadd.f32 %v11898_v52, %v5786_v38  ;;  %v5788_v49 = vpop.f32.mrb[70].mxu1 }
 0x94f   :  { %v5933_v24 = vmax.f32 %v5901_v16, 0.0  ;;  %v5903_v41 = vadd.f32 %v11894_v27, %v5788_v49  ;;  %v5790_v29 = vpop.f32.mrb[71].mxu1 }
 0x950   :  { %v5934_v17 = vmax.f32 %v5902_v4, 0.0  ;;  %v5904_v47 = vadd.f32 %v11898_v52, %v5790_v29  ;;  %8582 = vmatprep.subr.bf16.mxu0 %v11905_v45 }
 0x951   :  { %v5935_v14 = vmax.f32 %v5903_v41, 0.0  ;;  %8583 = vmatpush3.bf16.msra.mxu0 %v11905_v45 }
 0x952   :  { %v5963_v42 = vmax.f32 %v5933_v24, %v5934_v17  ;;  %v5936_v30 = vmax.f32 %v5904_v47, 0.0 }
 0x954   :  { %v5964_v40 = vmax.f32 %v5935_v14, %v5936_v30  ;;  %v5794_v10 = vpop.f32.mrb[72].mxu1 }
 0x955   :  { %v5905_v20 = vadd.f32 %v11894_v27, %v5794_v10  ;;  %v5796_v21 = vpop.f32.mrb[73].mxu1 }
 0x956   :  { %v11913_v5 = vpack.c.bf16 %v5964_v40, %v5963_v42  ;;  %v5906_v54 = vadd.f32 %v11898_v52, %v5796_v21  ;;  %v5798_v48 = vpop.f32.mrb[74].mxu1 }
 0x957   :  { %v5937_v55 = vmax.f32 %v5905_v20, 0.0  ;;  %v5907_v34 = vadd.f32 %v11894_v27, %v5798_v48  ;;  %v5800_v56 = vpop.f32.mrb[75].mxu1 }
 0x958   :  { %v5938_v12 = vmax.f32 %v5906_v54, 0.0  ;;  %v5908_v28 = vadd.f32 %v11898_v52, %v5800_v56  ;;  %8584 = vmatprep.subr.bf16.mxu0 %v11913_v5 }
 0x959   :  { %v5939_v59 = vmax.f32 %v5907_v34, 0.0  ;;  %8585 = vmatpush3.bf16.msra.mxu0 %v11913_v5 }
 0x95a   :  { %v5965_v11 = vmax.f32 %v5937_v55, %v5938_v12  ;;  %v5940_v3 = vmax.f32 %v5908_v28, 0.0 }
 0x95c   :  { %v5966_v53 = vmax.f32 %v5939_v59, %v5940_v3  ;;  %v5804_v31 = vpop.f32.mrb[76].mxu1 }
 0x95d   :  { %v5909_v23 = vadd.f32 %v11894_v27, %v5804_v31  ;;  %v5806_v25 = vpop.f32.mrb[77].mxu1 }
 0x95e   :  { %v11921_v0 = vpack.c.bf16 %v5966_v53, %v5965_v11  ;;  %v5910_v1 = vadd.f32 %v11898_v52, %v5806_v25  ;;  %v5808_v6 = vpop.f32.mrb[78].mxu1 }
 0x95f   :  { %v5941_v8 = vmax.f32 %v5909_v23, 0.0  ;;  %v5911_v62 = vadd.f32 %v11894_v27, %v5808_v6  ;;  %v5810_v33 = vpop.f32.mrb[79].mxu1 }
 0x960   :  { %v5942_v9 = vmax.f32 %v5910_v1, 0.0  ;;  %v5912_v61 = vadd.f32 %v11898_v52, %v5810_v33  ;;  %8586 = vmatprep.subr.bf16.mxu0 %v11921_v0 }
 0x961   :  { %v5943_v2 = vmax.f32 %v5911_v62, 0.0  ;;  %8587 = vmatpush3.bf16.msra.mxu0 %v11921_v0 }
 0x962   :  { %v5967_v13 = vmax.f32 %v5941_v8, %v5942_v9  ;;  %v5944_v43 = vmax.f32 %v5912_v61, 0.0 }
 0x964   :  { %v5968_v15 = vmax.f32 %v5943_v2, %v5944_v43  ;;  %v5814_v19 = vpop.f32.mrb[80].mxu1 }
 0x965   :  { %v5913_v58 = vadd.f32 %v11894_v27, %v5814_v19  ;;  %v5816_v7 = vpop.f32.mrb[81].mxu1 }
 0x966   :  { %v11929_v46 = vpack.c.bf16 %v5968_v15, %v5967_v13  ;;  %v5914_v57 = vadd.f32 %v11898_v52, %v5816_v7  ;;  %v5818_v18 = vpop.f32.mrb[82].mxu1  ;;  %v9762_v7 = vld [vmem:[%s12137_s9 + $0x8] sm:$0xff]  }
 0x967   :  { %v5945_v39 = vmax.f32 %v5913_v58, 0.0  ;;  %v5915_v37 = vadd.f32 %v11894_v27, %v5818_v18  ;;  %v5820_v60 = vpop.f32.mrb[83].mxu1  ;;  %v10143_v18 = vmov 0.0  }
 0x968   :  { %v5946_v35 = vmax.f32 %v5914_v57, 0.0  ;;  %v5916_v44 = vadd.f32 %v11898_v52, %v5820_v60  ;;  %8588 = vmatprep.subr.bf16.mxu0 %v11929_v46  ;;  %v9765_v57 = vld [vmem:[#allocation12] sm:$0xff]   ;;  %8738 = vmatprep.subr.bf16.mxu1 %v10143_v18 }
 0x969   :  { %v5947_v32 = vmax.f32 %v5915_v37, 0.0  ;;  %8589 = vmatpush3.bf16.msra.mxu0 %v11929_v46  ;;  %8754 = vmatprep.mubr.msk.bf16.mxu1 %vm10144_vm0, %v10143_v18 }
 0x96a   :  { %v5969_v50 = vmax.f32 %v5945_v39, %v5946_v35  ;;  %v5948_v63 = vmax.f32 %v5916_v44, 0.0 }
 0x96c   :  { %v5970_v36 = vmax.f32 %v5947_v32, %v5948_v63  ;;  %v5824_v22 = vpop.f32.mrb[84].mxu1 }
 0x96d   :  { %v5917_v51 = vadd.f32 %v11894_v27, %v5824_v22  ;;  %v5826_v26 = vpop.f32.mrb[85].mxu1 }
 0x96e   :  { %v11937_v16 = vpack.c.bf16 %v5970_v36, %v5969_v50  ;;  %v5918_v38 = vadd.f32 %v11898_v52, %v5826_v26  ;;  %v5828_v4 = vpop.f32.mrb[86].mxu1 }
 0x96f   :  { %v5949_v49 = vmax.f32 %v5917_v51, 0.0  ;;  %v5919_v24 = vadd.f32 %v11894_v27, %v5828_v4  ;;  %v5830_v41 = vpop.f32.mrb[87].mxu1 }
 0x970   :  { %v5950_v29 = vmax.f32 %v5918_v38, 0.0  ;;  %v5920_v17 = vadd.f32 %v11898_v52, %v5830_v41  ;;  %8590 = vmatprep.subr.bf16.mxu0 %v11937_v16 }
 0x971   :  { %v5951_v47 = vmax.f32 %v5919_v24, 0.0  ;;  %8591 = vmatpush3.bf16.msra.mxu0 %v11937_v16 }
 0x972   :  { %v5971_v14 = vmax.f32 %v5949_v49, %v5950_v29  ;;  %v5952_v42 = vmax.f32 %v5920_v17, 0.0 }
 0x974   :  { %v5972_v30 = vmax.f32 %v5951_v47, %v5952_v42  ;;  %v5834_v40 = vpop.f32.mrb[88].mxu1 }
 0x975   :  { %v5921_v10 = vadd.f32 %v11894_v27, %v5834_v40  ;;  %v5836_v20 = vpop.f32.mrb[89].mxu1 }
 0x976   :  { %v5982_v21 = vpack.c.bf16 %v5972_v30, %v5971_v14  ;;  %v5922_v54 = vadd.f32 %v11898_v52, %v5836_v20  ;;  %v5838_v48 = vpop.f32.mrb[90].mxu1 }
 0x977   :  { %v5953_v55 = vmax.f32 %v5921_v10, 0.0  ;;  %v5923_v34 = vadd.f32 %v11894_v27, %v5838_v48  ;;  %v5840_v56 = vpop.f32.mrb[91].mxu1  ;;  %v9769_v48 = vld [vmem:[#allocation13 + $0x40] sm:$0xff]  }
 0x978   :  { %v5954_v12 = vmax.f32 %v5922_v54, 0.0  ;;  %v5924_v28 = vadd.f32 %v11898_v52, %v5840_v56  ;;  %8592 = vmatprep.subr.bf16.mxu0 %v5982_v21  ;;  %v7635_v54 = vld [vmem:[%s12141_s13 + $0x4] sm:$0xf]  ;;  %v9772_v56 = vld [vmem:[#allocation13 + $0x58] sm:$0xff]  }
 0x979   :  { %v5955_v59 = vmax.f32 %v5923_v34, 0.0  ;;  %8593 = vmatpush3.bf16.msra.mxu0 %v5982_v21  ;;  %v9771_v34 = vld [vmem:[#allocation13 + $0x50] sm:$0xff]  }
 0x97a   :  { %v5973_v11 = vmax.f32 %v5953_v55, %v5954_v12  ;;  %v5956_v3 = vmax.f32 %v5924_v28, 0.0  ;;  %v9770_v55 = vld [vmem:[#allocation13 + $0x48] sm:$0xff]   ;;  %v9773_v12 = vld [vmem:[#allocation13 + $0x60] sm:$0xff]  }
 0x97b   :  { %v9774_v28 = vld [vmem:[#allocation13 + $0x68] sm:$0xff]  }
 0x97c   :  { %v5974_v53 = vmax.f32 %v5955_v59, %v5956_v3  ;;  %v5844_v31 = vpop.f32.mrb[92].mxu1  ;;  %v9775_v59 = vld [vmem:[#allocation13 + $0x70] sm:$0xff]  }
 0x97d   :  { %v5925_v23 = vadd.f32 %v11894_v27, %v5844_v31  ;;  %v5846_v25 = vpop.f32.mrb[93].mxu1 }
 0x97e   :  { %v5983_v1 = vpack.c.bf16 %v5974_v53, %v5973_v11  ;;  %v5926_v6 = vadd.f32 %v11898_v52, %v5846_v25  ;;  %v5848_v8 = vpop.f32.mrb[94].mxu1  ;;  %v9776_v11 = vld [vmem:[#allocation13 + $0x78] sm:$0xff]  }
 0x97f   :  { %v5957_v62 = vmax.f32 %v5925_v23, 0.0  ;;  %v5927_v33 = vadd.f32 %v11894_v27, %v5848_v8  ;;  %v5850_v9 = vpop.f32.mrb[95].mxu1  ;;  %v9763_v27 = vld [vmem:[%s12137_s9 + $0x10] sm:$0xff]  }
 0x980   :  { %v5958_v61 = vmax.f32 %v5926_v6, 0.0  ;;  %v5928_v2 = vadd.f32 %v11898_v52, %v5850_v9  ;;  %8594 = vmatprep.subr.bf16.mxu0 %v5983_v1  ;;  %v9764_v52 = vld [vmem:[%s12137_s9 + $0x18] sm:$0xff]   ;;  %v9778_v9 = vld [vmem:[#allocation13 + $0x8] sm:$0xff]  }
 0x981   :  { %v5959_v13 = vmax.f32 %v5927_v33, 0.0  ;;  %8595 = vmatpush3.bf16.msra.mxu0 %v5983_v1 }
 0x982   :  { %v5975_v43 = vmax.f32 %v5957_v62, %v5958_v61  ;;  %v5960_v15 = vmax.f32 %v5928_v2, 0.0  ;;  %v9779_v61 = vld [vmem:[#allocation13 + $0x10] sm:$0xff]   ;;  %v9780_v2 = vld [vmem:[#allocation13 + $0x18] sm:$0xff]  }
 0x984   :  { %v5976_v19 = vmax.f32 %v5959_v13, %v5960_v15  ;;  %v9781_v13 = vld [vmem:[#allocation13 + $0x20] sm:$0xff]   ;;  %v9783_v15 = vld [vmem:[#allocation13 + $0x30] sm:$0xff]  }
 0x986   :  { %v5984_v58 = vpack.c.bf16 %v5976_v19, %v5975_v43  ;;  %v9782_v43 = vld [vmem:[#allocation13 + $0x28] sm:$0xff]   ;;  %v9784_v19 = vld [vmem:[#allocation13 + $0x38] sm:$0xff]  }
 0x988   :  { %8596 = vmatprep.subr.bf16.mxu0 %v5984_v58 }
 0x989   :  { %8597 = vmatpush3.bf16.msra.mxu0 %v5984_v58 }
 0x98a   :  { %8606 = vmatprep.subr.bf16.mxu0 %v11905_v45 }
 0x98c   :  { %8599 = vmatmul.mubr.bf16.vlgmr.msra.gmra.mrb[128].mxu0 %v9762_v7  ;;  %v7653_v7 = vld [vmem:[%s12141_s13 + $0x8] sm:$0xf] }
 0x98d   :  { %8607 = vmatpush3.bf16.msra.mxu0 %v11905_v45  ;;  %8602 = vmatprep.mubr.bf16.mxu0 %v9763_v27  ;;  %v9766_v45 = vld [vmem:[#allocation12 + $0x8] sm:$0xff]   ;;  %v9785_v27 = vld [vmem:[#allocation13 + $0x80] sm:$0xff]  }
 0x98e   :  { %8608 = vmatprep.subr.bf16.mxu0 %v11913_v5 }
 0x991   :  { %8609 = vmatpush3.bf16.msra.mxu0 %v11913_v5  ;;  %v9767_v5 = vld [vmem:[#allocation12 + $0x10] sm:$0xff]  }
 0x992   :  { %8610 = vmatprep.subr.bf16.mxu0 %v11921_v0 }
 0x994   :  { %8603 = vmatmul.mubr.bf16.gmra.mrb[132].mxu0 %v9764_v52  ;;  %v9786_v52 = vld [vmem:[#allocation13 + $0x88] sm:$0xff]  }
 0x995   :  { %8611 = vmatpush3.bf16.msra.mxu0 %v11921_v0  ;;  %8622 = vmatprep.mubr.bf16.mxu0 %v9765_v57  ;;  %v9768_v0 = vld [vmem:[#allocation12 + $0x18] sm:$0xff]   ;;  %v9787_v57 = vld [vmem:[#allocation13 + $0x90] sm:$0xff]  }
 0x996   :  { %8612 = vmatprep.subr.bf16.mxu0 %v11929_v46 }
 0x999   :  { %8613 = vmatpush3.bf16.msra.mxu0 %v11929_v46 }
 0x99a   :  { %8614 = vmatprep.subr.bf16.mxu0 %v11937_v16 }
 0x99d   :  { %8615 = vmatpush3.bf16.msra.mxu0 %v11937_v16 }
 0x99e   :  { %8616 = vmatprep.subr.bf16.mxu0 %v5982_v21 }
 0x9a1   :  { %8617 = vmatpush3.bf16.msra.mxu0 %v5982_v21  ;;  %v6191_v21 = vld [vmem:[%s12141_s13] sm:$0xf] }
 0x9a2   :  { %8618 = vmatprep.subr.bf16.mxu0 %v5983_v1 }
 0x9a5   :  { %8619 = vmatpush3.bf16.msra.mxu0 %v5983_v1  ;;  %v9777_v1 = vld [vmem:[#allocation13] sm:$0xff]  }
 0x9a6   :  { %8620 = vmatprep.subr.bf16.mxu0 %v5984_v58 }
 0x9a9   :  { %8621 = vmatpush3.bf16.msra.mxu0 %v5984_v58 }
 0x9aa   :  { %8630 = vmatprep.subr.bf16.mxu0 %v10143_v18 }
 0x9ac   :  { %8623 = vmatmul.mubr.bf16.vlgmr.msra.gmra.mrb[136].mxu0 %v9766_v45  ;;  %v9788_v45 = vld [vmem:[#allocation13 + $0x98] sm:$0xff]  }
 0x9ad   :  { %8626 = vmatprep.mubr.bf16.mxu0 %v9767_v5  ;;  %v9789_v5 = vld [vmem:[#allocation13 + $0xa0] sm:$0xff]  }
 0x9b4   :  { %8627 = vmatmul.mubr.bf16.gmra.mrb[140].mxu0 %v9768_v0  ;;  %v9790_v0 = vld [vmem:[#allocation13 + $0xa8] sm:$0xff]  }
 0x9b5   :  { %8638 = vmatprep.mubr.msk.bf16.mxu0 %vm10144_vm0, %v10143_v18 }
 0xa5f   :  { %v8600_v46 = vpop.f32.mrb[128].mxu0 }
 0xa60   :  { %v6051_v39 = vpop.f32.mrb[129].mxu0 }
 0xa61   :  { %v8601_v37 = vpop.f32.mrb[130].mxu0 }
 0xa62   :  { %v6083_v60 = vpack.c.bf16 %v8601_v37, %v8600_v46  ;;  %v6054_v35 = vpop.f32.mrb[131].mxu0  ;;  %v9791_v46 = vld [vmem:[#allocation13 + $0xb0] sm:$0xff]   ;;  %v9793_v37 = vld [vmem:[#allocation13 + $0xc0] sm:$0xff]  }
 0xa63   :  { %v6082_v44 = vpack.c.bf16 %v6054_v35, %v6051_v39  ;;  %v9792_v39 = vld [vmem:[#allocation13 + $0xb8] sm:$0xff]   ;;  %8739 = vmatpush3.bf16.msra.mxu1 %v9793_v37  ;;  %v9795_v35 = vld [vmem:[#allocation13 + $0xd0] sm:$0xff]  }
 0xa64   :  { %8740 = vmatprep.subr.bf16.mxu1 %v10143_v18 }
 0xa67   :  { %v8604_v32 = vpop.f32.mrb[132].mxu0 }
 0xa68   :  { %v6067_v50 = vpop.f32.mrb[133].mxu0 }
 0xa69   :  { %v8605_v63 = vpop.f32.mrb[134].mxu0 }
 0xa6a   :  { %v6085_v36 = vpack.c.bf16 %v8605_v63, %v8604_v32  ;;  %v6070_v22 = vpop.f32.mrb[135].mxu0 }
 0xa6b   :  { %v6084_v51 = vpack.c.bf16 %v6070_v22, %v6067_v50 }
 0xa7f   :  { %v8624_v26 = vpop.f32.mrb[136].mxu0 }
 0xa80   :  { %v6152_v16 = vpop.f32.mrb[137].mxu0 }
 0xa81   :  { %v8625_v38 = vpop.f32.mrb[138].mxu0 }
 0xa82   :  { %v6184_v4 = vpack.c.bf16 %v8625_v38, %v8624_v26  ;;  %v6155_v49 = vpop.f32.mrb[139].mxu0 }
 0xa83   :  { %v6183_v24 = vpack.c.bf16 %v6155_v49, %v6152_v16 }
 0xa84   :  { %v11977_v41 = vmax.bf16 %v6184_v4, %v6083_v60  ;;  %v9794_v60 = vld [vmem:[#allocation13 + $0xc8] sm:$0xff]  }
 0xa85   :  { %v11979_v29 = vmax.bf16 %v6183_v24, %v6082_v44  ;;  %8741 = vmatpush3.bf16.msra.mxu1 %v9794_v60  ;;  %v9796_v44 = vld [vmem:[#allocation13 + $0xd8] sm:$0xff]  }
 0xa86   :  { %8742 = vmatprep.subr.bf16.mxu1 %v10143_v18 }
 0xa87   :  { %v8628_v17 = vpop.f32.mrb[140].mxu0  ;;  %8631 = vmatpush3.bf16.msra.mxu0 %v11979_v29 }
 0xa88   :  { %v6168_v47 = vpop.f32.mrb[141].mxu0  ;;  %8632 = vmatprep.subr.bf16.mxu0 %v10143_v18 }
 0xa89   :  { %v8629_v14 = vpop.f32.mrb[142].mxu0  ;;  %8743 = vmatpush3.bf16.msra.mxu1 %v9795_v35 }
 0xa8a   :  { %v6186_v42 = vpack.c.bf16 %v8629_v14, %v8628_v17  ;;  %v6171_v30 = vpop.f32.mrb[143].mxu0  ;;  %8744 = vmatprep.subr.bf16.mxu1 %v10143_v18  ;;  %v7663_v14 = vld [vmem:[%s12141_s13 + $0xc] sm:$0xf] }
 0xa8b   :  { %v6185_v40 = vpack.c.bf16 %v6171_v30, %v6168_v47  ;;  %8633 = vmatpush3.bf16.msra.mxu0 %v11977_v41  ;;  %v9799_v30 = vld [vmem:[#allocation13 + $0xf0] sm:$0xff]  }
 0xa8c   :  { %v11984_v10 = vmax.bf16 %v6186_v42, %v6085_v36  ;;  %8634 = vmatprep.subr.bf16.mxu0 %v10143_v18  ;;  %v7673_v42 = vld [vmem:[%s12141_s13 + $0x10] sm:$0xf] }
 0xa8d   :  { %v11987_v20 = vmax.bf16 %v6185_v40, %v6084_v51  ;;  %8745 = vmatpush3.bf16.msra.mxu1 %v9796_v44  ;;  %v9800_v40 = vld [vmem:[#allocation13 + $0xf8] sm:$0xff]  }
 0xa8e   :  { %8746 = vmatprep.subr.bf16.mxu1 %v10143_v18 }
 0xa8f   :  { %8635 = vmatpush3.bf16.msra.mxu0 %v11987_v20 }
 0xa90   :  { %8636 = vmatprep.subr.bf16.mxu0 %v10143_v18 }
 0xa93   :  { %8637 = vmatpush3.bf16.msra.mxu0 %v11984_v10 }
 0xa94   :  { %8642 = vmatprep.subr.bf16.mxu0 %v10143_v18 }
 0xa96   :  { %8639 = vmatmul.mubr.msk.bf16.vlgmr.msra.gmra.mrb[144].mxu0 %vm6192_vm1, %v6191_v21 }
 0xa97   :  { %8643 = vmatpush3.bf16.msra.mxu0 %v11979_v29  ;;  %8650 = vmatprep.mubr.msk.bf16.mxu0 %vm10144_vm0, %v10143_v18 }
 0xa98   :  { %8644 = vmatprep.subr.bf16.mxu0 %v10143_v18 }
 0xa9b   :  { %8645 = vmatpush3.bf16.msra.mxu0 %v11977_v41 }
 0xa9c   :  { %8646 = vmatprep.subr.bf16.mxu0 %v10143_v18 }
 0xa9f   :  { %8647 = vmatpush3.bf16.msra.mxu0 %v11987_v20 }
 0xaa0   :  { %8648 = vmatprep.subr.bf16.mxu0 %v10143_v18 }
 0xaa3   :  { %8649 = vmatpush3.bf16.msra.mxu0 %v11984_v10 }
 0xaa4   :  { %8654 = vmatprep.subr.bf16.mxu0 %v10143_v18 }
 0xaa6   :  { %8651 = vmatmul.mubr.msk.bf16.vlgmr.msra.gmra.mrb[148].mxu0 %vm6192_vm1, %v7635_v54 }
 0xaa7   :  { %8655 = vmatpush3.bf16.msra.mxu0 %v9769_v48  ;;  %8670 = vmatprep.mubr.msk.bf16.mxu0 %vm10144_vm0, %v10143_v18 }
 0xaa8   :  { %8656 = vmatprep.subr.bf16.mxu0 %v10143_v18 }
 0xaab   :  { %8657 = vmatpush3.bf16.msra.mxu0 %v9770_v55 }
 0xaac   :  { %8658 = vmatprep.subr.bf16.mxu0 %v10143_v18 }
 0xaaf   :  { %8659 = vmatpush3.bf16.msra.mxu0 %v9771_v34  ;;  %v9801_v34 = vld [vmem:[#allocation13 + $0x100] sm:$0xff]  }
 0xab0   :  { %8660 = vmatprep.subr.bf16.mxu0 %v10143_v18 }
 0xab3   :  { %8661 = vmatpush3.bf16.msra.mxu0 %v9772_v56 }
 0xab4   :  { %8662 = vmatprep.subr.bf16.mxu0 %v10143_v18 }
 0xab7   :  { %8663 = vmatpush3.bf16.msra.mxu0 %v9773_v12 }
 0xab8   :  { %8664 = vmatprep.subr.bf16.mxu0 %v10143_v18 }
 0xabb   :  { %8665 = vmatpush3.bf16.msra.mxu0 %v9774_v28 }
 0xabc   :  { %8666 = vmatprep.subr.bf16.mxu0 %v10143_v18 }
 0xabf   :  { %8667 = vmatpush3.bf16.msra.mxu0 %v9775_v59 }
 0xac0   :  { %8668 = vmatprep.subr.bf16.mxu0 %v10143_v18 }
 0xac3   :  { %8669 = vmatpush3.bf16.msra.mxu0 %v9776_v11  ;;  %v9802_v11 = vld [vmem:[#allocation13 + $0x108] sm:$0xff]  }
 0xac4   :  { %8674 = vmatprep.subr.bf16.mxu0 %v10143_v18 }
 0xb69   :  { %v6230_v3 = vpop.f32.mrb[144].mxu0 }
 0xb6a   :  { %v8640_v53 = vpop.f32.mrb[145].mxu0  ;;  %v6236_v58 = vpack.c.bf16 %v6230_v3, %v6230_v3  ;;  %v9803_v3 = vld [vmem:[#allocation13 + $0x110] sm:$0xff]  }
 0xb6b   :  { %v6233_v31 = vpop.f32.mrb[146].mxu0  ;;  %v9804_v53 = vld [vmem:[#allocation13 + $0x118] sm:$0xff]  }
 0xb6c   :  { %v8641_v23 = vpop.f32.mrb[147].mxu0  ;;  %v9805_v31 = vld [vmem:[#allocation13 + $0x120] sm:$0xff]  }
 0xb79   :  { %v6292_v25 = vpop.f32.mrb[148].mxu0 }
 0xb7a   :  { %v6298_v6 = vpack.c.bf16 %v6292_v25, %v6292_v25  ;;  %v8652_v8 = vpop.f32.mrb[149].mxu0 }
 0xb7b   :  { %v6295_v62 = vpop.f32.mrb[150].mxu0  ;;  %v9806_v8 = vld [vmem:[#allocation13 + $0x128] sm:$0xff]  }
 0xb7c   :  { %8671 = vmatmul.mubr.bf16.vlgmr.msra.gmra.mrb[152].mxu0 %v6298_v6  ;;  %v8653_v33 = vpop.f32.mrb[151].mxu0  ;;  %v9807_v62 = vld [vmem:[#allocation13 + $0x130] sm:$0xff]  }
 0xb7d   :  { %8675 = vmatpush3.bf16.msra.mxu0 %v9777_v1  ;;  %8690 = vmatprep.mubr.msk.bf16.mxu0 %vm10144_vm0, %v10143_v18  ;;  %v9808_v33 = vld [vmem:[#allocation13 + $0x138] sm:$0xff]  }
 0xb7e   :  { %8676 = vmatprep.subr.bf16.mxu0 %v10143_v18 }
 0xb81   :  { %8677 = vmatpush3.bf16.msra.mxu0 %v9778_v9 }
 0xb82   :  { %8678 = vmatprep.subr.bf16.mxu0 %v10143_v18 }
 0xb85   :  { %8679 = vmatpush3.bf16.msra.mxu0 %v9779_v61  ;;  %v9809_v61 = vld [vmem:[#allocation15] sm:$0xff]  }
 0xb86   :  { %8680 = vmatprep.subr.bf16.mxu0 %v10143_v18 }
 0xb89   :  { %8681 = vmatpush3.bf16.msra.mxu0 %v9780_v2  ;;  %v9810_v2 = vld [vmem:[#allocation15 + $0x8] sm:$0xff]  }
 0xb8a   :  { %8682 = vmatprep.subr.bf16.mxu0 %v10143_v18 }
 0xb8d   :  { %8683 = vmatpush3.bf16.msra.mxu0 %v9781_v13  ;;  %v9811_v13 = vld [vmem:[#allocation15 + $0x10] sm:$0xff]  }
 0xb8e   :  { %8684 = vmatprep.subr.bf16.mxu0 %v10143_v18 }
 0xb91   :  { %8685 = vmatpush3.bf16.msra.mxu0 %v9782_v43  ;;  %v9812_v43 = vld [vmem:[#allocation15 + $0x18] sm:$0xff]  }
 0xb92   :  { %8686 = vmatprep.subr.bf16.mxu0 %v10143_v18 }
 0xb95   :  { %8687 = vmatpush3.bf16.msra.mxu0 %v9783_v15  ;;  %v9813_v15 = vld [vmem:[#allocation15 + $0x20] sm:$0xff]  }
 0xb96   :  { %8688 = vmatprep.subr.bf16.mxu0 %v10143_v18 }
 0xb99   :  { %8689 = vmatpush3.bf16.msra.mxu0 %v9784_v19  ;;  %v9814_v19 = vld [vmem:[#allocation15 + $0x28] sm:$0xff]  }
 0xb9a   :  { %8694 = vmatprep.subr.bf16.mxu0 %v10143_v18 }
 0xb9c   :  { %8691 = vmatmul.mubr.bf16.vlgmr.msra.gmra.mrb[156].mxu0 %v6236_v58  ;;  %v9815_v58 = vld [vmem:[#allocation15 + $0x30] sm:$0xff]  }
 0xb9d   :  { %8695 = vmatpush3.bf16.msra.mxu0 %v11979_v29  ;;  %8702 = vmatprep.mubr.msk.bf16.mxu0 %vm10144_vm0, %v10143_v18 }
 0xb9e   :  { %8696 = vmatprep.subr.bf16.mxu0 %v10143_v18 }
 0xba1   :  { %8697 = vmatpush3.bf16.msra.mxu0 %v11977_v41 }
 0xba2   :  { %8698 = vmatprep.subr.bf16.mxu0 %v10143_v18 }
 0xba5   :  { %8699 = vmatpush3.bf16.msra.mxu0 %v11987_v20 }
 0xba6   :  { %8700 = vmatprep.subr.bf16.mxu0 %v10143_v18 }
 0xba9   :  { %8701 = vmatpush3.bf16.msra.mxu0 %v11984_v10 }
 0xbaa   :  { %8706 = vmatprep.subr.bf16.mxu0 %v10143_v18 }
 0xbac   :  { %8703 = vmatmul.mubr.msk.bf16.vlgmr.msra.gmra.mrb[160].mxu0 %vm6192_vm1, %v7653_v7  ;;  %v9816_v7 = vld [vmem:[#allocation15 + $0x38] sm:$0xff]  }
 0xbad   :  { %8707 = vmatpush3.bf16.msra.mxu0 %v9785_v27  ;;  %8722 = vmatprep.mubr.msk.bf16.mxu0 %vm10144_vm0, %v10143_v18  ;;  %v9817_v27 = vld [vmem:[#allocation18] sm:$0xff]  }
 0xbae   :  { %8708 = vmatprep.subr.bf16.mxu0 %v10143_v18 }
 0xbb1   :  { %8709 = vmatpush3.bf16.msra.mxu0 %v9786_v52  ;;  %v9818_v52 = vld [vmem:[#allocation18 + $0x8] sm:$0xff]  }
 0xbb2   :  { %8710 = vmatprep.subr.bf16.mxu0 %v10143_v18 }
 0xbb5   :  { %8711 = vmatpush3.bf16.msra.mxu0 %v9787_v57  ;;  %v9819_v57 = vld [vmem:[#allocation18 + $0x10] sm:$0xff]  }
 0xbb6   :  { %8712 = vmatprep.subr.bf16.mxu0 %v10143_v18 }
 0xbb9   :  { %8713 = vmatpush3.bf16.msra.mxu0 %v9788_v45  ;;  %v9820_v45 = vld [vmem:[#allocation18 + $0x18] sm:$0xff]  }
 0xbba   :  { %8714 = vmatprep.subr.bf16.mxu0 %v10143_v18 }
 0xbbd   :  { %8715 = vmatpush3.bf16.msra.mxu0 %v9789_v5  ;;  %v9821_v5 = vld [vmem:[#allocation18 + $0x20] sm:$0xff]  }
 0xbbe   :  { %8716 = vmatprep.subr.bf16.mxu0 %v10143_v18 }
 0xbc1   :  { %8717 = vmatpush3.bf16.msra.mxu0 %v9790_v0  ;;  %v9822_v0 = vld [vmem:[#allocation18 + $0x28] sm:$0xff]  }
 0xbc2   :  { %8718 = vmatprep.subr.bf16.mxu0 %v10143_v18 }
 0xbc5   :  { %8719 = vmatpush3.bf16.msra.mxu0 %v9791_v46 }
 0xbc6   :  { %8720 = vmatprep.subr.bf16.mxu0 %v10143_v18 }
 0xbc9   :  { %8721 = vmatpush3.bf16.msra.mxu0 %v9792_v39 }
 0xbca   :  { %8726 = vmatprep.subr.bf16.mxu0 %v10143_v18 }
 0xc4f   :  { %v6398_v32 = vpop.f32.mrb[152].mxu0 }
 0xc50   :  { %v8672_v50 = vpop.f32.mrb[153].mxu0 }
 0xc51   :  { %v6401_v63 = vpop.f32.mrb[154].mxu0 }
 0xc52   :  { %v8673_v36 = vpop.f32.mrb[155].mxu0 }
 0xc6f   :  { %v6486_v22 = vpop.f32.mrb[156].mxu0 }
 0xc70   :  { %v6487_v51 = vadd.f32 %v6486_v22, %v6398_v32  ;;  %v8692_v26 = vpop.f32.mrb[157].mxu0  ;;  %v7683_v32 = vld [vmem:[%s12140_s12] ss:$0 sm:$0xff] }
 0xc71   :  { %v6489_v16 = vpop.f32.mrb[158].mxu0 }
 0xc72   :  { %v8693_v38 = vpop.f32.mrb[159].mxu0 }
 0xc73   :  { %v9823_v38 = vld [vmem:[#allocation18 + $0x30] sm:$0xff]  }
 0xc7f   :  { %v6531_v4 = vpop.f32.mrb[160].mxu0 }
 0xc80   :  { %v6537_v49 = vpack.c.bf16 %v6531_v4, %v6531_v4  ;;  %v8704_v24 = vpop.f32.mrb[161].mxu0  ;;  %v9824_v4 = vld [vmem:[#allocation18 + $0x38] sm:$0xff]  }
 0xc81   :  { %v6534_v17 = vpop.f32.mrb[162].mxu0 }
 0xc82   :  { %8723 = vmatmul.mubr.bf16.vlgmr.msra.gmra.mrb[164].mxu0 %v6537_v49  ;;  %v8705_v47 = vpop.f32.mrb[163].mxu0  ;;  %v7684_v49 = vld [vmem:[#allocation16] ss:$0 sm:$0xff] }
 0xc83   :  { %8727 = vmatpush3.bf16.msra.mxu0 %v11979_v29  ;;  %8734 = vmatprep.mubr.msk.bf16.mxu0 %vm10144_vm0, %v10143_v18 }
 0xc84   :  { %8728 = vmatprep.subr.bf16.mxu0 %v10143_v18 }
 0xc87   :  { %8729 = vmatpush3.bf16.msra.mxu0 %v11977_v41 }
 0xc88   :  { %8730 = vmatprep.subr.bf16.mxu0 %v10143_v18 }
 0xc8b   :  { %8731 = vmatpush3.bf16.msra.mxu0 %v11987_v20 }
 0xc8c   :  { %8732 = vmatprep.subr.bf16.mxu0 %v10143_v18 }
 0xc8f   :  { %8733 = vmatpush3.bf16.msra.mxu0 %v11984_v10 }
 0xc90   :  { %8758 = vmatprep.subr.bf16.mxu0 %v10143_v18 }
 0xc92   :  { %8735 = vmatmul.mubr.msk.bf16.vlgmr.msra.gmra.mrb[168].mxu0 %vm6192_vm1, %v7663_v14 }
 0xc93   :  { %8759 = vmatpush3.bf16.msra.mxu0 %v11979_v29  ;;  %8766 = vmatprep.mubr.msk.bf16.mxu0 %vm10144_vm0, %v10143_v18  ;;  %v9798_v29 = vld [vmem:[#allocation13 + $0xe8] sm:$0xff]  }
 0xc94   :  { %8760 = vmatprep.subr.bf16.mxu0 %v10143_v18 }
 0xc97   :  { %8761 = vmatpush3.bf16.msra.mxu0 %v11977_v41  ;;  %v9797_v41 = vld [vmem:[#allocation13 + $0xe0] sm:$0xff]  }
 0xc98   :  { %8762 = vmatprep.subr.bf16.mxu0 %v10143_v18  ;;  %8747 = vmatpush3.bf16.msra.mxu1 %v9797_v41 }
 0xc99   :  { %8748 = vmatprep.subr.bf16.mxu1 %v10143_v18 }
 0xc9b   :  { %8763 = vmatpush3.bf16.msra.mxu0 %v11987_v20 }
 0xc9c   :  { %8764 = vmatprep.subr.bf16.mxu0 %v10143_v18  ;;  %8749 = vmatpush3.bf16.msra.mxu1 %v9798_v29 }
 0xc9d   :  { %8750 = vmatprep.subr.bf16.mxu1 %v10143_v18 }
 0xc9f   :  { %8765 = vmatpush3.bf16.msra.mxu0 %v11984_v10 }
 0xca0   :  { %8790 = vmatprep.subr.bf16.mxu0 %v10143_v18  ;;  %8751 = vmatpush3.bf16.msra.mxu1 %v9799_v30  ;;  %v7693_v30 = vld [vmem:[#allocation19] ss:$0 sm:$0xff] }
 0xca1   :  { %8752 = vmatprep.subr.bf16.mxu1 %v10143_v18 }
 0xca2   :  { %8767 = vmatmul.mubr.msk.bf16.vlgmr.msra.gmra.mrb[172].mxu0 %vm6192_vm1, %v7673_v42 }
 0xca3   :  { %8806 = vmatprep.mubr.msk.bf16.mxu0 %vm10144_vm0, %v10143_v18  ;;  %8791 = vmatpush3.bf16.msra.mxu0 %v9809_v61 }
 0xca4   :  { %8753 = vmatpush3.bf16.msra.mxu1 %v9800_v40  ;;  %8792 = vmatprep.subr.bf16.mxu0 %v10143_v18 }
 0xca5   :  { %8770 = vmatprep.subr.bf16.mxu1 %v10143_v18 }
 0xca7   :  { %8793 = vmatpush3.bf16.msra.mxu0 %v9810_v2 }
 0xca8   :  { %8794 = vmatprep.subr.bf16.mxu0 %v10143_v18 }
 0xcab   :  { %8795 = vmatpush3.bf16.msra.mxu0 %v9811_v13 }
 0xcac   :  { %8796 = vmatprep.subr.bf16.mxu0 %v10143_v18 }
 0xcaf   :  { %8797 = vmatpush3.bf16.msra.mxu0 %v9812_v43 }
 0xcb0   :  { %8798 = vmatprep.subr.bf16.mxu0 %v10143_v18 }
 0xcb3   :  { %8799 = vmatpush3.bf16.msra.mxu0 %v9813_v15 }
 0xcb4   :  { %8800 = vmatprep.subr.bf16.mxu0 %v10143_v18 }
 0xcb7   :  { %8801 = vmatpush3.bf16.msra.mxu0 %v9814_v19 }
 0xcb8   :  { %8802 = vmatprep.subr.bf16.mxu0 %v10143_v18 }
 0xcbb   :  { %8803 = vmatpush3.bf16.msra.mxu0 %v9815_v58 }
 0xcbc   :  { %8804 = vmatprep.subr.bf16.mxu0 %v10143_v18 }
 0xcbf   :  { %8805 = vmatpush3.bf16.msra.mxu0 %v9816_v7 }
 0xd55   :  { %v6637_v10 = vpop.f32.mrb[164].mxu0 }
 0xd56   :  { %v12093_v20 = vadd.f32 %v6637_v10, %v6487_v51  ;;  %v8724_v21 = vpop.f32.mrb[165].mxu0 }
 0xd57   :  { %v6640_v54 = vpop.f32.mrb[166].mxu0 }
 0xd58   :  { %v8725_v48 = vpop.f32.mrb[167].mxu0 }
 0xd65   :  { %v6683_v55 = vpop.f32.mrb[168].mxu0 }
 0xd66   :  { %v6689_v56 = vpack.c.bf16 %v6683_v55, %v6683_v55  ;;  %v8736_v12 = vpop.f32.mrb[169].mxu0 }
 0xd67   :  { %v6686_v28 = vpop.f32.mrb[170].mxu0 }
 0xd68   :  { %8755 = vmatmul.mubr.bf16.vlgmr.msra.gmra.mrb[96].mxu1 %v6689_v56  ;;  %v8737_v59 = vpop.f32.mrb[171].mxu0 }
 0xd69   :  { %8771 = vmatpush3.bf16.msra.mxu1 %v9801_v34  ;;  %8786 = vmatprep.mubr.msk.bf16.mxu1 %vm10144_vm0, %v10143_v18 }
 0xd6a   :  { %8772 = vmatprep.subr.bf16.mxu1 %v10143_v18 }
 0xd6d   :  { %8773 = vmatpush3.bf16.msra.mxu1 %v9802_v11 }
 0xd6e   :  { %8774 = vmatprep.subr.bf16.mxu1 %v10143_v18 }
 0xd71   :  { %8775 = vmatpush3.bf16.msra.mxu1 %v9803_v3 }
 0xd72   :  { %8776 = vmatprep.subr.bf16.mxu1 %v10143_v18 }
 0xd75   :  { %8777 = vmatpush3.bf16.msra.mxu1 %v9804_v53  ;;  %v6835_v23 = vpop.f32.mrb[172].mxu0 }
 0xd76   :  { %8778 = vmatprep.subr.bf16.mxu1 %v10143_v18  ;;  %v8768_v25 = vpop.f32.mrb[173].mxu0  ;;  %v6841_v9 = vpack.c.bf16 %v6835_v23, %v6835_v23 }
 0xd77   :  { %v6838_v1 = vpop.f32.mrb[174].mxu0 }
 0xd78   :  { %v8769_v6 = vpop.f32.mrb[175].mxu0 }
 0xd79   :  { %8779 = vmatpush3.bf16.msra.mxu1 %v9805_v31 }
 0xd7a   :  { %8780 = vmatprep.subr.bf16.mxu1 %v10143_v18 }
 0xd7d   :  { %8781 = vmatpush3.bf16.msra.mxu1 %v9806_v8 }
 0xd7e   :  { %8782 = vmatprep.subr.bf16.mxu1 %v10143_v18 }
 0xd81   :  { %8783 = vmatpush3.bf16.msra.mxu1 %v9807_v62 }
 0xd82   :  { %8784 = vmatprep.subr.bf16.mxu1 %v10143_v18 }
 0xd85   :  { %8785 = vmatpush3.bf16.msra.mxu1 %v9808_v33 }
 0xd86   :  { %8810 = vmatprep.subr.bf16.mxu1 %v10143_v18 }
 0xd88   :  { %8787 = vmatmul.mubr.bf16.vlgmr.msra.gmra.mrb[100].mxu1 %v6841_v9 }
 0xd89   :  { %8826 = vmatprep.mubr.msk.bf16.mxu1 %vm10144_vm0, %v10143_v18  ;;  %8811 = vmatpush3.bf16.msra.mxu1 %v9817_v27 }
 0xd8a   :  { %8812 = vmatprep.subr.bf16.mxu1 %v10143_v18 }
 0xd8d   :  { %8813 = vmatpush3.bf16.msra.mxu1 %v9818_v52 }
 0xd8e   :  { %8814 = vmatprep.subr.bf16.mxu1 %v10143_v18 }
 0xd91   :  { %8815 = vmatpush3.bf16.msra.mxu1 %v9819_v57 }
 0xd92   :  { %8816 = vmatprep.subr.bf16.mxu1 %v10143_v18 }
 0xd95   :  { %8817 = vmatpush3.bf16.msra.mxu1 %v9820_v45 }
 0xd96   :  { %8818 = vmatprep.subr.bf16.mxu1 %v10143_v18 }
 0xd99   :  { %8819 = vmatpush3.bf16.msra.mxu1 %v9821_v5 }
 0xd9a   :  { %8820 = vmatprep.subr.bf16.mxu1 %v10143_v18 }
 0xd9d   :  { %8821 = vmatpush3.bf16.msra.mxu1 %v9822_v0 }
 0xd9e   :  { %8822 = vmatprep.subr.bf16.mxu1 %v10143_v18 }
 0xda1   :  { %8823 = vmatpush3.bf16.msra.mxu1 %v9823_v38 }
 0xda2   :  { %8824 = vmatprep.subr.bf16.mxu1 %v10143_v18 }
 0xda5   :  { %8825 = vmatpush3.bf16.msra.mxu1 %v9824_v4 }
 0xe3b   :  { %v6789_v46 = vpop.f32.mrb[96].mxu1 }
 0xe3c   :  { %v6795_v39 = vadd.f32 %v6789_v46, %v12093_v20  ;;  %v8756_v37 = vpop.f32.mrb[97].mxu1 }
 0xe3d   :  { %v6792_v60 = vpop.f32.mrb[98].mxu1 }
 0xe3e   :  { %v8757_v35 = vpop.f32.mrb[99].mxu1 }
 0xe5b   :  { %v6941_v44 = vpop.f32.mrb[100].mxu1 }
 0xe5c   :  { %v6947_v50 = vadd.f32 %v6941_v44, %v6795_v39  ;;  %v8788_v63 = vpop.f32.mrb[101].mxu1 }
 0xe5d   :  { %v6944_v36 = vpop.f32.mrb[102].mxu1 }
 0xe5e   :  { %v6955_v22 = vadd.f32 %v7683_v32, %v6947_v50  ;;  %v8789_v51 = vpop.f32.mrb[103].mxu1 }
 0xe60   :  { %v6956_v26 = vmax.f32 %v6955_v22, 0.0 }
 0xe62   :  { %v6957_v16 = vpack.c.bf16 %v6956_v26, %v6956_v26 }
 0xe64   :  { %8807 = vmatmul.mubr.bf16.vlgmr.msra.gmra.mrb[176].mxu0 %v6957_v16 }
 0xf37   :  { %v7063_v24 = vpop.f32.mrb[176].mxu0 }
 0xf38   :  { %v7064_v17 = vadd.f32 %v7684_v49, %v7063_v24  ;;  %v8808_v47 = vpop.f32.mrb[177].mxu0 }
 0xf39   :  { %v7066_v14 = vpop.f32.mrb[178].mxu0 }
 0xf3a   :  { %v7069_v42 = vmax.f32 %v7064_v17, 0.0  ;;  %v8809_v41 = vpop.f32.mrb[179].mxu0 }
 0xf3c   :  { %v7070_v29 = vpack.c.bf16 %v7069_v42, %v7069_v42 }
 0xf3e   :  { %8827 = vmatmul.mubr.bf16.vlgmr.msra.gmra.mrb[104].mxu1 %v7070_v29 }
0x1011   :  { %v7176_v40 = vpop.f32.mrb[104].mxu1 }
0x1012   :  { %v7177_v10 = vadd.f32 %v7693_v30, %v7176_v40  ;;  %v8828_v20 = vpop.f32.mrb[105].mxu1 }
0x1013   :  { %v7179_v21 = vpop.f32.mrb[106].mxu1 }
0x1014   :  { %7182 = vst [vmem:[%s12162_s8] sm:$0xff] %v7177_v10  ;;  %v8829_v18 = vpop.f32.mrb[107].mxu1 }
0x1015   :  { %7187 = vsyncpa [#allocation3], 1 }
0x1016   :  { %7188 = vsyncpa [#allocation5], 1 }
0x1017   :  { %7189 = vsyncpa [#allocation8], 1 }
0x1018   :  { %7190 = vsyncpa [#allocation11], 1 }
0x1019   :  { %7191 = vsyncpa [#allocation14], 1 }
0x101a   :  { %7192 = vsyncpa [#allocation17], 1 }
0x101b   :  { %7193 = vsyncpa [#allocation20], 1 }

</bundles_post_ra>
